<compile_context>
chip_gen: v7x
topology: tpu7x:2x2x1
jax: 0.10.0
libtpu: 0.0.40
codegen_flags: <defaults>
</compile_context>

<pallas_src>
import jax
import jax.numpy as jnp
from jax import lax
from jax.experimental import pallas as pl
from jax.experimental.pallas import tpu as pltpu

# ----- cfg stand-ins (cfg.SEM.*, cfg.MODEL.*) ---------------------------------
FC_DIM = 128           # cfg.SEM.FC_DIM (reduced; lane-dense for the toy)
DEC_DIM = FC_DIM // 2  # decoder head width
NUM_CLASSES = 8        # cfg.MODEL.NUM_CLASSES
INPUT_SIZE = (16, 16)  # cfg.SEM.INPUT_SIZE
C_IN = 3               # RGB input to the encoder
KPACK = 32             # 9 * C_IN = 27 packed patch channels, padded to 32


# ----- Pallas kernel ----------------------------------------------------------
def _semseg_fused_kernel(x_ref, we_ref, be_ref, wd_ref, bd_ref, wct_ref, bc_ref,
                         o_ref, featp_ref, shift_ref, acc_ref):
    """Fused encoder conv3x3 -> decoder conv3x3 -> 1x1 classifier -> softmax.

    x_ref   : (1, H*W, KPACK)   bf16  pre-packed 3x3 RGB patches (27 real ch)
    we_ref  : (KPACK, FC)       bf16  packed encoder conv weights
    be_ref  : (1, FC)           f32
    wd_ref  : (9, FC, DEC)      bf16  decoder conv weights (one matrix per tap)
    bd_ref  : (1, DEC)          f32
    wct_ref : (NC, DEC)         bf16  classifier weights, pre-transposed
    bc_ref  : (NC, 1)           f32
    o_ref   : (1, NC, H*W)      f32   class-major, lane-dense (NCHW-ready)
    featp_ref : VMEM (H+2, W+2, FC) bf16  padded encoder features (never in HBM)
    shift_ref : VMEM (H+2, W, FC)   bf16  per-dj sublane-shifted copy
    acc_ref   : VMEM (H*W, DEC)     f32   decoder conv accumulator
    """
    hp, wp, fc = featp_ref.shape
    h, w = hp - 2, wp - 2
    hw = h * w

    # ---- encoder: 3x3 conv C_IN->FC as ONE K=KPACK MXU dot + bias + ReLU ----
    enc = jnp.dot(x_ref[0], we_ref[...], preferred_element_type=jnp.float32)
    enc = jnp.maximum(enc + be_ref[...], 0.0).astype(jnp.bfloat16)

    # ---- halo padding entirely in VMEM (zero border, write interior) ----
    featp_ref[...] = jnp.zeros_like(featp_ref)
    featp_ref[1:h + 1, 1:w + 1, :] = enc.reshape(h, w, fc)

    # ---- decoder 3x3 conv, taps grouped by the W (sublane) shift ----
    acc_ref[...] = jnp.zeros_like(acc_ref)
    for dj in range(3):                                   # 3 relayouts, not 9
        shift_ref[...] = featp_ref[:, dj:dj + w, :]
        for di in range(3):                               # H slices are free
            tap = shift_ref[di:di + h].reshape(hw, fc)
            acc_ref[...] += jnp.dot(tap, wd_ref[3 * di + dj],
                                    preferred_element_type=jnp.float32)
    dec = jnp.maximum(acc_ref[...] + bd_ref[...], 0.0).astype(jnp.bfloat16)

    # ---- 1x1 classifier, class-major: (NC,DEC) contracted with (HW,DEC) ----
    # MXU emits (NC, HW) directly -> no XLU transpose of the big probs array.
    logits = lax.dot_general(wct_ref[...], dec,
                             dimension_numbers=(((1,), (1,)), ((), ())),
                             preferred_element_type=jnp.float32) + bc_ref[...]

    # ---- softmax over the class (sublane) axis, f32 ----
    m = jnp.max(logits, axis=0, keepdims=True)
    e = jnp.exp(logits - m)
    denom = jnp.sum(e, axis=0, keepdims=True)
    inv = pl.reciprocal(denom, approx=True)               # EUP slot
    inv = inv * (2.0 - denom * inv)                       # one NR step
    o_ref[0] = (e * inv).astype(o_ref.dtype)              # (NC, H*W), lane-dense


# ----- pallas_call wrapper ----------------------------------------------------
def semseg_fused(patches, we_p, be, wd, bd, wct, bc_cm, *, H, W):
    B = patches.shape[0]
    NC, DEC = wct.shape
    FC = we_p.shape[-1]
    HW = H * W
    out = pl.pallas_call(
        _semseg_fused_kernel,
        out_shape=jax.ShapeDtypeStruct((B, NC, HW), jnp.float32),
        grid_spec=pltpu.PrefetchScalarGridSpec(
            num_scalar_prefetch=0,
            grid=(B,),
            in_specs=[
                pl.BlockSpec((1, HW, KPACK), lambda i: (i, 0, 0)),
                pl.BlockSpec((KPACK, FC), lambda i: (0, 0)),
                pl.BlockSpec((1, FC), lambda i: (0, 0)),
                pl.BlockSpec((9, FC, DEC), lambda i: (0, 0, 0)),
                pl.BlockSpec((1, DEC), lambda i: (0, 0)),
                pl.BlockSpec((NC, DEC), lambda i: (0, 0)),
                pl.BlockSpec((NC, 1), lambda i: (0, 0)),
            ],
            out_specs=pl.BlockSpec((1, NC, HW), lambda i: (i, 0, 0)),
            scratch_shapes=[
                pltpu.VMEM((H + 2, W + 2, FC), jnp.bfloat16),   # padded features
                pltpu.VMEM((H + 2, W, FC), jnp.bfloat16),       # dj-shifted copy
                pltpu.VMEM((HW, DEC), jnp.float32),             # decoder acc
            ],
        ),
        compiler_params=pltpu.CompilerParams(
            dimension_semantics=("parallel",),
            vmem_limit_bytes=32 * 1024 * 1024,
        ),
    )(patches, we_p, be, wd, bd, wct, bc_cm)
    return out.reshape(B, NC, H, W)       # free reshape: already NCHW order


# ----- model ------------------------------------------------------------------
def init_params(key):
    """Deterministic parameter init (per-tap matmul-form conv weights, bf16)."""
    k1, k2, k3, k4, k5, k6 = jax.random.split(key, 6)
    s = 0.1
    return {
        # encoder: 3x3 conv C_IN -> FC_DIM  (stand-in for the ResNet encoder)
        "enc_w": (s * jax.random.normal(k1, (9, C_IN, FC_DIM))).astype(jnp.bfloat16),
        "enc_b": 0.01 * jax.random.normal(k4, (1, FC_DIM), jnp.float32),
        # decoder head: 3x3 conv FC_DIM -> DEC_DIM
        "dec_w": (s * jax.random.normal(k2, (9, FC_DIM, DEC_DIM))).astype(jnp.bfloat16),
        "dec_b": 0.01 * jax.random.normal(k5, (1, DEC_DIM), jnp.float32),
        # classifier: 1x1 conv DEC_DIM -> NUM_CLASSES (+ softmax at inference)
        "cls_w": (s * jax.random.normal(k3, (DEC_DIM, NUM_CLASSES))).astype(jnp.bfloat16),
        "cls_b": 0.01 * jax.random.normal(k6, (1, NUM_CLASSES), jnp.float32),
    }


def generalized_semseg_forward(data_nchw, params):
    """Inference branch of Generalized_SEMSEG.forward (net.eval())."""
    B, Cin, H, W = data_nchw.shape
    # One layout transpose at the entry (NCHW -> NHWC puts channels on lanes).
    x = jnp.transpose(data_nchw, (0, 2, 3, 1)).astype(jnp.bfloat16)

    # Pre-pack the 9 shifted RGB slices -> (B, H*W, KPACK) so the encoder conv
    # becomes a single K=KPACK MXU dot (input is tiny: 9x an RGB tensor).
    xp = jnp.pad(x, ((0, 0), (1, 1), (1, 1), (0, 0)))
    patches = jnp.concatenate(
        [xp[:, di:di + H, dj:dj + W, :] for di in range(3) for dj in range(3)],
        axis=-1)                                              # (B, H, W, 9*Cin)
    patches = jnp.pad(patches, ((0, 0), (0, 0), (0, 0), (0, KPACK - 9 * Cin)))
    patches = patches.reshape(B, H * W, KPACK)

    # Weight repacks (tiny, one-off XLA ops).
    we_p = jnp.pad(params["enc_w"].reshape(9 * Cin, FC_DIM),
                   ((0, KPACK - 9 * Cin), (0, 0)))            # (KPACK, FC) bf16
    wct = params["cls_w"].T                                   # (NC, DEC)  bf16
    bc_cm = params["cls_b"].reshape(NUM_CLASSES, 1)           # (NC, 1)    f32

    # encoder -> decoder(use_softmax=True, segSize=cfg.SEM.INPUT_SIZE), fused.
    pred = semseg_fused(patches, we_p, params["enc_b"], params["dec_w"],
                        params["dec_b"], wct, bc_cm, H=H, W=W)

    # the module's inference asserts
    assert pred.shape[1] == NUM_CLASSES, "need to predict for all class"
    assert (pred.shape[-1] == INPUT_SIZE[-1]
            and pred.shape[-2] == INPUT_SIZE[-2]), "need full size output"
    return {"pred_semseg": pred}


# ----- pure-JAX reference (mirrors the kernel's bf16 rounding points) ---------
def _reference_forward(data_nchw, params):
    x = jnp.transpose(data_nchw, (0, 2, 3, 1)).astype(jnp.bfloat16).astype(jnp.float32)

    def conv3x3_relu(inp, w9, b):
        B, H, W, _ = inp.shape
        xp = jnp.pad(inp, ((0, 0), (1, 1), (1, 1), (0, 0)))
        acc = jnp.zeros((B, H, W, w9.shape[-1]), jnp.float32)
        for t in range(9):
            di, dj = divmod(t, 3)
            acc = acc + jnp.einsum("bhwc,cf->bhwf",
                                   xp[:, di:di + H, dj:dj + W, :],
                                   w9[t].astype(jnp.float32))
        return jnp.maximum(acc + b.reshape(1, 1, 1, -1), 0.0)

    feat = conv3x3_relu(x, params["enc_w"], params["enc_b"])
    feat = feat.astype(jnp.bfloat16).astype(jnp.float32)
    dec = conv3x3_relu(feat, params["dec_w"], params["dec_b"])
    dec = dec.astype(jnp.bfloat16).astype(jnp.float32)
    logits = jnp.einsum("bhwc,cn->bhwn", dec, params["cls_w"].astype(jnp.float32))
    logits = logits + params["cls_b"].reshape(1, 1, 1, -1)
    probs = jax.nn.softmax(logits, axis=-1)
    return jnp.transpose(probs, (0, 3, 1, 2))


if __name__ == "__main__":
    key = jax.random.PRNGKey(0)
    kdata, kparam = jax.random.split(key)

    data = jax.random.normal(kdata, (2, C_IN, INPUT_SIZE[0], INPUT_SIZE[1]),
                             jnp.float32)
    params = init_params(kparam)

    out = generalized_semseg_forward(data, params)
    pred = jax.block_until_ready(out["pred_semseg"])

    # mimic the module's inference checks: softmax output, full size, all classes
    assert pred.shape == (2, NUM_CLASSES, INPUT_SIZE[0], INPUT_SIZE[1])
    assert int(jnp.sum(pred < 0)) == 0, "need to output softmax"
    assert bool(jnp.allclose(jnp.sum(pred, axis=1), 1.0, atol=1e-3))

    # numerical check against a pure-JAX reference
    ref = _reference_forward(data, params)
    max_err = float(jnp.max(jnp.abs(pred - ref)))
    assert max_err < 2e-3, f"kernel deviates from reference: {max_err}"

    print("KERNEL_OK")
</pallas_src>

<mosaic_0001>
module attributes {stable_mosaic.version = 11 : i64} {
  func.func @_semseg_fused_kernel(%arg0: i32, %arg1: memref<1x256x32xbf16, #tpu.memory_space<vmem>>, %arg2: memref<32x128xbf16, #tpu.memory_space<vmem>>, %arg3: memref<1x128xf32, #tpu.memory_space<vmem>>, %arg4: memref<9x128x64xbf16, #tpu.memory_space<vmem>>, %arg5: memref<1x64xf32, #tpu.memory_space<vmem>>, %arg6: memref<8x64xbf16, #tpu.memory_space<vmem>>, %arg7: memref<8x1xf32, #tpu.memory_space<vmem>>, %arg8: memref<1x8x256xf32, #tpu.memory_space<vmem>>, %arg9: memref<18x18x128xbf16, #tpu.memory_space<vmem>>, %arg10: memref<18x16x128xbf16, #tpu.memory_space<vmem>>, %arg11: memref<256x64xf32, #tpu.memory_space<vmem>>) attributes {dimension_semantics = [#tpu.dimension_semantics<parallel>], iteration_bounds = array<i64: 2>, scalar_prefetch = 0 : i64, scratch_operands = 3 : i64, tpu.core_type = #tpu.core_type<tc>, window_params = [{transform_indices = @transform_0, window_bounds = array<i64: 1, 256, 32>}, {pipeline_mode = #tpu.pipeline_mode<synchronous>, transform_indices = @transform_1, window_bounds = array<i64: 32, 128>}, {pipeline_mode = #tpu.pipeline_mode<synchronous>, transform_indices = @transform_2, window_bounds = array<i64: 1, 128>}, {pipeline_mode = #tpu.pipeline_mode<synchronous>, transform_indices = @transform_3, window_bounds = array<i64: 9, 128, 64>}, {pipeline_mode = #tpu.pipeline_mode<synchronous>, transform_indices = @transform_4, window_bounds = array<i64: 1, 64>}, {pipeline_mode = #tpu.pipeline_mode<synchronous>, transform_indices = @transform_5, window_bounds = array<i64: 8, 64>}, {pipeline_mode = #tpu.pipeline_mode<synchronous>, transform_indices = @transform_6, window_bounds = array<i64: 8, 1>}, {transform_indices = @transform_7, window_bounds = array<i64: 1, 8, 256>}]} {
    %c0 = arith.constant 0 : index
    %c0_0 = arith.constant 0 : index
    %c0_1 = arith.constant 0 : index
    %0 = vector.load %arg1[%c0, %c0_0, %c0_1] : memref<1x256x32xbf16, #tpu.memory_space<vmem>>, vector<1x256x32xbf16>
    %1 = vector.shape_cast %0 : vector<1x256x32xbf16> to vector<256x32xbf16>
    %c0_2 = arith.constant 0 : index
    %c0_3 = arith.constant 0 : index
    %2 = vector.load %arg2[%c0_2, %c0_3] : memref<32x128xbf16, #tpu.memory_space<vmem>>, vector<32x128xbf16>
    %cst = arith.constant dense<0.000000e+00> : vector<256x128xf32>
    %3 = tpu.matmul %1, %2, %cst {dimension_numbers = #tpu.dot_dimension_numbers<[1], [0], [0], [1], [0, 0, 1, 1], [], []>} : vector<256x32xbf16>, vector<32x128xbf16>, vector<256x128xf32> -> vector<256x128xf32>
    %c0_4 = arith.constant 0 : index
    %c0_5 = arith.constant 0 : index
    %4 = vector.load %arg3[%c0_4, %c0_5] : memref<1x128xf32, #tpu.memory_space<vmem>>, vector<1x128xf32>
    %5 = vector.broadcast %4 : vector<1x128xf32> to vector<256x128xf32>
    %6 = arith.addf %3, %5 : vector<256x128xf32>
    %cst_6 = arith.constant 0.000000e+00 : f32
    %7 = vector.broadcast %cst_6 : f32 to vector<256x128xf32>
    %8 = arith.maximumf %6, %7 : vector<256x128xf32>
    %9 = arith.truncf %8 : vector<256x128xf32> to vector<256x128xbf16>
    %cst_7 = arith.constant 0.000000e+00 : bf16
    %10 = vector.broadcast %cst_7 : bf16 to vector<18x18x128xbf16>
    %c0_8 = arith.constant 0 : index
    %c0_9 = arith.constant 0 : index
    %c0_10 = arith.constant 0 : index
    %11 = vector.load %arg9[%c0_8, %c0_9, %c0_10] : memref<18x18x128xbf16, #tpu.memory_space<vmem>>, vector<18x18x128xbf16>
    tpu.vector_store %arg9[%c0_8, %c0_9, %c0_10], %10 {strides = array<i32>} : memref<18x18x128xbf16, #tpu.memory_space<vmem>>, vector<18x18x128xbf16>,
    %12 = vector.shape_cast %9 : vector<256x128xbf16> to vector<16x16x128xbf16>
    %c1 = arith.constant 1 : index
    %c1_11 = arith.constant 1 : index
    %c0_12 = arith.constant 0 : index
    %13 = vector.load %arg9[%c1, %c1_11, %c0_12] : memref<18x18x128xbf16, #tpu.memory_space<vmem>>, vector<16x16x128xbf16>
    tpu.vector_store %arg9[%c1, %c1_11, %c0_12], %12 {strides = array<i32>} : memref<18x18x128xbf16, #tpu.memory_space<vmem>>, vector<16x16x128xbf16>,
    %cst_13 = arith.constant 0.000000e+00 : f32
    %14 = vector.broadcast %cst_13 : f32 to vector<256x64xf32>
    %c0_14 = arith.constant 0 : index
    %c0_15 = arith.constant 0 : index
    %15 = vector.load %arg11[%c0_14, %c0_15] : memref<256x64xf32, #tpu.memory_space<vmem>>, vector<256x64xf32>
    tpu.vector_store %arg11[%c0_14, %c0_15], %14 {strides = array<i32>} : memref<256x64xf32, #tpu.memory_space<vmem>>, vector<256x64xf32>,
    %c0_16 = arith.constant 0 : index
    %c0_17 = arith.constant 0 : index
    %c0_18 = arith.constant 0 : index
    %16 = vector.load %arg9[%c0_16, %c0_17, %c0_18] : memref<18x18x128xbf16, #tpu.memory_space<vmem>>, vector<18x16x128xbf16>
    %c0_19 = arith.constant 0 : index
    %c0_20 = arith.constant 0 : index
    %c0_21 = arith.constant 0 : index
    %17 = vector.load %arg10[%c0_19, %c0_20, %c0_21] : memref<18x16x128xbf16, #tpu.memory_space<vmem>>, vector<18x16x128xbf16>
    tpu.vector_store %arg10[%c0_19, %c0_20, %c0_21], %16 {strides = array<i32>} : memref<18x16x128xbf16, #tpu.memory_space<vmem>>, vector<18x16x128xbf16>,
    %c0_22 = arith.constant 0 : index
    %c0_23 = arith.constant 0 : index
    %c0_24 = arith.constant 0 : index
    %18 = vector.load %arg10[%c0_22, %c0_23, %c0_24] : memref<18x16x128xbf16, #tpu.memory_space<vmem>>, vector<16x16x128xbf16>
    %19 = vector.shape_cast %18 : vector<16x16x128xbf16> to vector<256x128xbf16>
    %c0_25 = arith.constant 0 : index
    %c0_26 = arith.constant 0 : index
    %20 = vector.load %arg11[%c0_25, %c0_26] : memref<256x64xf32, #tpu.memory_space<vmem>>, vector<256x64xf32>
    %c0_27 = arith.constant 0 : index
    %c0_28 = arith.constant 0 : index
    %c0_29 = arith.constant 0 : index
    %21 = vector.load %arg4[%c0_27, %c0_28, %c0_29] : memref<9x128x64xbf16, #tpu.memory_space<vmem>>, vector<1x128x64xbf16>
    %22 = vector.shape_cast %21 : vector<1x128x64xbf16> to vector<128x64xbf16>
    %cst_30 = arith.constant dense<0.000000e+00> : vector<256x64xf32>
    %23 = tpu.matmul %19, %22, %cst_30 {dimension_numbers = #tpu.dot_dimension_numbers<[1], [0], [0], [1], [0, 0, 1, 1], [], []>} : vector<256x128xbf16>, vector<128x64xbf16>, vector<256x64xf32> -> vector<256x64xf32>
    %24 = arith.addf %20, %23 : vector<256x64xf32>
    %c0_31 = arith.constant 0 : index
    %c0_32 = arith.constant 0 : index
    %25 = vector.load %arg11[%c0_31, %c0_32] : memref<256x64xf32, #tpu.memory_space<vmem>>, vector<256x64xf32>
    tpu.vector_store %arg11[%c0_31, %c0_32], %24 {strides = array<i32>} : memref<256x64xf32, #tpu.memory_space<vmem>>, vector<256x64xf32>,
    %c1_33 = arith.constant 1 : index
    %c0_34 = arith.constant 0 : index
    %c0_35 = arith.constant 0 : index
    %26 = vector.load %arg10[%c1_33, %c0_34, %c0_35] : memref<18x16x128xbf16, #tpu.memory_space<vmem>>, vector<16x16x128xbf16>
    %27 = vector.shape_cast %26 : vector<16x16x128xbf16> to vector<256x128xbf16>
    %c0_36 = arith.constant 0 : index
    %c0_37 = arith.constant 0 : index
    %28 = vector.load %arg11[%c0_36, %c0_37] : memref<256x64xf32, #tpu.memory_space<vmem>>, vector<256x64xf32>
    %c3 = arith.constant 3 : index
    %c0_38 = arith.constant 0 : index
    %c0_39 = arith.constant 0 : index
    %29 = vector.load %arg4[%c3, %c0_38, %c0_39] : memref<9x128x64xbf16, #tpu.memory_space<vmem>>, vector<1x128x64xbf16>
    %30 = vector.shape_cast %29 : vector<1x128x64xbf16> to vector<128x64xbf16>
    %cst_40 = arith.constant dense<0.000000e+00> : vector<256x64xf32>
    %31 = tpu.matmul %27, %30, %cst_40 {dimension_numbers = #tpu.dot_dimension_numbers<[1], [0], [0], [1], [0, 0, 1, 1], [], []>} : vector<256x128xbf16>, vector<128x64xbf16>, vector<256x64xf32> -> vector<256x64xf32>
    %32 = arith.addf %28, %31 : vector<256x64xf32>
    %c0_41 = arith.constant 0 : index
    %c0_42 = arith.constant 0 : index
    %33 = vector.load %arg11[%c0_41, %c0_42] : memref<256x64xf32, #tpu.memory_space<vmem>>, vector<256x64xf32>
    tpu.vector_store %arg11[%c0_41, %c0_42], %32 {strides = array<i32>} : memref<256x64xf32, #tpu.memory_space<vmem>>, vector<256x64xf32>,
    %c2 = arith.constant 2 : index
    %c0_43 = arith.constant 0 : index
    %c0_44 = arith.constant 0 : index
    %34 = vector.load %arg10[%c2, %c0_43, %c0_44] : memref<18x16x128xbf16, #tpu.memory_space<vmem>>, vector<16x16x128xbf16>
    %35 = vector.shape_cast %34 : vector<16x16x128xbf16> to vector<256x128xbf16>
    %c0_45 = arith.constant 0 : index
    %c0_46 = arith.constant 0 : index
    %36 = vector.load %arg11[%c0_45, %c0_46] : memref<256x64xf32, #tpu.memory_space<vmem>>, vector<256x64xf32>
    %c6 = arith.constant 6 : index
    %c0_47 = arith.constant 0 : index
    %c0_48 = arith.constant 0 : index
    %37 = vector.load %arg4[%c6, %c0_47, %c0_48] : memref<9x128x64xbf16, #tpu.memory_space<vmem>>, vector<1x128x64xbf16>
    %38 = vector.shape_cast %37 : vector<1x128x64xbf16> to vector<128x64xbf16>
    %cst_49 = arith.constant dense<0.000000e+00> : vector<256x64xf32>
    %39 = tpu.matmul %35, %38, %cst_49 {dimension_numbers = #tpu.dot_dimension_numbers<[1], [0], [0], [1], [0, 0, 1, 1], [], []>} : vector<256x128xbf16>, vector<128x64xbf16>, vector<256x64xf32> -> vector<256x64xf32>
    %40 = arith.addf %36, %39 : vector<256x64xf32>
    %c0_50 = arith.constant 0 : index
    %c0_51 = arith.constant 0 : index
    %41 = vector.load %arg11[%c0_50, %c0_51] : memref<256x64xf32, #tpu.memory_space<vmem>>, vector<256x64xf32>
    tpu.vector_store %arg11[%c0_50, %c0_51], %40 {strides = array<i32>} : memref<256x64xf32, #tpu.memory_space<vmem>>, vector<256x64xf32>,
    %c0_52 = arith.constant 0 : index
    %c1_53 = arith.constant 1 : index
    %c0_54 = arith.constant 0 : index
    %42 = vector.load %arg9[%c0_52, %c1_53, %c0_54] : memref<18x18x128xbf16, #tpu.memory_space<vmem>>, vector<18x16x128xbf16>
    %c0_55 = arith.constant 0 : index
    %c0_56 = arith.constant 0 : index
    %c0_57 = arith.constant 0 : index
    %43 = vector.load %arg10[%c0_55, %c0_56, %c0_57] : memref<18x16x128xbf16, #tpu.memory_space<vmem>>, vector<18x16x128xbf16>
    tpu.vector_store %arg10[%c0_55, %c0_56, %c0_57], %42 {strides = array<i32>} : memref<18x16x128xbf16, #tpu.memory_space<vmem>>, vector<18x16x128xbf16>,
    %c0_58 = arith.constant 0 : index
    %c0_59 = arith.constant 0 : index
    %c0_60 = arith.constant 0 : index
    %44 = vector.load %arg10[%c0_58, %c0_59, %c0_60] : memref<18x16x128xbf16, #tpu.memory_space<vmem>>, vector<16x16x128xbf16>
    %45 = vector.shape_cast %44 : vector<16x16x128xbf16> to vector<256x128xbf16>
    %c0_61 = arith.constant 0 : index
    %c0_62 = arith.constant 0 : index
    %46 = vector.load %arg11[%c0_61, %c0_62] : memref<256x64xf32, #tpu.memory_space<vmem>>, vector<256x64xf32>
    %c1_63 = arith.constant 1 : index
    %c0_64 = arith.constant 0 : index
    %c0_65 = arith.constant 0 : index
    %47 = vector.load %arg4[%c1_63, %c0_64, %c0_65] : memref<9x128x64xbf16, #tpu.memory_space<vmem>>, vector<1x128x64xbf16>
    %48 = vector.shape_cast %47 : vector<1x128x64xbf16> to vector<128x64xbf16>
    %cst_66 = arith.constant dense<0.000000e+00> : vector<256x64xf32>
    %49 = tpu.matmul %45, %48, %cst_66 {dimension_numbers = #tpu.dot_dimension_numbers<[1], [0], [0], [1], [0, 0, 1, 1], [], []>} : vector<256x128xbf16>, vector<128x64xbf16>, vector<256x64xf32> -> vector<256x64xf32>
    %50 = arith.addf %46, %49 : vector<256x64xf32>
    %c0_67 = arith.constant 0 : index
    %c0_68 = arith.constant 0 : index
    %51 = vector.load %arg11[%c0_67, %c0_68] : memref<256x64xf32, #tpu.memory_space<vmem>>, vector<256x64xf32>
    tpu.vector_store %arg11[%c0_67, %c0_68], %50 {strides = array<i32>} : memref<256x64xf32, #tpu.memory_space<vmem>>, vector<256x64xf32>,
    %c1_69 = arith.constant 1 : index
    %c0_70 = arith.constant 0 : index
    %c0_71 = arith.constant 0 : index
    %52 = vector.load %arg10[%c1_69, %c0_70, %c0_71] : memref<18x16x128xbf16, #tpu.memory_space<vmem>>, vector<16x16x128xbf16>
    %53 = vector.shape_cast %52 : vector<16x16x128xbf16> to vector<256x128xbf16>
    %c0_72 = arith.constant 0 : index
    %c0_73 = arith.constant 0 : index
    %54 = vector.load %arg11[%c0_72, %c0_73] : memref<256x64xf32, #tpu.memory_space<vmem>>, vector<256x64xf32>
    %c4 = arith.constant 4 : index
    %c0_74 = arith.constant 0 : index
    %c0_75 = arith.constant 0 : index
    %55 = vector.load %arg4[%c4, %c0_74, %c0_75] : memref<9x128x64xbf16, #tpu.memory_space<vmem>>, vector<1x128x64xbf16>
    %56 = vector.shape_cast %55 : vector<1x128x64xbf16> to vector<128x64xbf16>
    %cst_76 = arith.constant dense<0.000000e+00> : vector<256x64xf32>
    %57 = tpu.matmul %53, %56, %cst_76 {dimension_numbers = #tpu.dot_dimension_numbers<[1], [0], [0], [1], [0, 0, 1, 1], [], []>} : vector<256x128xbf16>, vector<128x64xbf16>, vector<256x64xf32> -> vector<256x64xf32>
    %58 = arith.addf %54, %57 : vector<256x64xf32>
    %c0_77 = arith.constant 0 : index
    %c0_78 = arith.constant 0 : index
    %59 = vector.load %arg11[%c0_77, %c0_78] : memref<256x64xf32, #tpu.memory_space<vmem>>, vector<256x64xf32>
    tpu.vector_store %arg11[%c0_77, %c0_78], %58 {strides = array<i32>} : memref<256x64xf32, #tpu.memory_space<vmem>>, vector<256x64xf32>,
    %c2_79 = arith.constant 2 : index
    %c0_80 = arith.constant 0 : index
    %c0_81 = arith.constant 0 : index
    %60 = vector.load %arg10[%c2_79, %c0_80, %c0_81] : memref<18x16x128xbf16, #tpu.memory_space<vmem>>, vector<16x16x128xbf16>
    %61 = vector.shape_cast %60 : vector<16x16x128xbf16> to vector<256x128xbf16>
    %c0_82 = arith.constant 0 : index
    %c0_83 = arith.constant 0 : index
    %62 = vector.load %arg11[%c0_82, %c0_83] : memref<256x64xf32, #tpu.memory_space<vmem>>, vector<256x64xf32>
    %c7 = arith.constant 7 : index
    %c0_84 = arith.constant 0 : index
    %c0_85 = arith.constant 0 : index
    %63 = vector.load %arg4[%c7, %c0_84, %c0_85] : memref<9x128x64xbf16, #tpu.memory_space<vmem>>, vector<1x128x64xbf16>
    %64 = vector.shape_cast %63 : vector<1x128x64xbf16> to vector<128x64xbf16>
    %cst_86 = arith.constant dense<0.000000e+00> : vector<256x64xf32>
    %65 = tpu.matmul %61, %64, %cst_86 {dimension_numbers = #tpu.dot_dimension_numbers<[1], [0], [0], [1], [0, 0, 1, 1], [], []>} : vector<256x128xbf16>, vector<128x64xbf16>, vector<256x64xf32> -> vector<256x64xf32>
    %66 = arith.addf %62, %65 : vector<256x64xf32>
    %c0_87 = arith.constant 0 : index
    %c0_88 = arith.constant 0 : index
    %67 = vector.load %arg11[%c0_87, %c0_88] : memref<256x64xf32, #tpu.memory_space<vmem>>, vector<256x64xf32>
    tpu.vector_store %arg11[%c0_87, %c0_88], %66 {strides = array<i32>} : memref<256x64xf32, #tpu.memory_space<vmem>>, vector<256x64xf32>,
    %c0_89 = arith.constant 0 : index
    %c2_90 = arith.constant 2 : index
    %c0_91 = arith.constant 0 : index
    %68 = vector.load %arg9[%c0_89, %c2_90, %c0_91] : memref<18x18x128xbf16, #tpu.memory_space<vmem>>, vector<18x16x128xbf16>
    %c0_92 = arith.constant 0 : index
    %c0_93 = arith.constant 0 : index
    %c0_94 = arith.constant 0 : index
    %69 = vector.load %arg10[%c0_92, %c0_93, %c0_94] : memref<18x16x128xbf16, #tpu.memory_space<vmem>>, vector<18x16x128xbf16>
    tpu.vector_store %arg10[%c0_92, %c0_93, %c0_94], %68 {strides = array<i32>} : memref<18x16x128xbf16, #tpu.memory_space<vmem>>, vector<18x16x128xbf16>,
    %c0_95 = arith.constant 0 : index
    %c0_96 = arith.constant 0 : index
    %c0_97 = arith.constant 0 : index
    %70 = vector.load %arg10[%c0_95, %c0_96, %c0_97] : memref<18x16x128xbf16, #tpu.memory_space<vmem>>, vector<16x16x128xbf16>
    %71 = vector.shape_cast %70 : vector<16x16x128xbf16> to vector<256x128xbf16>
    %c0_98 = arith.constant 0 : index
    %c0_99 = arith.constant 0 : index
    %72 = vector.load %arg11[%c0_98, %c0_99] : memref<256x64xf32, #tpu.memory_space<vmem>>, vector<256x64xf32>
    %c2_100 = arith.constant 2 : index
    %c0_101 = arith.constant 0 : index
    %c0_102 = arith.constant 0 : index
    %73 = vector.load %arg4[%c2_100, %c0_101, %c0_102] : memref<9x128x64xbf16, #tpu.memory_space<vmem>>, vector<1x128x64xbf16>
    %74 = vector.shape_cast %73 : vector<1x128x64xbf16> to vector<128x64xbf16>
    %cst_103 = arith.constant dense<0.000000e+00> : vector<256x64xf32>
    %75 = tpu.matmul %71, %74, %cst_103 {dimension_numbers = #tpu.dot_dimension_numbers<[1], [0], [0], [1], [0, 0, 1, 1], [], []>} : vector<256x128xbf16>, vector<128x64xbf16>, vector<256x64xf32> -> vector<256x64xf32>
    %76 = arith.addf %72, %75 : vector<256x64xf32>
    %c0_104 = arith.constant 0 : index
    %c0_105 = arith.constant 0 : index
    %77 = vector.load %arg11[%c0_104, %c0_105] : memref<256x64xf32, #tpu.memory_space<vmem>>, vector<256x64xf32>
    tpu.vector_store %arg11[%c0_104, %c0_105], %76 {strides = array<i32>} : memref<256x64xf32, #tpu.memory_space<vmem>>, vector<256x64xf32>,
    %c1_106 = arith.constant 1 : index
    %c0_107 = arith.constant 0 : index
    %c0_108 = arith.constant 0 : index
    %78 = vector.load %arg10[%c1_106, %c0_107, %c0_108] : memref<18x16x128xbf16, #tpu.memory_space<vmem>>, vector<16x16x128xbf16>
    %79 = vector.shape_cast %78 : vector<16x16x128xbf16> to vector<256x128xbf16>
    %c0_109 = arith.constant 0 : index
    %c0_110 = arith.constant 0 : index
    %80 = vector.load %arg11[%c0_109, %c0_110] : memref<256x64xf32, #tpu.memory_space<vmem>>, vector<256x64xf32>
    %c5 = arith.constant 5 : index
    %c0_111 = arith.constant 0 : index
    %c0_112 = arith.constant 0 : index
    %81 = vector.load %arg4[%c5, %c0_111, %c0_112] : memref<9x128x64xbf16, #tpu.memory_space<vmem>>, vector<1x128x64xbf16>
    %82 = vector.shape_cast %81 : vector<1x128x64xbf16> to vector<128x64xbf16>
    %cst_113 = arith.constant dense<0.000000e+00> : vector<256x64xf32>
    %83 = tpu.matmul %79, %82, %cst_113 {dimension_numbers = #tpu.dot_dimension_numbers<[1], [0], [0], [1], [0, 0, 1, 1], [], []>} : vector<256x128xbf16>, vector<128x64xbf16>, vector<256x64xf32> -> vector<256x64xf32>
    %84 = arith.addf %80, %83 : vector<256x64xf32>
    %c0_114 = arith.constant 0 : index
    %c0_115 = arith.constant 0 : index
    %85 = vector.load %arg11[%c0_114, %c0_115] : memref<256x64xf32, #tpu.memory_space<vmem>>, vector<256x64xf32>
    tpu.vector_store %arg11[%c0_114, %c0_115], %84 {strides = array<i32>} : memref<256x64xf32, #tpu.memory_space<vmem>>, vector<256x64xf32>,
    %c2_116 = arith.constant 2 : index
    %c0_117 = arith.constant 0 : index
    %c0_118 = arith.constant 0 : index
    %86 = vector.load %arg10[%c2_116, %c0_117, %c0_118] : memref<18x16x128xbf16, #tpu.memory_space<vmem>>, vector<16x16x128xbf16>
    %87 = vector.shape_cast %86 : vector<16x16x128xbf16> to vector<256x128xbf16>
    %c0_119 = arith.constant 0 : index
    %c0_120 = arith.constant 0 : index
    %88 = vector.load %arg11[%c0_119, %c0_120] : memref<256x64xf32, #tpu.memory_space<vmem>>, vector<256x64xf32>
    %c8 = arith.constant 8 : index
    %c0_121 = arith.constant 0 : index
    %c0_122 = arith.constant 0 : index
    %89 = vector.load %arg4[%c8, %c0_121, %c0_122] : memref<9x128x64xbf16, #tpu.memory_space<vmem>>, vector<1x128x64xbf16>
    %90 = vector.shape_cast %89 : vector<1x128x64xbf16> to vector<128x64xbf16>
    %cst_123 = arith.constant dense<0.000000e+00> : vector<256x64xf32>
    %91 = tpu.matmul %87, %90, %cst_123 {dimension_numbers = #tpu.dot_dimension_numbers<[1], [0], [0], [1], [0, 0, 1, 1], [], []>} : vector<256x128xbf16>, vector<128x64xbf16>, vector<256x64xf32> -> vector<256x64xf32>
    %92 = arith.addf %88, %91 : vector<256x64xf32>
    %c0_124 = arith.constant 0 : index
    %c0_125 = arith.constant 0 : index
    %93 = vector.load %arg11[%c0_124, %c0_125] : memref<256x64xf32, #tpu.memory_space<vmem>>, vector<256x64xf32>
    tpu.vector_store %arg11[%c0_124, %c0_125], %92 {strides = array<i32>} : memref<256x64xf32, #tpu.memory_space<vmem>>, vector<256x64xf32>,
    %c0_126 = arith.constant 0 : index
    %c0_127 = arith.constant 0 : index
    %94 = vector.load %arg11[%c0_126, %c0_127] : memref<256x64xf32, #tpu.memory_space<vmem>>, vector<256x64xf32>
    %c0_128 = arith.constant 0 : index
    %c0_129 = arith.constant 0 : index
    %95 = vector.load %arg5[%c0_128, %c0_129] : memref<1x64xf32, #tpu.memory_space<vmem>>, vector<1x64xf32>
    %96 = vector.broadcast %95 : vector<1x64xf32> to vector<256x64xf32>
    %97 = arith.addf %94, %96 : vector<256x64xf32>
    %cst_130 = arith.constant 0.000000e+00 : f32
    %98 = vector.broadcast %cst_130 : f32 to vector<256x64xf32>
    %99 = arith.maximumf %97, %98 : vector<256x64xf32>
    %100 = arith.truncf %99 : vector<256x64xf32> to vector<256x64xbf16>
    %c0_131 = arith.constant 0 : index
    %c0_132 = arith.constant 0 : index
    %101 = vector.load %arg6[%c0_131, %c0_132] : memref<8x64xbf16, #tpu.memory_space<vmem>>, vector<8x64xbf16>
    %cst_133 = arith.constant dense<0.000000e+00> : vector<8x256xf32>
    %102 = tpu.matmul %101, %100, %cst_133 {dimension_numbers = #tpu.dot_dimension_numbers<[1], [1], [0], [0], [0, 0, 1, 0], [], []>} : vector<8x64xbf16>, vector<256x64xbf16>, vector<8x256xf32> -> vector<8x256xf32>
    %c0_134 = arith.constant 0 : index
    %c0_135 = arith.constant 0 : index
    %103 = vector.load %arg7[%c0_134, %c0_135] : memref<8x1xf32, #tpu.memory_space<vmem>>, vector<8x1xf32>
    %104 = vector.broadcast %103 : vector<8x1xf32> to vector<8x256xf32>
    %105 = arith.addf %102, %104 : vector<8x256xf32>
    %cst_136 = arith.constant dense<0xFF800000> : vector<256xf32>
    %106 = vector.multi_reduction <maximumf>, %105, %cst_136 [0] : vector<8x256xf32> to vector<256xf32>
    %107 = vector.shape_cast %106 : vector<256xf32> to vector<1x256xf32>
    %108 = vector.broadcast %107 : vector<1x256xf32> to vector<8x256xf32>
    %109 = arith.subf %105, %108 : vector<8x256xf32>
    %110 = math.exp %109 : vector<8x256xf32>
    %cst_137 = arith.constant dense<0.000000e+00> : vector<256xf32>
    %111 = vector.multi_reduction <add>, %110, %cst_137 [0] : vector<8x256xf32> to vector<256xf32>
    %112 = vector.shape_cast %111 : vector<256xf32> to vector<1x256xf32>
    %113 = tpu.reciprocal %112 {approx = true} : vector<1x256xf32> -> vector<1x256xf32>
    %114 = arith.mulf %112, %113 : vector<1x256xf32>
    %cst_138 = arith.constant 2.000000e+00 : f32
    %115 = vector.broadcast %cst_138 : f32 to vector<1x256xf32>
    %116 = arith.subf %115, %114 : vector<1x256xf32>
    %117 = arith.mulf %113, %116 : vector<1x256xf32>
    %118 = vector.broadcast %117 : vector<1x256xf32> to vector<8x256xf32>
    %119 = arith.mulf %110, %118 : vector<8x256xf32>
    %c0_139 = arith.constant 0 : index
    %c0_140 = arith.constant 0 : index
    %c0_141 = arith.constant 0 : index
    %120 = vector.load %arg8[%c0_139, %c0_140, %c0_141] : memref<1x8x256xf32, #tpu.memory_space<vmem>>, vector<1x8x256xf32>
    %121 = vector.shape_cast %120 : vector<1x8x256xf32> to vector<8x256xf32>
    %122 = vector.shape_cast %119 : vector<8x256xf32> to vector<1x8x256xf32>
    tpu.vector_store %arg8[%c0_139, %c0_140, %c0_141], %122 {strides = array<i32>} : memref<1x8x256xf32, #tpu.memory_space<vmem>>, vector<1x8x256xf32>,
    return
  }
  func.func @transform_0(%arg0: i32) -> (i32, i32, i32) {
    %c0_i32 = arith.constant 0 : i32
    %c0_i32_0 = arith.constant 0 : i32
    %c0_i32_1 = arith.constant 0 : i32
    return %arg0, %c0_i32, %c0_i32_0 : i32, i32, i32
  }
  func.func @transform_1(%arg0: i32) -> (i32, i32) {
    %c0_i32 = arith.constant 0 : i32
    %c0_i32_0 = arith.constant 0 : i32
    %c0_i32_1 = arith.constant 0 : i32
    return %c0_i32, %c0_i32_0 : i32, i32
  }
  func.func @transform_2(%arg0: i32) -> (i32, i32) {
    %c0_i32 = arith.constant 0 : i32
    %c0_i32_0 = arith.constant 0 : i32
    %c0_i32_1 = arith.constant 0 : i32
    return %c0_i32, %c0_i32_0 : i32, i32
  }
  func.func @transform_3(%arg0: i32) -> (i32, i32, i32) {
    %c0_i32 = arith.constant 0 : i32
    %c0_i32_0 = arith.constant 0 : i32
    %c0_i32_1 = arith.constant 0 : i32
    %c0_i32_2 = arith.constant 0 : i32
    return %c0_i32, %c0_i32_0, %c0_i32_1 : i32, i32, i32
  }
  func.func @transform_4(%arg0: i32) -> (i32, i32) {
    %c0_i32 = arith.constant 0 : i32
    %c0_i32_0 = arith.constant 0 : i32
    %c0_i32_1 = arith.constant 0 : i32
    return %c0_i32, %c0_i32_0 : i32, i32
  }
  func.func @transform_5(%arg0: i32) -> (i32, i32) {
    %c0_i32 = arith.constant 0 : i32
    %c0_i32_0 = arith.constant 0 : i32
    %c0_i32_1 = arith.constant 0 : i32
    return %c0_i32, %c0_i32_0 : i32, i32
  }
  func.func @transform_6(%arg0: i32) -> (i32, i32) {
    %c0_i32 = arith.constant 0 : i32
    %c0_i32_0 = arith.constant 0 : i32
    %c0_i32_1 = arith.constant 0 : i32
    return %c0_i32, %c0_i32_0 : i32, i32
  }
  func.func @transform_7(%arg0: i32) -> (i32, i32, i32) {
    %c0_i32 = arith.constant 0 : i32
    %c0_i32_0 = arith.constant 0 : i32
    %c0_i32_1 = arith.constant 0 : i32
    return %arg0, %c0_i32, %c0_i32_0 : i32, i32, i32
  }
}

</mosaic_0001>

<bundles_post_ra>
// kernel: tpu_custom_call.1
= control target key start
LH: loop header
LB: loop body
LE: loop exit
PB: predicated region body
PF: predicated region fallthrough
CT: control target
= control target key end

     0   :  { %12 = vsyncpa [#allocation6], 0  ;;  %s8321_s0 = inlined_call_operand.vmem [shape: bf16[2,256,32], index: 0, kind: input, shape index: {}]   ;;  %s8322_s1 = inlined_call_operand.vmem [shape: bf16[32,128], index: 1, kind: input, shape index: {}]   ;;  %s8323_s2 = inlined_call_operand.vmem [shape: f32[1,128], index: 2, kind: input, shape index: {}]   ;;  %s8324_s3 = inlined_call_operand.vmem [shape: bf16[9,128,64], index: 3, kind: input, shape index: {}]   ;;  %s8325_s4 = inlined_call_operand.vmem [shape: f32[1,64], index: 4, kind: input, shape index: {}]   ;;  %s8326_s5 = inlined_call_operand.vmem [shape: bf16[8,64], index: 5, kind: input, shape index: {}]   ;;  %s8327_s6 = inlined_call_operand.vmem [shape: f32[8,1], index: 6, kind: input, shape index: {}]   ;;  %s8328_s7 = inlined_call_operand.hbm [shape: f32[2,8,256], index: 7, kind: output, shape index: {}]  }
   0x1   :  { %14 = vsyncpa [#allocation6 + $0x1], 0  ;;  %s7028_s24 = smov 0   ;;  %s7030_s25 = smov 0  }
   0x2   :  { %s7032_s26 = smov 0   ;;  %s7034_s27 = smov 0  }
   0x3 LB: > { %s7049_s28 = sadd.s32 4294967295, %s6983_s27   ;;  %s5558_s29 = sadd.s32 4294967294, %s6983_s27   ;;  %s6983_s27 = sphi %s7034_s27, %s8340_s27   ;;  %s6979_s26 = sphi %s7032_s26, %s8339_s26   ;;  %s6975_s25 = sphi %s7030_s25, %s8338_s25   ;;  %s6971_s24 = sphi %s7028_s24, %s8337_s24  }
   0x4   : > { %s7053_s30 = sadd.s32 1, %s6983_s27   ;;  %s179_s8 = sadd.s32 1, %s6979_s26 }
   0x5   : > { %s176_s9 = ssub.s32 %s6983_s27, %s7053_s30  ;;  %p189_p0 = scmp.ne.s32.totalorder %s6979_s26, %s6975_s25 }
   0x6   : > { %p177_p1 = scmp.eq.s32.totalorder %s176_s9, 0  ;;  %p190_p2 = scmp.eq.s32.totalorder %s7049_s28, 1 }
   0x7   : > { %p195_p3 = scmp.ne.s32.totalorder %s6975_s25, %s6971_s24  ;;  %p196_p4 = scmp.eq.s32.totalorder %s5558_s29, 1 }
   0x8   : > { %s7064_s10 = scalar_select %p177_p1, %s6979_s26, %s179_s8  }
   0x9   : > { %p7066_p5 = por %p190_p2, %p189_p0  ;;  %p7070_p6 = por %p196_p4, %p195_p3 }
   0xa   : > { %p5561_p7 = scmp.ge.s32.totalorder %s6983_s27, 1  ;;  %p240_p8 = scmp.lt.s32.totalorder %s6983_s27, 3 }
   0xc   : > { %p241_p9 = pnand %p5561_p7, %p240_p8 }
   0xd   : > { %v6733_v0 = vld [vmem:[%s8322_s1] sm:$0xff] (!%p241_p9)   ;;  %p272_p10 = scmp.lt.s32.totalorder (!%p241_p9), %s7049_s28, 1  ;;  %v6734_v1 = vld [vmem:[%s8322_s1 + $0x8] sm:$0xff] (!%p241_p9)   ;;  %vm413_vm0 = vcmask (!%p241_p9), 261120   ;;  %v6755_v22 = vld [vmem:[%s8324_s3 + $0x10] sm:$0xff] (!%p241_p9)   ;;  %v6985_v24 = vmov (!%p241_p9), 0  }
   0xe   : > { %244 = sbr.rel (%p241_p9) target bundleno = 1146 (0x47a), region = 48  ;;  %6215 = vmatprep.subr.bf16.mxu0 (!%p241_p9), %v6733_v0  ;;  %v6751_v2 = vld [vmem:[%s8324_s3] sm:$0xff] (!%p241_p9)   ;;  %v6753_v4 = vld [vmem:[%s8324_s3 + $0x8] sm:$0xff] (!%p241_p9)   ;;  %v6756_v23 = vld [vmem:[%s8324_s3 + $0xd0] sm:$0xff] (!%p241_p9)   ;;  %677 = vst [vmem:[#allocation2 + $0x18] sm:$0xf] (!%p241_p9), %v6985_v24  ;;  %6732 = vset.pattern.permute.xlu0 (!%p241_p9), %v6985_v24 }
   0xf   : > { %6216 = vmatpush3.bf16.msra.mxu0 (!%p241_p9), %v6733_v0  ;;  %v6752_v3 = vld [vmem:[%s8324_s3 + $0xc0] sm:$0xff] (!%p241_p9)   ;;  %6251 = vmatprep.subr.bf16.mxu1 (!%p241_p9), %v6751_v2  ;;  %v6754_v21 = vld [vmem:[%s8324_s3 + $0xc8] sm:$0xff] (!%p241_p9)   ;;  %671 = vst [vmem:[#allocation2] sm:$0xf] (!%p241_p9), %v6985_v24  ;;  %672 = vst [vmem:[#allocation2 + $0x4] sm:$0xf] (!%p241_p9), %v6985_v24 }
  0x10   : > { %6217 = vmatprep.subr.bf16.mxu0 (!%p241_p9), %v6734_v1  ;;  %6252 = vmatpush3.bf16.msra.mxu1 (!%p241_p9), %v6751_v2  ;;  %673 = vst [vmem:[#allocation2 + $0x8] sm:$0x1] (!%p241_p9), %v6985_v24  ;;  %674 = vst [vmem:[#allocation2 + $0xc] sm:$0xf] (!%p241_p9), %v6985_v24  ;;  %v6757_v25 = vld [vmem:[%s8324_s3 + $0x18] sm:$0xff] (!%p241_p9)   ;;  %v6759_v27 = vld [vmem:[%s8324_s3 + $0x20] sm:$0xff] (!%p241_p9)  }
  0x11   : > { %6253 = vmatprep.subr.bf16.mxu1 (!%p241_p9), %v6753_v4  ;;  %675 = vst [vmem:[#allocation2 + $0x10] sm:$0xf] (!%p241_p9), %v6985_v24  ;;  %676 = vst [vmem:[#allocation2 + $0x14] sm:$0x1] (!%p241_p9), %v6985_v24  ;;  %v6758_v26 = vld [vmem:[%s8324_s3 + $0xd8] sm:$0xff] (!%p241_p9)   ;;  %v6760_v28 = vld [vmem:[%s8324_s3 + $0xe0] sm:$0xff] (!%p241_p9)  }
  0x12   : > { %678 = vst [vmem:[#allocation2 + $0x1c] sm:$0xf] (!%p241_p9), %v6985_v24  ;;  %679 = vst [vmem:[#allocation2 + $0x20] sm:$0x1] (!%p241_p9), %v6985_v24  ;;  %v6761_v29 = vld [vmem:[%s8324_s3 + $0x28] sm:$0xff] (!%p241_p9)   ;;  %v6763_v31 = vld [vmem:[%s8324_s3 + $0x30] sm:$0xff] (!%p241_p9)  }
  0x13   : > { %6218 = vmatpush3.bf16.msra.mxu0 (!%p241_p9), %v6734_v1  ;;  %680 = vst [vmem:[#allocation2 + $0x24] sm:$0xf] (!%p241_p9), %v6985_v24  ;;  %681 = vst [vmem:[#allocation2 + $0x28] sm:$0xf] (!%p241_p9), %v6985_v24  ;;  %v6762_v30 = vld [vmem:[%s8324_s3 + $0xe8] sm:$0xff] (!%p241_p9)   ;;  %v6764_v32 = vld [vmem:[%s8324_s3 + $0xf0] sm:$0xff] (!%p241_p9)  }
  0x14   : > { %6299 = vmatprep.subr.bf16.mxu0 (!%p241_p9), %v6752_v3  ;;  %6254 = vmatpush3.bf16.msra.mxu1 (!%p241_p9), %v6753_v4  ;;  %682 = vst [vmem:[#allocation2 + $0x2c] sm:$0x1] (!%p241_p9), %v6985_v24  ;;  %683 = vst [vmem:[#allocation2 + $0x30] sm:$0xf] (!%p241_p9), %v6985_v24  ;;  %v6765_v33 = vld [vmem:[%s8324_s3 + $0x38] sm:$0xff] (!%p241_p9)   ;;  %v7172_v36 = vld [vmem:[%s8324_s3 + $0x180] sm:$0xff] (!%p241_p9)  }
  0x15   : > { %s273_s17 = scalar_select %p272_p10, %s7049_s28, 1  ;;  %6255 = vmatprep.subr.bf16.mxu1 %v6755_v22  ;;  %684 = vst [vmem:[#allocation2 + $0x34] sm:$0xf] %v6985_v24  ;;  %685 = vst [vmem:[#allocation2 + $0x38] sm:$0x1] %v6985_v24  ;;  %v6766_v34 = vld [vmem:[%s8324_s3 + $0xf8] sm:$0xff]  }
  0x16   : > { %686 = vst [vmem:[#allocation2 + $0x3c] sm:$0xf] %v6985_v24  ;;  %687 = vst [vmem:[#allocation2 + $0x40] sm:$0xf] %v6985_v24  ;;  %v6767_v35 = vld [vmem:[#allocation2] sm:$0xff]   ;;  %vm1129_vm1 = vcmask 1043456  }
  0x17   : > { %s5929_s22 = sshll.u32 %s273_s17, 7  ;;  %688 = vst [vmem:[#allocation2 + $0x44] sm:$0x1] %v6985_v24  ;;  %689 = vst [vmem:[#allocation2 + $0x48] sm:$0xf] %v6985_v24  ;;  %6267 = vmatprep.mubr.bf16.mxu1 %v6767_v35  ;;  %v7178_v37 = vld [vmem:[%s8324_s3 + $0x40] sm:$0xff]  }
  0x18   : > { %s7096_s13 = scalar_lea.vmem %s8321_s0, %s5929_s22  ;;  %6256 = vmatpush3.bf16.msra.mxu1 %v6755_v22  ;;  %690 = vst [vmem:[#allocation2 + $0x4c] sm:$0xf] %v6985_v24  ;;  %691 = vst [vmem:[#allocation2 + $0x50] sm:$0x1] %v6985_v24  ;;  %v7184_v38 = vld [vmem:[%s8323_s2] ss:$0 sm:$0xff] }
  0x19   : > { %v6735_v5 = vld [vmem:[%s7096_s13] sm:$0xff]   ;;  %v6736_v6 = vld [vmem:[%s7096_s13 + $0x8] sm:$0xff]   ;;  %v6737_v7 = vld [vmem:[%s7096_s13 + $0x10] sm:$0xff]   ;;  %692 = vst [vmem:[#allocation2 + $0x54] sm:$0xf] %v6985_v24  ;;  %6257 = vmatprep.subr.bf16.mxu1 %v6757_v25  ;;  %vm1136_vm5 = vcmask 1040384  }
  0x1a   : > { %6219 = vmatprep.mubr.msk.bf16.mxu0 %vm413_vm0, %v6735_v5  ;;  %v6738_v8 = vld [vmem:[%s7096_s13 + $0x18] sm:$0xff]   ;;  %v6739_v9 = vld [vmem:[%s7096_s13 + $0x20] sm:$0xff]   ;;  %v6740_v10 = vld [vmem:[%s7096_s13 + $0x28] sm:$0xff]   ;;  %693 = vst [vmem:[#allocation2 + $0x58] sm:$0xf] %v6985_v24  ;;  %vm1246_vm10 = vcmask 523264  }
  0x1b   : > { %6220 = vmatmul.mubr.msk.bf16.vlgmr.msra.gmra.mrb[0].mxu0 %vm413_vm0, %v6736_v6  ;;  %v6741_v11 = vld [vmem:[%s7096_s13 + $0x30] sm:$0xff]   ;;  %v6742_v12 = vld [vmem:[%s7096_s13 + $0x38] sm:$0xff]   ;;  %v6743_v13 = vld [vmem:[%s7096_s13 + $0x40] sm:$0xff]   ;;  %694 = vst [vmem:[#allocation2 + $0x5c] sm:$0x1] %v6985_v24  ;;  %vm4119_vm11 = vcmask 1046528  }
  0x1c   : > { %6223 = vmatprep.mubr.msk.bf16.mxu0 %vm413_vm0, %v6737_v7  ;;  %6300 = vmatpush3.bf16.msra.mxu0 %v6752_v3  ;;  %v6744_v14 = vld [vmem:[%s7096_s13 + $0x48] sm:$0xff]   ;;  %v6745_v15 = vld [vmem:[%s7096_s13 + $0x50] sm:$0xff]   ;;  %v6746_v16 = vld [vmem:[%s7096_s13 + $0x58] sm:$0xff]   ;;  %695 = vst [vmem:[#allocation2 + $0x60] sm:$0xf] %v6985_v24  ;;  %s269_s20 = sand.u32 1, %s6975_s25  }
  0x1d   : > { %v6747_v17 = vld [vmem:[%s7096_s13 + $0x60] sm:$0xff]   ;;  %v6748_v18 = vld [vmem:[%s7096_s13 + $0x68] sm:$0xff]   ;;  %v6749_v19 = vld [vmem:[%s7096_s13 + $0x70] sm:$0xff]   ;;  %6301 = vmatprep.subr.bf16.mxu0 %v6754_v21  ;;  %696 = vst [vmem:[#allocation2 + $0x64] sm:$0xf] %v6985_v24  ;;  %6258 = vmatpush3.bf16.msra.mxu1 %v6757_v25  ;;  %s5562_s21 = sshll.u32 %s269_s20, 4 }
  0x1e   : > { %v6750_v20 = vld [vmem:[%s7096_s13 + $0x78] sm:$0xff]   ;;  %697 = vst [vmem:[#allocation2 + $0x68] sm:$0x1] %v6985_v24  ;;  %698 = vst [vmem:[#allocation2 + $0x6c] sm:$0xf] %v6985_v24  ;;  %6259 = vmatprep.subr.bf16.mxu1 %v6759_v27  ;;  %s5962_s22 = sshll.u32 %s7049_s28, 8 }
  0x1f   : > { %699 = vst [vmem:[#allocation2 + $0x70] sm:$0xf] %v6985_v24  ;;  %700 = vst [vmem:[#allocation2 + $0x74] sm:$0x1] %v6985_v24  ;;  %vm1130_vm2 = vsmask.f32 7938  ;;  %s8279_s13 = scalar_lea.hbm %s8328_s7, %s5962_s22 }
  0x20   : > { %6302 = vmatpush3.bf16.msra.mxu0 %v6754_v21  ;;  %701 = vst [vmem:[#allocation2 + $0x78] sm:$0xf] %v6985_v24  ;;  %702 = vst [vmem:[#allocation2 + $0x7c] sm:$0xf] %v6985_v24  ;;  %vm805_vm3 = vsmask.f32 256 }
  0x21   : > { %6303 = vmatprep.subr.bf16.mxu0 %v6756_v23  ;;  %703 = vst [vmem:[#allocation2 + $0x80] sm:$0x1] %v6985_v24  ;;  %704 = vst [vmem:[#allocation2 + $0x84] sm:$0xf] %v6985_v24  ;;  %6260 = vmatpush3.bf16.msra.mxu1 %v6759_v27  ;;  %vm806_vm4 = vsmask.f32 4368 }
  0x22   : > { %705 = vst [vmem:[#allocation2 + $0x88] sm:$0xf] %v6985_v24  ;;  %706 = vst [vmem:[#allocation2 + $0x8c] sm:$0x1] %v6985_v24  ;;  %6261 = vmatprep.subr.bf16.mxu1 %v6761_v29  ;;  %v1141_v2 = vld [vmem:[#allocation2 + $0x18] sm:$0xf] }
  0x23   : > { %6224 = vmatmul.mubr.msk.bf16.gmra.mrb[4].mxu0 %vm413_vm0, %v6738_v8  ;;  %707 = vst [vmem:[#allocation2 + $0x90] sm:$0xf] %v6985_v24  ;;  %708 = vst [vmem:[#allocation2 + $0x94] sm:$0xf] %v6985_v24  ;;  %vm2654_vm9 = vsmask.f32 7424 }
  0x24   : > { %6227 = vmatprep.mubr.msk.bf16.mxu0 %vm413_vm0, %v6739_v9  ;;  %709 = vst [vmem:[#allocation2 + $0x98] sm:$0x1] %v6985_v24  ;;  %710 = vst [vmem:[#allocation2 + $0x9c] sm:$0xf] %v6985_v24  ;;  %6304 = vmatpush3.bf16.msra.mxu0 %v6756_v23  ;;  %s271_s23 = scalar_lea.vmem [#allocation5], %s5562_s21  ;;  %s5485_s14 = scalar_lea.sflag [#allocation6], %s269_s20 }
  0x25   : > { %711 = vst [vmem:[#allocation2 + $0xa0] sm:$0xf] %v6985_v24  ;;  %712 = vst [vmem:[#allocation2 + $0xa4] sm:$0x1] %v6985_v24  ;;  %6305 = vmatprep.subr.bf16.mxu0 %v6758_v26  ;;  %6262 = vmatpush3.bf16.msra.mxu1 %v6761_v29  ;;  %s5499_s29 = sshll.u32 %s271_s23, 4  ;;  %s6987_s28 = smov [#allocation5]   ;;  %s8281_s29 = int_to_ptr.vmem [resolvable:$true] %s5499_s29 }
  0x26   : > { %713 = vst [vmem:[#allocation2 + $0xa8] sm:$0xf] %v6985_v24  ;;  %714 = vst [vmem:[#allocation2 + $0xac] sm:$0xf] %v6985_v24  ;;  %6263 = vmatprep.subr.bf16.mxu1 %v6763_v31  ;;  %s6921_s15 = scalar_lea.vmem %s8281_s29, 256  ;;  %s6925_s16 = sshll.u32 %s6987_s28, 4  ;;  %s6926_s16 = int_to_ptr.vmem [resolvable:$false] %s6925_s16 }
  0x27   : > { %715 = vst [vmem:[#allocation2 + $0xb0] sm:$0x1] %v6985_v24  ;;  %716 = vst [vmem:[#allocation2 + $0xb4] sm:$0xf] %v6985_v24  ;;  %p6922_p11 = scmp.ne.s32.totalorder %s8281_s29, %s6921_s15  ;;  %s6927_s17 = scalar_lea.vmem %s6926_s16, 512 }
  0x28   : > { %717 = vst [vmem:[#allocation2 + $0xb8] sm:$0xf] %v6985_v24  ;;  %718 = vst [vmem:[#allocation2 + $0xbc] sm:$0x1] %v6985_v24  ;;  %6306 = vmatpush3.bf16.msra.mxu0 %v6758_v26  ;;  %p6928_p0 = scmp.lt.s32.totalorder %s8281_s29, %s6926_s16  ;;  %p6929_p1 = scmp.lt.s32.totalorder %s6927_s17, %s6921_s15 }
  0x29   : > { %719 = vst [vmem:[#allocation2 + $0xc0] sm:$0xf] %v6985_v24  ;;  %720 = vst [vmem:[#allocation2 + $0xc4] sm:$0xf] %v6985_v24  ;;  %6307 = vmatprep.subr.bf16.mxu0 %v6760_v28  ;;  %6264 = vmatpush3.bf16.msra.mxu1 %v6763_v31  ;;  %p6923_p12 = pnand %p6922_p11, %p7066_p5 }
  0x2a   : > { %721 = vst [vmem:[#allocation2 + $0xc8] sm:$0x1] %v6985_v24  ;;  %722 = vst [vmem:[#allocation2 + $0xcc] sm:$0xf] %v6985_v24  ;;  %6265 = vmatprep.subr.bf16.mxu1 %v6765_v33  ;;  %p6930_p2 = por %p6929_p1, %p6928_p0 }
  0x2b   : > { %6228 = vmatmul.mubr.msk.bf16.gmra.mrb[8].mxu0 %vm413_vm0, %v6740_v10  ;;  %723 = vst [vmem:[#allocation2 + $0xd0] sm:$0xf] %v6985_v24  ;;  %724 = vst [vmem:[#allocation2 + $0xd4] sm:$0x1] %v6985_v24  ;;  %v1132_v10 = vld [vmem:[#allocation2 + $0xc] sm:$0xf]  ;;  %p6924_p13 = pneg %p6923_p12 }
  0x2c   : > { %6231 = vmatprep.mubr.msk.bf16.mxu0 %vm413_vm0, %v6741_v11  ;;  %6308 = vmatpush3.bf16.msra.mxu0 %v6760_v28  ;;  %vm7193_vm6 = vmand %vm1129_vm1, %vm1130_vm2  ;;  %v1138_v24 = vld [vmem:[#allocation2 + $0x14] sm:$0x1] }
  0x2d   : > { %6309 = vmatprep.subr.bf16.mxu0 %v6762_v30  ;;  %6266 = vmatpush3.bf16.msra.mxu1 %v6765_v33  ;;  %vm7200_vm7 = vmor %vm805_vm3, %vm806_vm4  ;;  %p6931_p3 = pnand %p6930_p2, %p6924_p13 }
  0x2e   : > { %6347 = vmatprep.subr.bf16.mxu1 %v7172_v36  ;;  %vm7206_vm8 = vmand %vm1136_vm5, %vm805_vm3 }
  0x30   : > { %6310 = vmatpush3.bf16.msra.mxu0 %v6762_v30 }
  0x31   : > { %6311 = vmatprep.subr.bf16.mxu0 %v6764_v32 }
  0x33   : > { %6232 = vmatmul.mubr.msk.bf16.gmra.mrb[12].mxu0 %vm413_vm0, %v6742_v12 }
  0x34   : > { %6235 = vmatprep.mubr.msk.bf16.mxu0 %vm413_vm0, %v6743_v13  ;;  %6312 = vmatpush3.bf16.msra.mxu0 %v6764_v32 }
  0x35   : > { %6313 = vmatprep.subr.bf16.mxu0 %v6766_v34 }
  0x38   : > { %6314 = vmatpush3.bf16.msra.mxu0 %v6766_v34 }
  0x39   : > { %6395 = vmatprep.subr.bf16.mxu0 %v7178_v37 }
  0x3b   : > { %6236 = vmatmul.mubr.msk.bf16.gmra.mrb[16].mxu0 %vm413_vm0, %v6744_v14 }
  0x3c   : > { %6239 = vmatprep.mubr.msk.bf16.mxu0 %vm413_vm0, %v6745_v15 }
  0x43   : > { %6240 = vmatmul.mubr.msk.bf16.gmra.mrb[20].mxu0 %vm413_vm0, %v6746_v16 }
  0x44   : > { %6243 = vmatprep.mubr.msk.bf16.mxu0 %vm413_vm0, %v6747_v17 }
  0x4b   : > { %6244 = vmatmul.mubr.msk.bf16.gmra.mrb[24].mxu0 %vm413_vm0, %v6748_v18  ;;  %v1145_v18 = vld [vmem:[#allocation2 + $0x20] sm:$0x1] }
  0x4c   : > { %6247 = vmatprep.mubr.msk.bf16.mxu0 %vm413_vm0, %v6749_v19 }
  0x53   : > { %6248 = vmatmul.mubr.msk.bf16.gmra.mrb[28].mxu0 %vm413_vm0, %v6750_v20 }
  0xee   : > { %v6221_v39 = vpop.f32.mrb[0].mxu0 }
  0xef   : > { %v505_v40 = vadd.f32 %v6221_v39, %v7184_v38  ;;  %v496_v41 = vpop.f32.mrb[1].mxu0 }
  0xf0   : > { %v497_v42 = vadd.f32 %v7184_v38, %v496_v41  ;;  %v6222_v43 = vpop.f32.mrb[2].mxu0 }
  0xf1   : > { %v625_v44 = vmax.f32 %v505_v40, 0.0  ;;  %v508_v45 = vadd.f32 %v6222_v43, %v7184_v38  ;;  %v499_v46 = vpop.f32.mrb[3].mxu0 }
  0xf2   : > { %v623_v47 = vmax.f32 %v497_v42, 0.0  ;;  %v500_v48 = vadd.f32 %v7184_v38, %v499_v46  ;;  %v1155_v46 = vld [vmem:[#allocation2 + $0x30] sm:$0xf] }
  0xf3   : > { %v5932_v49 = vpack.c.bf16 %v625_v44, %v625_v44  ;;  %v626_v50 = vmax.f32 %v508_v45, 0.0 }
  0xf4   : > { %v5930_v51 = vpack.c.bf16 %v623_v47, %v623_v47  ;;  %v624_v52 = vmax.f32 %v500_v48, 0.0 }
  0xf5   : > { %v826_v53 = vshrl.u32 %v5932_v49, 16  ;;  %v5933_v54 = vpack.c.bf16 %v626_v50, %v626_v50  ;;  %v829_v55 = vshll.u32 %v5932_v49, 16 }
  0xf6   : > { %v809_v56 = vshrl.u32 %v5930_v51, 16  ;;  %v812_v57 = vshll.u32 %v5930_v51, 16  ;;  %v5931_v58 = vpack.c.bf16 %v624_v52, %v624_v52  ;;  %v6225_v59 = vpop.f32.mrb[4].mxu0 }
  0xf7   : > { %v828_v60 = vrot.slane %v826_v53, 7  ;;  %v834_v61 = vshrl.u32 %v5933_v54, 16  ;;  %v837_v62 = vshll.u32 %v5933_v54, 16  ;;  %v521_v63 = vadd.f32 %v6225_v59, %v7184_v38  ;;  %v512_v0 = vpop.f32.mrb[5].mxu0  ;;  %v1148_v53 = vld [vmem:[#allocation2 + $0x24] sm:$0xf] }
  0xf8   : > { %v811_v3 = vrot.slane %v809_v56, 7  ;;  %v817_v4 = vshrl.u32 %v5931_v58, 16  ;;  %v820_v5 = vshll.u32 %v5931_v58, 16  ;;  %v513_v6 = vadd.f32 %v7184_v38, %v512_v0  ;;  %v6226_v7 = vpop.f32.mrb[6].mxu0 }
  0xf9   : > { %v831_v8 = vor.u32 %v829_v55, %v828_v60  ;;  %v832_v9 = vrot.slane %v828_v60, 4  ;;  %v836_v12 = vrot.slane %v834_v61, 7  ;;  %v629_v13 = vmax.f32 %v521_v63, 0.0  ;;  %v515_v14 = vpop.f32.mrb[7].mxu0 }
  0xfa   : > { %v814_v15 = vor.u32 %v812_v57, %v811_v3  ;;  %v815_v16 = vrot.slane %v811_v3, 4  ;;  %v819_v19 = vrot.slane %v817_v4, 7  ;;  %v627_v20 = vmax.f32 %v513_v6, 0.0 }
  0xfb   : > { %v1142_v21 = vsel %vm7193_vm6, %v831_v8, %v1141_v2  ;;  %v839_v22 = vor.u32 %v837_v62, %v836_v12  ;;  %v841_v23 = vrot.slane %v836_v12, 4  ;;  %v5936_v25 = vpack.c.bf16 %v629_v13, %v629_v13  ;;  %v1159_v12 = vld [vmem:[#allocation2 + $0x38] sm:$0x1]  ;;  %v1152_v13 = vld [vmem:[#allocation2 + $0x2c] sm:$0x1] }
  0xfc   : > { %1143 = vst [vmem:[#allocation2 + $0x18] sm:$0xf] %v1142_v21  ;;  %v1133_v26 = vsel %vm7193_vm6, %v814_v15, %v1132_v10  ;;  %v822_v27 = vor.u32 %v820_v5, %v819_v19  ;;  %v824_v28 = vrot.slane %v819_v19, 4  ;;  %v5934_v29 = vpack.c.bf16 %v627_v20, %v627_v20  ;;  %v7245_v10 = vld [vmem:[%s8324_s3 + $0x188] sm:$0xff]  }
  0xfd   : > { %1134 = vst [vmem:[#allocation2 + $0xc] sm:$0xf] %v1133_v26  ;;  %v840_v30 = vsel %vm7200_vm7, %v832_v9, %v839_v22  ;;  %v1146_v31 = vsel %vm7206_vm8, %v841_v23, %v1145_v18  ;;  %v860_v32 = vshrl.u32 %v5936_v25, 16  ;;  %v863_v35 = vshll.u32 %v5936_v25, 16  ;;  %v1169_v23 = vld [vmem:[#allocation2 + $0x48] sm:$0xf] }
  0xfe   : > { %1144 = vst [vmem:[#allocation2 + $0x1c] sm:$0xf] %v840_v30  ;;  %1147 = vst [vmem:[#allocation2 + $0x20] sm:$0x1] %v1146_v31  ;;  %v823_v33 = vsel %vm7200_vm7, %v815_v16, %v822_v27  ;;  %v1139_v34 = vsel %vm7206_vm8, %v824_v28, %v1138_v24  ;;  %v843_v39 = vshrl.u32 %v5934_v29, 16  ;;  %v6229_v40 = vpop.f32.mrb[8].mxu0  ;;  %v524_v42 = vadd.f32 %v6226_v7, %v7184_v38 }
  0xff   : > { %1135 = vst [vmem:[#allocation2 + $0x10] sm:$0xf] %v823_v33  ;;  %1140 = vst [vmem:[#allocation2 + $0x14] sm:$0x1] %v1139_v34  ;;  %v7222_v41 = vrot.slane %v860_v32, 7  ;;  %v516_v43 = vadd.f32 %v7184_v38, %v515_v14  ;;  %v537_v44 = vadd.f32 %v6229_v40, %v7184_v38  ;;  %v528_v45 = vpop.f32.mrb[9].mxu0 }
 0x100   : > { %v7227_v47 = vrot.slane %v843_v39, 7  ;;  %v846_v48 = vshll.u32 %v5934_v29, 16  ;;  %v529_v49 = vadd.f32 %v7184_v38, %v528_v45  ;;  %v6230_v50 = vpop.f32.mrb[10].mxu0  ;;  %v630_v54 = vmax.f32 %v524_v42, 0.0  ;;  %v1162_v24 = vld [vmem:[#allocation2 + $0x3c] sm:$0xf] }
 0x101   : > { %v865_v51 = vor.u32 %v863_v35, %v7222_v41  ;;  %v866_v52 = vrot.slane %v7222_v41, 4  ;;  %v628_v55 = vmax.f32 %v516_v43, 0.0  ;;  %v531_v56 = vpop.f32.mrb[11].mxu0  ;;  %v633_v59 = vmax.f32 %v537_v44, 0.0  ;;  %v6784_v34 = vld [vmem:[%s8324_s3 + $0x48] sm:$0xff]  }
 0x102   : > { %v848_v57 = vor.u32 %v846_v48, %v7227_v47  ;;  %v849_v58 = vrot.slane %v7227_v47, 4  ;;  %v631_v60 = vmax.f32 %v529_v49, 0.0  ;;  %v5937_v62 = vpack.c.bf16 %v630_v54, %v630_v54 }
 0x103   : > { %v1156_v61 = vsel %vm7193_vm6, %v865_v51, %v1155_v46  ;;  %v5935_v63 = vpack.c.bf16 %v628_v55, %v628_v55  ;;  %v7237_v0 = vadd.f32 %v6230_v50, %v7184_v38  ;;  %v5940_v3 = vpack.c.bf16 %v633_v59, %v633_v59 }
 0x104   : > { %1157 = vst [vmem:[#allocation2 + $0x30] sm:$0xf] %v1156_v61  ;;  %v1149_v2 = vsel %vm7193_vm6, %v848_v57, %v1148_v53  ;;  %v5938_v4 = vpack.c.bf16 %v631_v60, %v631_v60  ;;  %v532_v5 = vadd.f32 %v7184_v38, %v531_v56  ;;  %v868_v6 = vshrl.u32 %v5937_v62, 16 }
 0x105   : > { %1150 = vst [vmem:[#allocation2 + $0x24] sm:$0xf] %v1149_v2  ;;  %v871_v7 = vshll.u32 %v5937_v62, 16  ;;  %v851_v8 = vshrl.u32 %v5935_v63, 16  ;;  %v854_v9 = vshll.u32 %v5935_v63, 16  ;;  %v894_v14 = vshrl.u32 %v5940_v3, 16 }
 0x106   : > { %v897_v15 = vshll.u32 %v5940_v3, 16  ;;  %v877_v16 = vshrl.u32 %v5938_v4, 16  ;;  %v880_v18 = vshll.u32 %v5938_v4, 16  ;;  %v6233_v19 = vpop.f32.mrb[12].mxu0  ;;  %v6768_v20 = vld [vmem:[#allocation2 + $0xc] sm:$0xff]   ;;  %v870_v21 = vrot.slane %v868_v6, 7 }
 0x107   : > { %v853_v22 = vrot.slane %v851_v8, 7  ;;  %v634_v25 = vmax.f32 %v7237_v0, 0.0  ;;  %v632_v26 = vmax.f32 %v532_v5, 0.0  ;;  %v544_v27 = vpop.f32.mrb[13].mxu0  ;;  %v7248_v28 = vld [vmem:[#allocation2 + $0x18] sm:$0xff]   ;;  %v7250_v29 = vrot.slane %v894_v14, 7  ;;  %6268 = vmatmul.mubr.bf16.vlgmr.msra.gmra.mrb[0].mxu1 %v6768_v20  ;;  %6315 = vmatprep.mubr.bf16.mxu0 %v6768_v20 }
 0x108   : > { %v7252_v30 = vrot.slane %v877_v16, 7  ;;  %v553_v31 = vadd.f32 %v6233_v19, %v7184_v38  ;;  %v545_v32 = vadd.f32 %v7184_v38, %v544_v27  ;;  %v6234_v33 = vpop.f32.mrb[14].mxu0  ;;  %v873_v35 = vor.u32 %v871_v7, %v870_v21  ;;  %6271 = vmatprep.mubr.bf16.mxu1 %v7248_v28  ;;  %6316 = vmatmul.mubr.bf16.vlgmr.msra.gmra.mrb[32].mxu0 %v7248_v28  ;;  %v7292_v0 = vld [vmem:[%s8324_s3 + $0x198] sm:$0xff]   ;;  %v1173_v2 = vld [vmem:[#allocation2 + $0x50] sm:$0x1] }
 0x109   : > { %v875_v39 = vrot.slane %v870_v21, 4  ;;  %v856_v40 = vor.u32 %v854_v9, %v853_v22  ;;  %v858_v41 = vrot.slane %v853_v22, 4  ;;  %v547_v42 = vpop.f32.mrb[15].mxu0  ;;  %v899_v43 = vor.u32 %v897_v15, %v7250_v29  ;;  %6348 = vmatpush3.bf16.msra.mxu1 %v7172_v36  ;;  %6396 = vmatpush3.bf16.msra.mxu0 %v7178_v37  ;;  %v6775_v36 = vld [vmem:[%s8324_s3 + $0x190] sm:$0xff]   ;;  %v6789_v8 = vld [vmem:[%s8324_s3 + $0x58] sm:$0xff]  }
 0x10a   : > { %v900_v44 = vrot.slane %v7250_v29, 4  ;;  %v882_v45 = vor.u32 %v880_v18, %v7252_v30  ;;  %v883_v46 = vrot.slane %v7252_v30, 4  ;;  %v874_v47 = vsel %vm7200_vm7, %v866_v52, %v873_v35  ;;  %6349 = vmatprep.subr.bf16.mxu1 %v7245_v10  ;;  %v6788_v37 = vld [vmem:[%s8324_s3 + $0x50] sm:$0xff]   ;;  %6397 = vmatprep.subr.bf16.mxu0 %v6784_v34 }
 0x10b   : > { %v1160_v48 = vsel %vm7206_vm8, %v875_v39, %v1159_v12  ;;  %v857_v49 = vsel %vm7200_vm7, %v849_v58, %v856_v40  ;;  %v1153_v50 = vsel %vm7206_vm8, %v858_v41, %v1152_v13  ;;  %1158 = vst [vmem:[#allocation2 + $0x34] sm:$0xf] %v874_v47  ;;  %v1170_v51 = vsel %vm7193_vm6, %v899_v43, %v1169_v23  ;;  %v1166_v12 = vld [vmem:[#allocation2 + $0x44] sm:$0x1]  ;;  %v1176_v27 = vld [vmem:[#allocation2 + $0x54] sm:$0xf] }
 0x10c   : > { %1161 = vst [vmem:[#allocation2 + $0x38] sm:$0x1] %v1160_v48  ;;  %1151 = vst [vmem:[#allocation2 + $0x28] sm:$0xf] %v857_v49  ;;  %v1163_v52 = vsel %vm7193_vm6, %v882_v45, %v1162_v24  ;;  %v5941_v53 = vpack.c.bf16 %v634_v25, %v634_v25  ;;  %v5939_v54 = vpack.c.bf16 %v632_v26, %v632_v26  ;;  %v637_v55 = vmax.f32 %v553_v31, 0.0  ;;  %v7306_v31 = vld [vmem:[%s8324_s3 + $0x1a0] sm:$0xff]  }
 0x10d   : > { %1154 = vst [vmem:[#allocation2 + $0x2c] sm:$0x1] %v1153_v50  ;;  %1171 = vst [vmem:[#allocation2 + $0x48] sm:$0xf] %v1170_v51  ;;  %v635_v56 = vmax.f32 %v545_v32, 0.0  ;;  %v556_v57 = vadd.f32 %v6234_v33, %v7184_v38  ;;  %v548_v58 = vadd.f32 %v7184_v38, %v547_v42  ;;  %6350 = vmatpush3.bf16.msra.mxu1 %v7245_v10  ;;  %6398 = vmatpush3.bf16.msra.mxu0 %v6784_v34  ;;  %v7311_v32 = vld [vmem:[%s8324_s3 + $0x60] sm:$0xff]  }
 0x10e   : > { %1164 = vst [vmem:[#allocation2 + $0x3c] sm:$0xf] %v1163_v52  ;;  %v902_v59 = vshrl.u32 %v5941_v53, 16  ;;  %v905_v60 = vshll.u32 %v5941_v53, 16  ;;  %v885_v61 = vshrl.u32 %v5939_v54, 16  ;;  %v888_v62 = vshll.u32 %v5939_v54, 16  ;;  %6351 = vmatprep.subr.bf16.mxu1 %v6775_v36  ;;  %6399 = vmatprep.subr.bf16.mxu0 %v6788_v37 }
 0x10f   : > { %v6237_v63 = vpop.f32.mrb[16].mxu0  ;;  %v5944_v3 = vpack.c.bf16 %v637_v55, %v637_v55  ;;  %v5942_v4 = vpack.c.bf16 %v635_v56, %v635_v56  ;;  %v638_v5 = vmax.f32 %v556_v57, 0.0  ;;  %v636_v6 = vmax.f32 %v548_v58, 0.0  ;;  %v1183_v26 = vld [vmem:[#allocation2 + $0x60] sm:$0xf] }
 0x110   : > { %v560_v7 = vpop.f32.mrb[17].mxu0  ;;  %v904_v9 = vrot.slane %v902_v59, 7  ;;  %v887_v10 = vrot.slane %v885_v61, 7  ;;  %v7298_v13 = vadd.f32 %v6237_v63, %v7184_v38  ;;  %v1187_v53 = vld [vmem:[#allocation2 + $0x68] sm:$0x1] }
 0x111   : > { %v7301_v14 = vadd.f32 %v7184_v38, %v560_v7  ;;  %v6238_v15 = vpop.f32.mrb[18].mxu0  ;;  %v928_v16 = vshrl.u32 %v5944_v3, 16  ;;  %v931_v18 = vshll.u32 %v5944_v3, 16  ;;  %v911_v19 = vshrl.u32 %v5942_v4, 16  ;;  %6352 = vmatpush3.bf16.msra.mxu1 %v6775_v36  ;;  %6400 = vmatpush3.bf16.msra.mxu0 %v6788_v37  ;;  %v1180_v63 = vld [vmem:[#allocation2 + $0x5c] sm:$0x1] }
 0x112   : > { %v914_v20 = vshll.u32 %v5942_v4, 16  ;;  %v563_v21 = vpop.f32.mrb[19].mxu0  ;;  %v907_v22 = vor.u32 %v905_v60, %v904_v9  ;;  %v909_v23 = vrot.slane %v904_v9, 4  ;;  %v890_v24 = vor.u32 %v888_v62, %v887_v10  ;;  %v7319_v41 = vld [vmem:[#allocation2 + $0x30] sm:$0xff]   ;;  %6353 = vmatprep.subr.bf16.mxu1 %v7292_v0  ;;  %6401 = vmatprep.subr.bf16.mxu0 %v6789_v8  ;;  %v6786_v62 = vld [vmem:[%s8324_s3 + $0x1a8] sm:$0xff]  }
 0x113   : > { %v892_v25 = vrot.slane %v887_v10, 4  ;;  %v7313_v33 = vrot.slane %v928_v16, 7  ;;  %v7315_v34 = vrot.slane %v911_v19, 7  ;;  %v5945_v35 = vpack.c.bf16 %v638_v5, %v638_v5  ;;  %v7317_v40 = vld [vmem:[#allocation2 + $0x24] sm:$0xff]  }
 0x114   : > { %v5943_v39 = vpack.c.bf16 %v636_v6, %v636_v6  ;;  %v908_v42 = vsel %vm7200_vm7, %v900_v44, %v907_v22  ;;  %v1174_v43 = vsel %vm7206_vm8, %v909_v23, %v1173_v2  ;;  %v891_v45 = vsel %vm7200_vm7, %v883_v46, %v890_v24  ;;  %6272 = vmatmul.mubr.bf16.gmra.mrb[4].mxu1 %v7317_v40  ;;  %v6794_v6 = vld [vmem:[%s8324_s3 + $0x68] sm:$0xff]  }
 0x115   : > { %v1167_v47 = vsel %vm7206_vm8, %v892_v25, %v1166_v12  ;;  %1172 = vst [vmem:[#allocation2 + $0x4c] sm:$0xf] %v908_v42  ;;  %1175 = vst [vmem:[#allocation2 + $0x50] sm:$0x1] %v1174_v43  ;;  %v933_v29 = vor.u32 %v931_v18, %v7313_v33  ;;  %v934_v48 = vrot.slane %v7313_v33, 4  ;;  %v916_v44 = vor.u32 %v914_v20, %v7315_v34  ;;  %v6798_v43 = vld [vmem:[%s8324_s3 + $0x70] sm:$0xff]  }
 0x116   : > { %1165 = vst [vmem:[#allocation2 + $0x40] sm:$0xf] %v891_v45  ;;  %1168 = vst [vmem:[#allocation2 + $0x44] sm:$0x1] %v1167_v47  ;;  %v917_v49 = vrot.slane %v7315_v34, 4  ;;  %6319 = vmatprep.mubr.bf16.mxu0 %v7317_v40  ;;  %v936_v30 = vshrl.u32 %v5945_v35, 16  ;;  %6275 = vmatprep.mubr.bf16.mxu1 %v7319_v41  ;;  %v572_v59 = vadd.f32 %v6238_v15, %v7184_v38 }
 0x117   : > { %v939_v46 = vshll.u32 %v5945_v35, 16  ;;  %v919_v50 = vshrl.u32 %v5943_v39, 16  ;;  %v922_v36 = vshll.u32 %v5943_v39, 16  ;;  %6320 = vmatmul.mubr.bf16.gmra.mrb[36].mxu0 %v7319_v41  ;;  %v6241_v37 = vpop.f32.mrb[20].mxu0  ;;  %v1184_v51 = vsel %vm7193_vm6, %v933_v29, %v1183_v26  ;;  %6354 = vmatpush3.bf16.msra.mxu1 %v7292_v0  ;;  %v1190_v22 = vld [vmem:[#allocation2 + $0x6c] sm:$0xf] }
 0x118   : > { %v1177_v52 = vsel %vm7193_vm6, %v916_v44, %v1176_v27  ;;  %v641_v54 = vmax.f32 %v7298_v13, 0.0  ;;  %v639_v55 = vmax.f32 %v7301_v14, 0.0  ;;  %v576_v56 = vpop.f32.mrb[21].mxu0  ;;  %6402 = vmatpush3.bf16.msra.mxu0 %v6789_v8  ;;  %1185 = vst [vmem:[#allocation2 + $0x60] sm:$0xf] %v1184_v51  ;;  %v938_v57 = vrot.slane %v936_v30, 7  ;;  %6355 = vmatprep.subr.bf16.mxu1 %v7306_v31 }
 0x119   : > { %1178 = vst [vmem:[#allocation2 + $0x54] sm:$0xf] %v1177_v52  ;;  %v921_v58 = vrot.slane %v919_v50, 7  ;;  %v564_v60 = vadd.f32 %v7184_v38, %v563_v21  ;;  %v6242_v61 = vpop.f32.mrb[22].mxu0  ;;  %6403 = vmatprep.subr.bf16.mxu0 %v7311_v32  ;;  %v585_v3 = vadd.f32 %v6241_v37, %v7184_v38  ;;  %v577_v4 = vadd.f32 %v7184_v38, %v576_v56  ;;  %v1197_v21 = vld [vmem:[#allocation2 + $0x78] sm:$0xf] }
 0x11a   : > { %v5948_v0 = vpack.c.bf16 %v641_v54, %v641_v54  ;;  %v5946_v2 = vpack.c.bf16 %v639_v55, %v639_v55  ;;  %v579_v5 = vpop.f32.mrb[23].mxu0  ;;  %v941_v7 = vor.u32 %v939_v46, %v938_v57  ;;  %v943_v8 = vrot.slane %v938_v57, 4  ;;  %v6796_v55 = vld [vmem:[%s8324_s3 + $0x1b8] sm:$0xff]  }
 0x11b   : > { %v924_v9 = vor.u32 %v922_v36, %v921_v58  ;;  %v926_v10 = vrot.slane %v921_v58, 4  ;;  %6356 = vmatpush3.bf16.msra.mxu1 %v7306_v31  ;;  %v642_v26 = vmax.f32 %v572_v59, 0.0  ;;  %v640_v27 = vmax.f32 %v564_v60, 0.0  ;;  %v1201_v60 = vld [vmem:[#allocation2 + $0x80] sm:$0x1] }
 0x11c   : > { %v962_v12 = vshrl.u32 %v5948_v0, 16  ;;  %v965_v13 = vshll.u32 %v5948_v0, 16  ;;  %v945_v14 = vshrl.u32 %v5946_v2, 16  ;;  %v948_v15 = vshll.u32 %v5946_v2, 16  ;;  %6404 = vmatpush3.bf16.msra.mxu0 %v7311_v32  ;;  %6357 = vmatprep.subr.bf16.mxu1 %v6786_v62  ;;  %v7377_v31 = vld [vmem:[#allocation2 + $0x48] sm:$0xff]   ;;  %v6791_v32 = vld [vmem:[%s8324_s3 + $0x1b0] sm:$0xff]  }
 0x11d   : > { %v942_v16 = vsel %vm7200_vm7, %v934_v48, %v941_v7  ;;  %v1188_v18 = vsel %vm7206_vm8, %v943_v8, %v1187_v53  ;;  %v925_v19 = vsel %vm7200_vm7, %v917_v49, %v924_v9  ;;  %v1181_v20 = vsel %vm7206_vm8, %v926_v10, %v1180_v63  ;;  %v7371_v23 = vld [vmem:[#allocation2 + $0x3c] sm:$0xff]   ;;  %6405 = vmatprep.subr.bf16.mxu0 %v6794_v6  ;;  %v1211_v7 = vld [vmem:[#allocation2 + $0x90] sm:$0xf] }
 0x11e   : > { %1186 = vst [vmem:[#allocation2 + $0x64] sm:$0xf] %v942_v16  ;;  %1189 = vst [vmem:[#allocation2 + $0x68] sm:$0x1] %v1188_v18  ;;  %v7373_v24 = vrot.slane %v962_v12, 7  ;;  %v7375_v25 = vrot.slane %v945_v14, 7  ;;  %v588_v35 = vadd.f32 %v6242_v61, %v7184_v38  ;;  %v580_v39 = vadd.f32 %v7184_v38, %v579_v5  ;;  %6276 = vmatmul.mubr.bf16.gmra.mrb[8].mxu1 %v7371_v23 }
 0x11f   : > { %1179 = vst [vmem:[#allocation2 + $0x58] sm:$0xf] %v925_v19  ;;  %1182 = vst [vmem:[#allocation2 + $0x5c] sm:$0x1] %v1181_v20  ;;  %v645_v33 = vmax.f32 %v585_v3, 0.0  ;;  %v643_v34 = vmax.f32 %v577_v4, 0.0  ;;  %6323 = vmatprep.mubr.bf16.mxu0 %v7371_v23  ;;  %6279 = vmatprep.mubr.bf16.mxu1 %v7377_v31  ;;  %v5949_v49 = vpack.c.bf16 %v642_v26, %v642_v26 }
 0x120   : > { %v6245_v42 = vpop.f32.mrb[24].mxu0  ;;  %v967_v45 = vor.u32 %v965_v13, %v7373_v24  ;;  %v968_v47 = vrot.slane %v7373_v24, 4  ;;  %v950_v29 = vor.u32 %v948_v15, %v7375_v25  ;;  %v951_v48 = vrot.slane %v7375_v25, 4  ;;  %6324 = vmatmul.mubr.bf16.gmra.mrb[40].mxu0 %v7377_v31  ;;  %6358 = vmatpush3.bf16.msra.mxu1 %v6786_v62  ;;  %v1194_v61 = vld [vmem:[#allocation2 + $0x74] sm:$0x1]  ;;  %v6799_v3 = vld [vmem:[%s8324_s3 + $0x78] sm:$0xff]  }
 0x121   : > { %v592_v44 = vpop.f32.mrb[25].mxu0  ;;  %v5947_v30 = vpack.c.bf16 %v640_v27, %v640_v27  ;;  %v5952_v46 = vpack.c.bf16 %v645_v33, %v645_v33  ;;  %v5950_v50 = vpack.c.bf16 %v643_v34, %v643_v34  ;;  %v646_v52 = vmax.f32 %v588_v35, 0.0  ;;  %6359 = vmatprep.subr.bf16.mxu1 %v6791_v32  ;;  %6406 = vmatpush3.bf16.msra.mxu0 %v6794_v6  ;;  %v7412_v4 = vld [vmem:[%s8324_s3 + $0x100] sm:$0xff]  }
 0x122   : > { %v7395_v36 = vpop.f32.mrb[26].mxu0  ;;  %v1198_v37 = vsel %vm7193_vm6, %v967_v45, %v1197_v21  ;;  %v1191_v51 = vsel %vm7193_vm6, %v950_v29, %v1190_v22  ;;  %v644_v53 = vmax.f32 %v580_v39, 0.0  ;;  %v970_v56 = vshrl.u32 %v5949_v49, 16  ;;  %6407 = vmatprep.subr.bf16.mxu0 %v6798_v43  ;;  %v1204_v22 = vld [vmem:[#allocation2 + $0x84] sm:$0xf] }
 0x123   : > { %v7401_v54 = vpop.f32.mrb[27].mxu0  ;;  %1199 = vst [vmem:[#allocation2 + $0x78] sm:$0xf] %v1198_v37  ;;  %1192 = vst [vmem:[#allocation2 + $0x6c] sm:$0xf] %v1191_v51  ;;  %v973_v57 = vshll.u32 %v5949_v49, 16  ;;  %v7414_v8 = vpack.c.bf16 %v646_v52, %v646_v52  ;;  %v601_v15 = vadd.f32 %v6245_v42, %v7184_v38  ;;  %v593_v16 = vadd.f32 %v7184_v38, %v592_v44 }
 0x124   : > { %v953_v58 = vshrl.u32 %v5947_v30, 16  ;;  %v956_v59 = vshll.u32 %v5947_v30, 16  ;;  %v996_v62 = vshrl.u32 %v5952_v46, 16  ;;  %v999_v63 = vshll.u32 %v5952_v46, 16  ;;  %6360 = vmatpush3.bf16.msra.mxu1 %v6791_v32  ;;  %v7439_v39 = vld [vmem:[%s8324_s3 + $0x1c0] sm:$0xff]  }
 0x125   : > { %v979_v0 = vshrl.u32 %v5950_v50, 16  ;;  %v982_v2 = vshll.u32 %v5950_v50, 16  ;;  %v972_v5 = vrot.slane %v970_v56, 7  ;;  %v7416_v9 = vpack.c.bf16 %v644_v53, %v644_v53  ;;  %v7420_v12 = vld [vmem:[#allocation2 + $0x60] sm:$0xff]   ;;  %6361 = vmatprep.subr.bf16.mxu1 %v6796_v55  ;;  %6408 = vmatpush3.bf16.msra.mxu0 %v6798_v43  ;;  %v1215_v30 = vld [vmem:[#allocation2 + $0x98] sm:$0x1] }
 0x126   : > { %v955_v6 = vrot.slane %v953_v58, 7  ;;  %v7418_v10 = vld [vmem:[#allocation2 + $0x54] sm:$0xff]   ;;  %v7422_v13 = vrot.slane %v996_v62, 7  ;;  %v6249_v26 = vpop.f32.mrb[28].mxu0  ;;  %v1004_v25 = vshrl.u32 %v7414_v8, 16  ;;  %6409 = vmatprep.subr.bf16.mxu0 %v6799_v3  ;;  %v649_v37 = vmax.f32 %v601_v15, 0.0 }
 0x127   : > { %v7424_v14 = vrot.slane %v979_v0, 7  ;;  %v975_v18 = vor.u32 %v973_v57, %v972_v5  ;;  %v977_v19 = vrot.slane %v972_v5, 4  ;;  %6280 = vmatmul.mubr.bf16.gmra.mrb[12].mxu1 %v7418_v10  ;;  %6327 = vmatprep.mubr.bf16.mxu0 %v7418_v10  ;;  %v608_v35 = vpop.f32.mrb[29].mxu0  ;;  %v987_v46 = vshrl.u32 %v7416_v9, 16  ;;  %v1208_v58 = vld [vmem:[#allocation2 + $0x8c] sm:$0x1] }
 0x128   : > { %v958_v20 = vor.u32 %v956_v59, %v955_v6  ;;  %v960_v21 = vrot.slane %v955_v6, 4  ;;  %v1001_v27 = vor.u32 %v999_v63, %v7422_v13  ;;  %v1002_v32 = vrot.slane %v7422_v13, 4  ;;  %6283 = vmatprep.mubr.bf16.mxu1 %v7420_v12  ;;  %6328 = vmatmul.mubr.bf16.gmra.mrb[44].mxu0 %v7420_v12  ;;  %v7453_v44 = vpop.f32.mrb[30].mxu0 }
 0x129   : > { %v984_v33 = vor.u32 %v982_v2, %v7424_v14  ;;  %v985_v34 = vrot.slane %v7424_v14, 4  ;;  %v976_v42 = vsel %vm7200_vm7, %v968_v47, %v975_v18  ;;  %v1202_v43 = vsel %vm7206_vm8, %v977_v19, %v1201_v60  ;;  %6362 = vmatpush3.bf16.msra.mxu1 %v6796_v55  ;;  %v7461_v49 = vpop.f32.mrb[31].mxu0  ;;  %6410 = vmatpush3.bf16.msra.mxu0 %v6799_v3  ;;  %v1218_v18 = vld [vmem:[#allocation2 + $0x9c] sm:$0xf] }
 0x12a   : > { %v959_v45 = vsel %vm7200_vm7, %v951_v48, %v958_v20  ;;  %v1195_v29 = vsel %vm7206_vm8, %v960_v21, %v1194_v61  ;;  %1200 = vst [vmem:[#allocation2 + $0x7c] sm:$0xf] %v976_v42  ;;  %1203 = vst [vmem:[#allocation2 + $0x80] sm:$0x1] %v1202_v43  ;;  %v1212_v24 = vsel %vm7193_vm6, %v1001_v27, %v1211_v7  ;;  %v1007_v48 = vshll.u32 %v7414_v8, 16 }
 0x12b   : > { %1193 = vst [vmem:[#allocation2 + $0x70] sm:$0xf] %v959_v45  ;;  %1196 = vst [vmem:[#allocation2 + $0x74] sm:$0x1] %v1195_v29  ;;  %v1205_v47 = vsel %vm7193_vm6, %v984_v33, %v1204_v22  ;;  %6443 = vmatprep.subr.bf16.mxu1 %v7412_v4  ;;  %v990_v50 = vshll.u32 %v7416_v9, 16  ;;  %v647_v51 = vmax.f32 %v593_v16, 0.0  ;;  %v604_v53 = vadd.f32 %v7395_v36, %v7184_v38 }
 0x12c   : > { %1213 = vst [vmem:[#allocation2 + $0x90] sm:$0xf] %v1212_v24  ;;  %1206 = vst [vmem:[#allocation2 + $0x84] sm:$0xf] %v1205_v47  ;;  %v1006_v52 = vrot.slane %v1004_v25, 7  ;;  %v596_v55 = vadd.f32 %v7184_v38, %v7401_v54  ;;  %v617_v56 = vadd.f32 %v6249_v26, %v7184_v38  ;;  %6491 = vmatprep.subr.bf16.mxu0 %v7439_v39  ;;  %v989_v57 = vrot.slane %v987_v46, 7 }
 0x12d   : > { %v5956_v59 = vpack.c.bf16 %v649_v37, %v649_v37  ;;  %v5954_v60 = vpack.c.bf16 %v647_v51, %v647_v51  ;;  %v609_v61 = vadd.f32 %v7184_v38, %v608_v35  ;;  %v650_v0 = vmax.f32 %v604_v53, 0.0  ;;  %v1225_v8 = vld [vmem:[#allocation2 + $0xa8] sm:$0xf] }
 0x12e   : > { %v1009_v62 = vor.u32 %v1007_v48, %v1006_v52  ;;  %v1011_v63 = vrot.slane %v1006_v52, 4  ;;  %v648_v2 = vmax.f32 %v596_v55, 0.0  ;;  %v992_v3 = vor.u32 %v990_v50, %v989_v57  ;;  %v1229_v48 = vld [vmem:[#allocation2 + $0xb0] sm:$0x1] }
 0x12f   : > { %v994_v5 = vrot.slane %v989_v57, 4  ;;  %v1030_v36 = vshrl.u32 %v5956_v59, 16  ;;  %v1033_v6 = vshll.u32 %v5956_v59, 16  ;;  %v1013_v9 = vshrl.u32 %v5954_v60, 16 }
 0x130   : > { %v1010_v54 = vsel %vm7200_vm7, %v1002_v32, %v1009_v62  ;;  %v1216_v7 = vsel %vm7206_vm8, %v1011_v63, %v1215_v30  ;;  %v1016_v13 = vshll.u32 %v5954_v60, 16  ;;  %v993_v14 = vsel %vm7200_vm7, %v985_v34, %v992_v3 }
 0x131   : > { %1214 = vst [vmem:[#allocation2 + $0x94] sm:$0xf] %v1010_v54  ;;  %1217 = vst [vmem:[#allocation2 + $0x98] sm:$0x1] %v1216_v7  ;;  %v1209_v15 = vsel %vm7206_vm8, %v994_v5, %v1208_v58  ;;  %v1032_v16 = vrot.slane %v1030_v36, 7  ;;  %v5957_v19 = vpack.c.bf16 %v650_v0, %v650_v0  ;;  %v1015_v21 = vrot.slane %v1013_v9, 7 }
 0x132   : > { %v7481_v20 = vld [vmem:[#allocation2 + $0x6c] sm:$0xff]   ;;  %1207 = vst [vmem:[#allocation2 + $0x88] sm:$0xf] %v993_v14  ;;  %1210 = vst [vmem:[#allocation2 + $0x8c] sm:$0x1] %v1209_v15  ;;  %v5955_v22 = vpack.c.bf16 %v648_v2, %v648_v2  ;;  %v653_v26 = vmax.f32 %v617_v56, 0.0  ;;  %v620_v51 = vadd.f32 %v7453_v44, %v7184_v38  ;;  %v612_v52 = vadd.f32 %v7184_v38, %v7461_v49 }
 0x133   : > { %v651_v27 = vmax.f32 %v609_v61, 0.0  ;;  %v7483_v32 = vld [vmem:[#allocation2 + $0x78] sm:$0xff]   ;;  %v1035_v33 = vor.u32 %v1033_v6, %v1032_v16  ;;  %v1036_v35 = vrot.slane %v1032_v16, 4  ;;  %v1038_v42 = vshrl.u32 %v5957_v19, 16  ;;  %6284 = vmatmul.mubr.bf16.gmra.mrb[16].mxu1 %v7481_v20  ;;  %6331 = vmatprep.mubr.bf16.mxu0 %v7481_v20  ;;  %v1222_v56 = vld [vmem:[#allocation2 + $0xa4] sm:$0x1] }
 0x134   : > { %v1041_v34 = vshll.u32 %v5957_v19, 16  ;;  %v1018_v43 = vor.u32 %v1016_v13, %v1015_v21  ;;  %v1019_v45 = vrot.slane %v1015_v21, 4  ;;  %v1021_v29 = vshrl.u32 %v5955_v22, 16  ;;  %6287 = vmatprep.mubr.bf16.mxu1 %v7483_v32  ;;  %6332 = vmatmul.mubr.bf16.gmra.mrb[48].mxu0 %v7483_v32  ;;  %v1239_v61 = vld [vmem:[#allocation2 + $0xc0] sm:$0xf] }
 0x135   : > { %v1024_v24 = vshll.u32 %v5955_v22, 16  ;;  %v1226_v47 = vsel %vm7193_vm6, %v1035_v33, %v1225_v8  ;;  %v1040_v25 = vrot.slane %v1038_v42, 7  ;;  %v5960_v30 = vpack.c.bf16 %v653_v26, %v653_v26  ;;  %v1232_v8 = vld [vmem:[#allocation2 + $0xb4] sm:$0xf] }
 0x136   : > { %v5958_v46 = vpack.c.bf16 %v651_v27, %v651_v27  ;;  %1227 = vst [vmem:[#allocation2 + $0xa8] sm:$0xf] %v1226_v47  ;;  %v1219_v50 = vsel %vm7193_vm6, %v1018_v43, %v1218_v18  ;;  %v1023_v37 = vrot.slane %v1021_v29, 7  ;;  %v654_v3 = vmax.f32 %v620_v51, 0.0  ;;  %v6800_v18 = vld [vmem:[#allocation2] sm:$0xff]  }
 0x137   : > { %1220 = vst [vmem:[#allocation2 + $0x9c] sm:$0xf] %v1219_v50  ;;  %v1043_v53 = vor.u32 %v1041_v34, %v1040_v25  ;;  %v1045_v55 = vrot.slane %v1040_v25, 4  ;;  %v1064_v57 = vshrl.u32 %v5960_v30, 16  ;;  %v1067_v58 = vshll.u32 %v5960_v30, 16 }
 0x138   : > { %v1026_v59 = vor.u32 %v1024_v24, %v1023_v37  ;;  %v1028_v60 = vrot.slane %v1023_v37, 4  ;;  %v1047_v62 = vshrl.u32 %v5958_v46, 16  ;;  %v1050_v63 = vshll.u32 %v5958_v46, 16  ;;  %v7503_v49 = vld [vmem:[#allocation2 + $0x90] sm:$0xff]   ;;  %v1243_v27 = vld [vmem:[#allocation2 + $0xc8] sm:$0x1] }
 0x139   : > { %v1044_v0 = vsel %vm7200_vm7, %v1036_v35, %v1043_v53  ;;  %v1230_v44 = vsel %vm7206_vm8, %v1045_v55, %v1229_v48  ;;  %v1066_v2 = vrot.slane %v1064_v57, 7  ;;  %v7501_v38 = vld [vmem:[#allocation2 + $0x84] sm:$0xff]   ;;  %v652_v54 = vmax.f32 %v612_v52, 0.0  ;;  %v1236_v34 = vld [vmem:[#allocation2 + $0xbc] sm:$0x1] }
 0x13a   : > { %1228 = vst [vmem:[#allocation2 + $0xac] sm:$0xf] %v1044_v0  ;;  %1231 = vst [vmem:[#allocation2 + $0xb0] sm:$0x1] %v1230_v44  ;;  %v1027_v5 = vsel %vm7200_vm7, %v1019_v45, %v1026_v59  ;;  %v1223_v36 = vsel %vm7206_vm8, %v1028_v60, %v1222_v56  ;;  %v1049_v6 = vrot.slane %v1047_v62, 7  ;;  %v5961_v9 = vpack.c.bf16 %v654_v3, %v654_v3  ;;  %v6803_v56 = vld [vmem:[#allocation2 + $0xc] sm:$0xff]  }
 0x13b   : > { %1221 = vst [vmem:[#allocation2 + $0xa0] sm:$0xf] %v1027_v5  ;;  %1224 = vst [vmem:[#allocation2 + $0xa4] sm:$0x1] %v1223_v36  ;;  %v1069_v7 = vor.u32 %v1067_v58, %v1066_v2  ;;  %6288 = vmatmul.mubr.bf16.gmra.mrb[20].mxu1 %v7501_v38  ;;  %6335 = vmatprep.mubr.bf16.mxu0 %v7501_v38  ;;  %v5959_v14 = vpack.c.bf16 %v652_v54, %v652_v54  ;;  %v1070_v43 = vrot.slane %v1066_v2, 4  ;;  %v6805_v57 = vld [vmem:[#allocation2 + $0x18] sm:$0xff]  }
 0x13c   : > { %v1052_v13 = vor.u32 %v1050_v63, %v1049_v6  ;;  %6291 = vmatprep.mubr.bf16.mxu1 %v7503_v49  ;;  %6336 = vmatmul.mubr.bf16.gmra.mrb[52].mxu0 %v7503_v49  ;;  %v1072_v16 = vshrl.u32 %v5961_v9, 16  ;;  %v1075_v26 = vshll.u32 %v5961_v9, 16  ;;  %v6801_v33 = vld [vmem:[#allocation2 + $0x8] ss:$0 sps:$4 sm:$0x11]   ;;  %v2658_v24 = vshll.u32 %v6800_v18, 16 }
 0x13d   : > { %v1240_v15 = vsel %vm7193_vm6, %v1069_v7, %v1239_v61  ;;  %v1055_v21 = vshrl.u32 %v5959_v14, 16  ;;  %v1058_v42 = vshll.u32 %v5959_v14, 16  ;;  %v1053_v47 = vrot.slane %v1049_v6, 4  ;;  %v6804_v59 = vld [vmem:[#allocation2 + $0x14] ss:$0 sps:$4 sm:$0x11]  }
 0x13e   : > { %1241 = vst [vmem:[#allocation2 + $0xc0] sm:$0xf] %v1240_v15  ;;  %v1233_v19 = vsel %vm7193_vm6, %v1052_v13, %v1232_v8  ;;  %v1074_v22 = vrot.slane %v1072_v16, 7  ;;  %v2656_v52 = vshrl.u32 %v6800_v18, 16  ;;  %v2660_v53 = vrot.slane %v2658_v24, 1  ;;  %v6808_v2 = vld [vmem:[#allocation2 + $0x24] sm:$0xff]  }
 0x13f   : > { %1234 = vst [vmem:[#allocation2 + $0xb4] sm:$0xf] %v1233_v19  ;;  %v1057_v35 = vrot.slane %v1055_v21, 7  ;;  %v2663_v55 = vshll.u32 %v6801_v33, 16  ;;  %v2670_v17 = vshll.u32 %v6803_v56, 16  ;;  %v2682_v60 = vshll.u32 %v6805_v57, 16 }
 0x140   : > { %v1077_v45 = vor.u32 %v1075_v26, %v1074_v22  ;;  %v1079_v29 = vrot.slane %v1074_v22, 4  ;;  %v2661_v11 = vor.u32 %v2660_v53, %v2656_v52  ;;  %v6806_v62 = vld [vmem:[#allocation2 + $0x20] ss:$0 sps:$4 sm:$0x11]   ;;  %v6810_v5 = vld [vmem:[#allocation2 + $0x30] sm:$0xff]   ;;  %v2668_v36 = vshrl.u32 %v6803_v56, 16 }
 0x141   : > { %v1060_v25 = vor.u32 %v1058_v42, %v1057_v35  ;;  %v1062_v48 = vrot.slane %v1057_v35, 4  ;;  %v7523_v50 = vld [vmem:[#allocation2 + $0xa8] sm:$0xff]   ;;  %v2665_v58 = vrot.slane %v2663_v55, 1  ;;  %v2672_v44 = vrot.slane %v2670_v17, 1  ;;  %v6813_v26 = vld [vmem:[#allocation2 + $0x3c] sm:$0xff]   ;;  %v6818_v53 = vld [vmem:[#allocation2 + $0x54] sm:$0xff]  }
 0x142   : > { %v7517_v30 = vld [vmem:[#allocation2 + $0x9c] sm:$0xff]   ;;  %v1078_v1 = vsel %vm7200_vm7, %v1070_v43, %v1077_v45  ;;  %v1244_v46 = vsel %vm7206_vm8, %v1079_v29, %v1243_v27  ;;  %v2684_v3 = vrot.slane %v2682_v60, 1  ;;  %v2675_v6 = vshll.u32 %v6804_v59, 16  ;;  %v6809_v16 = vld [vmem:[#allocation2 + $0x2c] ss:$0 sps:$4 sm:$0x11]  }
 0x143   : > { %1242 = vst [vmem:[#allocation2 + $0xc4] sm:$0xf] %v1078_v1  ;;  %1245 = vst [vmem:[#allocation2 + $0xc8] sm:$0x1] %v1244_v46  ;;  %v1061_v37 = vsel %vm7200_vm7, %v1053_v47, %v1060_v25  ;;  %v1237_v51 = vsel %vm7206_vm8, %v1062_v48, %v1236_v34  ;;  %6292 = vmatmul.mubr.bf16.gmra.mrb[24].mxu1 %v7517_v30  ;;  %6339 = vmatprep.mubr.bf16.mxu0 %v7517_v30  ;;  %v2680_v54 = vshrl.u32 %v6805_v57, 16  ;;  %v6807_v19 = vld [vmem:[%s8324_s3 + $0x108] sm:$0xff]  }
 0x144   : > { %1235 = vst [vmem:[#allocation2 + $0xb8] sm:$0xf] %v1061_v37  ;;  %1238 = vst [vmem:[#allocation2 + $0xbc] sm:$0x1] %v1237_v51  ;;  %6295 = vmatprep.mubr.bf16.mxu1 %v7523_v50  ;;  %6340 = vmatmul.mubr.bf16.gmra.mrb[56].mxu0 %v7523_v50  ;;  %v2666_v0 = vsel %vm2654_vm9, %v2661_v11, %v2665_v58  ;;  %v2687_v7 = vshll.u32 %v6806_v62, 16  ;;  %v2673_v8 = vor.u32 %v2672_v44, %v2668_v36  ;;  %v6828_v27 = vld [vmem:[%s8324_s3 + $0x1c8] sm:$0xff]  }
 0x145   : > { %v2694_v9 = vshll.u32 %v6808_v2, 16  ;;  %v2685_v13 = vor.u32 %v2684_v3, %v2680_v54  ;;  %v2706_v14 = vshll.u32 %v6810_v5, 16  ;;  %v2677_v15 = vrot.slane %v2675_v6, 1  ;;  %v6811_v21 = vld [vmem:[#allocation2 + $0x38] ss:$0 sps:$4 sm:$0x11]  }
 0x146   : > { %v2689_v18 = vrot.slane %v2687_v7, 1  ;;  %v6815_v42 = vld [vmem:[#allocation2 + $0x48] sm:$0xff]   ;;  %v2699_v34 = vshll.u32 %v6809_v16, 16  ;;  %v2704_v43 = vshrl.u32 %v6810_v5, 16  ;;  %v2711_v45 = vshll.u32 %v6811_v21, 16  ;;  %v6817_v51 = vld [vmem:[%s8324_s3 + $0x118] sm:$0xff]  }
 0x147   : > { %v2696_v22 = vrot.slane %v2694_v9, 1  ;;  %v2708_v35 = vrot.slane %v2706_v14, 1  ;;  %v2718_v24 = vshll.u32 %v6813_v26, 16  ;;  %v6814_v25 = vld [vmem:[#allocation2 + $0x44] ss:$0 sps:$4 sm:$0x11]  }
 0x148   : > { %v7555_v33 = vsel %vm2654_vm9, %v2685_v13, %v2689_v18  ;;  %v2730_v48 = vshll.u32 %v6815_v42, 16  ;;  %v2701_v1 = vrot.slane %v2699_v34, 1  ;;  %v2713_v46 = vrot.slane %v2711_v45, 1  ;;  %v6816_v37 = vld [vmem:[#allocation2 + $0x50] ss:$0 sps:$4 sm:$0x11]  }
 0x149   : > { %v2709_v47 = vor.u32 %v2708_v35, %v2704_v43  ;;  %v2720_v52 = vrot.slane %v2718_v24, 1  ;;  %v6835_v55 = vld [vmem:[%s8324_s3 + $0x1d8] sm:$0xff]   ;;  %v2716_v57 = vshrl.u32 %v6813_v26, 16  ;;  %v2723_v11 = vshll.u32 %v6814_v25, 16  ;;  %v7581_v58 = vld [vmem:[#allocation2 + $0x60] sm:$0xff]   ;;  %v7598_v54 = vld [vmem:[%s8324_s3 + $0x128] sm:$0xff]  }
 0x14a   : > { %v7535_v63 = vld [vmem:[#allocation2 + $0xc0] sm:$0xff]   ;;  %v2728_v17 = vshrl.u32 %v6815_v42, 16  ;;  %v2735_v59 = vshll.u32 %v6816_v37, 16  ;;  %v2742_v62 = vshll.u32 %v6818_v53, 16  ;;  %v2754_v3 = vshll.u32 %v7581_v58, 16  ;;  %v7604_v9 = vld [vmem:[#allocation2 + $0x6c] sm:$0xff]  }
 0x14b   : > { %v7533_v61 = vld [vmem:[#allocation2 + $0xb4] sm:$0xff]   ;;  %v7579_v56 = vsel %vm2654_vm9, %v2709_v47, %v2713_v46  ;;  %v2721_v60 = vor.u32 %v2720_v52, %v2716_v57  ;;  %v2725_v5 = vrot.slane %v2723_v11, 1  ;;  %v7593_v36 = vld [vmem:[#allocation2 + $0x68] ss:$0 sps:$4 sm:$0x11]   ;;  %v2740_v16 = vshrl.u32 %v6818_v53, 16 }
 0x14c   : > { %6296 = vmatmul.mubr.bf16.gmra.mrb[28].mxu1 %v7533_v61  ;;  %6343 = vmatprep.mubr.bf16.mxu0 %v7533_v61  ;;  %v2737_v6 = vrot.slane %v2735_v59, 1  ;;  %v6842_v13 = vld [vmem:[%s8324_s3 + $0x1e8] sm:$0xff]   ;;  %v2759_v21 = vshll.u32 %v7593_v36, 16  ;;  %v2766_v26 = vshll.u32 %v7604_v9, 16  ;;  %v6986_v35 = vmov 0.0   ;;  %v6848_v25 = vld [vmem:[%s8324_s3 + $0x1f8] sm:$0xff]  }
 0x14d   : > { %6344 = vmatmul.mubr.bf16.gmra.mrb[60].mxu0 %v7535_v63  ;;  %6363 = vmatprep.mubr.bf16.mxu1 %v7248_v28  ;;  %v7547_v28 = vsel %vm2654_vm9, %v2673_v8, %v2677_v15  ;;  %v7602_v7 = vsel %vm2654_vm9, %v2721_v60, %v2725_v5  ;;  %v2744_v8 = vrot.slane %v2742_v62, 1  ;;  %v2756_v15 = vrot.slane %v2754_v3, 1  ;;  %1249 = vst.msk [vmem:[#allocation4 + $0x10] sm:$0xff] %vm1246_vm10, %v6986_v35  ;;  %v6827_v45 = vld [vmem:[#allocation2 + $0x80] ss:$0 sps:$4 sm:$0x11]  }
 0x14e   : > { %6411 = vmatprep.mubr.bf16.mxu0 %v2666_v0  ;;  %v6839_v0 = vld [vmem:[%s8324_s3 + $0x1e0] sm:$0xff]   ;;  %1247 = vst.msk [vmem:[#allocation4] sm:$0xff] %vm1246_vm10, %v6986_v35  ;;  %1248 = vst.msk [vmem:[#allocation4 + $0x8] sm:$0xff] %vm1246_vm10, %v6986_v35  ;;  %v6833_v46 = vld [vmem:[#allocation2 + $0x90] sm:$0xff]   ;;  %v2783_v52 = vshll.u32 %v6827_v45, 16 }
 0x14f   : > { %1250 = vst.msk [vmem:[#allocation4 + $0x18] sm:$0xff] %vm1246_vm10, %v6986_v35  ;;  %1251 = vst.msk [vmem:[#allocation4 + $0x20] sm:$0xff] %vm1246_vm10, %v6986_v35  ;;  %v6830_v47 = vld [vmem:[#allocation2 + $0x84] sm:$0xff]   ;;  %v6837_v59 = vld [vmem:[#allocation2 + $0x9c] sm:$0xff]  }
 0x150   : > { %1252 = vst.msk [vmem:[#allocation4 + $0x28] sm:$0xff] %vm1246_vm10, %v6986_v35  ;;  %1253 = vst.msk [vmem:[#allocation4 + $0x30] sm:$0xff] %vm1246_vm10, %v6986_v35  ;;  %v7688_v57 = vld [vmem:[%s8324_s3 + $0x140] sm:$0xff]   ;;  %v6834_v60 = vld [vmem:[#allocation2 + $0x98] ss:$0 sps:$4 sm:$0x11]  }
 0x151   : > { %1254 = vst.msk [vmem:[#allocation4 + $0x38] sm:$0xff] %vm1246_vm10, %v6986_v35  ;;  %1255 = vst.msk [vmem:[#allocation4 + $0x40] sm:$0xff] %vm1246_vm10, %v6986_v35  ;;  %v6840_v3 = vld [vmem:[#allocation2 + $0xa8] sm:$0xff]   ;;  %v2788_v5 = vshrl.u32 %v6830_v47, 16 }
 0x152   : > { %1256 = vst.msk [vmem:[#allocation4 + $0x48] sm:$0xff] %vm1246_vm10, %v6986_v35  ;;  %1257 = vst.msk [vmem:[#allocation4 + $0x50] sm:$0xff] %vm1246_vm10, %v6986_v35  ;;  %v6846_v45 = vld [vmem:[#allocation2 + $0xbc] ss:$0 sps:$4 sm:$0x11]  }
 0x153   : > { %1258 = vst.msk [vmem:[#allocation4 + $0x58] sm:$0xff] %vm1246_vm10, %v6986_v35  ;;  %1259 = vst.msk [vmem:[#allocation4 + $0x60] sm:$0xff] %vm1246_vm10, %v6986_v35 }
 0x154   : > { %6364 = vmatmul.mubr.bf16.vlgmr.msra.gmra.mrb[32].mxu1 %v7317_v40  ;;  %v2692_v40 = vshrl.u32 %v6808_v2, 16  ;;  %v7590_v2 = vld [vmem:[#allocation2 + $0x5c] ss:$0 sps:$4 sm:$0x11]   ;;  %1260 = vst.msk [vmem:[#allocation4 + $0x68] sm:$0xff] %vm1246_vm10, %v6986_v35  ;;  %1261 = vst.msk [vmem:[#allocation4 + $0x70] sm:$0xff] %vm1246_vm10, %v6986_v35 }
 0x155   : > { %6367 = vmatprep.mubr.bf16.mxu1 %v7319_v41  ;;  %6412 = vmatmul.mubr.bf16.vlgmr.msra.gmra.mrb[64].mxu0 %v7547_v28  ;;  %v6812_v41 = vld [vmem:[%s8324_s3 + $0x110] sm:$0xff]   ;;  %v2747_v18 = vshll.u32 %v7590_v2, 16  ;;  %1262 = vst.msk [vmem:[#allocation4 + $0x78] sm:$0xff] %vm1246_vm10, %v6986_v35  ;;  %1263 = vst.msk [vmem:[#allocation4 + $0x80] sm:$0xff] %vm1246_vm10, %v6986_v35 }
 0x156   : > { %6444 = vmatpush3.bf16.msra.mxu1 %v7412_v4  ;;  %6415 = vmatprep.mubr.bf16.mxu0 %v7555_v33  ;;  %v2697_v29 = vor.u32 %v2696_v22, %v2692_v40  ;;  %v6832_v4 = vld [vmem:[%s8324_s3 + $0x1d0] sm:$0xff]   ;;  %v2745_v22 = vor.u32 %v2744_v8, %v2740_v16  ;;  %1264 = vst.msk [vmem:[#allocation4 + $0x88] sm:$0xff] %vm1246_vm10, %v6986_v35  ;;  %1265 = vst.msk [vmem:[#allocation4 + $0x90] sm:$0xff] %vm1246_vm10, %v6986_v35 }
 0x157   : > { %6445 = vmatprep.subr.bf16.mxu1 %v6807_v19  ;;  %6492 = vmatpush3.bf16.msra.mxu0 %v7439_v39  ;;  %1266 = vst.msk [vmem:[#allocation4 + $0x98] sm:$0xff] %vm1246_vm10, %v6986_v35  ;;  %1267 = vst.msk [vmem:[#allocation4 + $0xa0] sm:$0xff] %vm1246_vm10, %v6986_v35  ;;  %v6824_v40 = vld [vmem:[#allocation2 + $0x74] ss:$0 sps:$4 sm:$0x11]   ;;  %v2749_v43 = vrot.slane %v2747_v18, 1 }
 0x158   : > { %6493 = vmatprep.subr.bf16.mxu0 %v6828_v27  ;;  %v7571_v39 = vsel %vm2654_vm9, %v2697_v29, %v2701_v1  ;;  %1268 = vst.msk [vmem:[#allocation4 + $0xa8] sm:$0xff] %vm1246_vm10, %v6986_v35  ;;  %1269 = vst.msk [vmem:[#allocation4 + $0xb0] sm:$0xff] %vm1246_vm10, %v6986_v35  ;;  %v6844_v29 = vld [vmem:[%s8324_s3 + $0x138] sm:$0xff]   ;;  %v2771_v37 = vshll.u32 %v6824_v40, 16 }
 0x159   : > { %1270 = vst.msk [vmem:[#allocation4 + $0xb8] sm:$0xff] %vm1246_vm10, %v6986_v35  ;;  %1271 = vst.msk [vmem:[#allocation4 + $0xc0] sm:$0xff] %vm1246_vm10, %v6986_v35  ;;  %v7667_v24 = vsel %vm2654_vm9, %v2745_v22, %v2749_v43  ;;  %v6841_v18 = vld [vmem:[#allocation2 + $0xb0] ss:$0 sps:$4 sm:$0x11]  }
 0x15a   : > { %6446 = vmatpush3.bf16.msra.mxu1 %v6807_v19  ;;  %v2752_v19 = vshrl.u32 %v7581_v58, 16  ;;  %1272 = vst.msk [vmem:[#allocation4 + $0xc8] sm:$0xff] %vm1246_vm10, %v6986_v35  ;;  %1273 = vst.msk [vmem:[#allocation4 + $0xd0] sm:$0xff] %vm1246_vm10, %v6986_v35  ;;  %v2802_v58 = vshll.u32 %v6833_v46, 16 }
 0x15b   : > { %6447 = vmatprep.subr.bf16.mxu1 %v6812_v41  ;;  %6494 = vmatpush3.bf16.msra.mxu0 %v6828_v27  ;;  %v6847_v27 = vld [vmem:[%s8324_s3 + $0x1f0] sm:$0xff]   ;;  %1274 = vst.msk [vmem:[#allocation4 + $0xd8] sm:$0xff] %vm1246_vm10, %v6986_v35  ;;  %1275 = vst.msk [vmem:[#allocation4 + $0xe0] sm:$0xff] %vm1246_vm10, %v6986_v35 }
 0x15c   : > { %6368 = vmatmul.mubr.bf16.gmra.mrb[36].mxu1 %v7371_v23  ;;  %6495 = vmatprep.subr.bf16.mxu0 %v6832_v4  ;;  %v2732_v23 = vrot.slane %v2730_v48, 1  ;;  %1276 = vst.msk [vmem:[#allocation4 + $0xe8] sm:$0xff] %vm1246_vm10, %v6986_v35  ;;  %1277 = vst.msk [vmem:[#allocation4 + $0xf0] sm:$0xff] %vm1246_vm10, %v6986_v35  ;;  %v2757_v42 = vor.u32 %v2756_v15, %v2752_v19  ;;  %v2804_v2 = vrot.slane %v2802_v58, 1  ;;  %v2826_v15 = vshll.u32 %v6840_v3, 16  ;;  %v6845_v19 = vld [vmem:[#allocation2 + $0xb4] sm:$0xff]  }
 0x15d   : > { %6371 = vmatprep.mubr.bf16.mxu1 %v7377_v31  ;;  %6416 = vmatmul.mubr.bf16.gmra.mrb[68].mxu0 %v7571_v39  ;;  %v6822_v31 = vld [vmem:[%s8324_s3 + $0x120] sm:$0xff]   ;;  %1278 = vst.msk [vmem:[#allocation4 + $0xf8] sm:$0xff] %vm1246_vm10, %v6986_v35  ;;  %v2824_v35 = vshrl.u32 %v6840_v3, 16  ;;  %v6862_v58 = vld [vmem:[#allocation2 + $0xc8] ss:$0 sps:$4 sm:$0x11]  }
 0x15e   : > { %6419 = vmatprep.mubr.bf16.mxu0 %v7579_v56  ;;  %6448 = vmatpush3.bf16.msra.mxu1 %v6812_v41  ;;  %v2733_v44 = vor.u32 %v2732_v23, %v2728_v17  ;;  %v2761_v41 = vrot.slane %v2759_v21, 1  ;;  %v6831_v23 = vld [vmem:[#allocation2 + $0x8c] ss:$0 sps:$4 sm:$0x11]   ;;  %v2773_v17 = vrot.slane %v2771_v37, 1  ;;  %v2828_v22 = vrot.slane %v2826_v15, 1 }
 0x15f   : > { %6449 = vmatprep.subr.bf16.mxu1 %v6817_v51  ;;  %6496 = vmatpush3.bf16.msra.mxu0 %v6832_v4  ;;  %v2768_v4 = vrot.slane %v2766_v26, 1  ;;  %v2795_v36 = vshll.u32 %v6831_v23, 16  ;;  %v2812_v26 = vshrl.u32 %v6837_v59, 16  ;;  %v6855_v37 = vld [vmem:[%s8324_s3 + $0x148] sm:$0xff]  }
 0x160   : > { %6497 = vmatprep.subr.bf16.mxu0 %v6835_v55  ;;  %v7612_v14 = vsel %vm2654_vm9, %v2733_v44, %v2737_v6  ;;  %v7675_v48 = vsel %vm2654_vm9, %v2757_v42, %v2761_v41  ;;  %v2807_v6 = vshll.u32 %v6834_v60, 16  ;;  %v2831_v42 = vshll.u32 %v6841_v18, 16  ;;  %v6865_v23 = vld [vmem:[#allocation2 + $0xcc] sm:$0xff]  }
 0x162   : > { %6450 = vmatpush3.bf16.msra.mxu1 %v6817_v51  ;;  %v2833_v41 = vrot.slane %v2831_v42, 1 }
 0x163   : > { %6451 = vmatprep.subr.bf16.mxu1 %v6822_v31  ;;  %6498 = vmatpush3.bf16.msra.mxu0 %v6835_v55  ;;  %v2790_v55 = vshll.u32 %v6830_v47, 16  ;;  %v2836_v47 = vshrl.u32 %v6845_v19, 16 }
 0x164   : > { %6372 = vmatmul.mubr.bf16.gmra.mrb[40].mxu1 %v7418_v10  ;;  %6499 = vmatprep.subr.bf16.mxu0 %v6839_v0  ;;  %v7614_v10 = vld [vmem:[#allocation2 + $0x78] sm:$0xff]  }
 0x165   : > { %6375 = vmatprep.mubr.bf16.mxu1 %v7420_v12  ;;  %6420 = vmatmul.mubr.bf16.gmra.mrb[72].mxu0 %v7602_v7  ;;  %v6836_v12 = vld [vmem:[%s8324_s3 + $0x130] sm:$0xff]   ;;  %v2778_v34 = vshll.u32 %v7614_v10, 16  ;;  %v2776_v51 = vshrl.u32 %v7614_v10, 16  ;;  %v2797_v10 = vrot.slane %v2795_v36, 1 }
 0x166   : > { %6423 = vmatprep.mubr.bf16.mxu0 %v7612_v14  ;;  %6452 = vmatpush3.bf16.msra.mxu1 %v6822_v31  ;;  %v2785_v31 = vrot.slane %v2783_v52, 1  ;;  %v6853_v52 = vld [vmem:[%s8324_s3 + $0xa0] sm:$0xff]   ;;  %v6872_v36 = vld [vmem:[#allocation2 + $0x8] ss:$0 sps:$4 sm:$0x11]  }
 0x167   : > { %6453 = vmatprep.subr.bf16.mxu1 %v7598_v54  ;;  %6500 = vmatpush3.bf16.msra.mxu0 %v6839_v0  ;;  %v2780_v1 = vrot.slane %v2778_v34, 1  ;;  %v2792_v0 = vrot.slane %v2790_v55, 1  ;;  %v2838_v34 = vshll.u32 %v6845_v19, 16  ;;  %v6870_v55 = vld [vmem:[%s8324_s3 + $0x178] sm:$0xff]  }
 0x168   : > { %6501 = vmatprep.subr.bf16.mxu0 %v6842_v13 }
 0x169   : > { %v2781_v11 = vor.u32 %v2780_v1, %v2776_v51  ;;  %v2793_v8 = vor.u32 %v2792_v0, %v2788_v5  ;;  %v6843_v1 = vld [vmem:[#allocation2 + $0xcc] sm:$0xff]   ;;  %v6858_v51 = vld [vmem:[%s8324_s3 + $0x158] sm:$0xff]  }
 0x16a   : > { %6454 = vmatpush3.bf16.msra.mxu1 %v7598_v54  ;;  %v2814_v54 = vshll.u32 %v6837_v59, 16  ;;  %v6866_v59 = vld [vmem:[#allocation2 + $0xd4] ss:$0 sps:$4 sm:$0x11]  }
 0x16b   : > { %6455 = vmatprep.subr.bf16.mxu1 %v6836_v12  ;;  %6502 = vmatpush3.bf16.msra.mxu0 %v6842_v13  ;;  %v7699_v44 = vsel %vm2654_vm9, %v2781_v11, %v2785_v31  ;;  %v6838_v13 = vld [vmem:[#allocation2 + $0xa4] ss:$0 sps:$4 sm:$0x11]   ;;  %v7704_v21 = vsel %vm2654_vm9, %v2793_v8, %v2797_v10  ;;  %v2862_v31 = vshll.u32 %v6865_v23, 16  ;;  %v2867_v5 = vshll.u32 %v6866_v59, 16 }
 0x16c   : > { %6376 = vmatmul.mubr.bf16.gmra.mrb[44].mxu1 %v7481_v20  ;;  %6503 = vmatprep.subr.bf16.mxu0 %v6847_v27  ;;  %v2764_v20 = vshrl.u32 %v7604_v9, 16  ;;  %v2816_v16 = vrot.slane %v2814_v54, 1  ;;  %v6868_v54 = vld [vmem:[#allocation2 + $0xc] sm:$0xfe]   ;;  %v4121_v10 = vrot.slane %v6872_v36, 1 }
 0x16d   : > { %6379 = vmatprep.mubr.bf16.mxu1 %v7483_v32  ;;  %6424 = vmatmul.mubr.bf16.gmra.mrb[76].mxu0 %v7667_v24  ;;  %v7683_v32 = vld [vmem:[%s8324_s3 + $0x80] sm:$0xff]   ;;  %v2864_v3 = vrot.slane %v2862_v31, 1  ;;  %v6869_v8 = vld [vmem:[#allocation2 + $0x14] ss:$0 sps:$4 sm:$0x11]  }
 0x16e   : > { %6427 = vmatprep.mubr.bf16.mxu0 %v7675_v48  ;;  %6456 = vmatpush3.bf16.msra.mxu1 %v6836_v12  ;;  %v2769_v53 = vor.u32 %v2768_v4, %v2764_v20  ;;  %v2817_v40 = vor.u32 %v2816_v16, %v2812_v26  ;;  %v4124_v16 = vrot.slane %v6869_v8, 1  ;;  %v6876_v26 = vld [vmem:[#allocation2 + $0x24] sm:$0xfe]  }
 0x16f   : > { %6457 = vmatprep.subr.bf16.mxu1 %v6844_v29  ;;  %6504 = vmatpush3.bf16.msra.mxu0 %v6847_v27  ;;  %v2819_v27 = vshll.u32 %v6838_v13, 16  ;;  %v2869_v13 = vrot.slane %v2867_v5, 1  ;;  %v6898_v5 = vld [vmem:[%s8324_s3 + $0x228] sm:$0xff]  }
 0x170   : > { %6505 = vmatprep.subr.bf16.mxu0 %v6848_v25  ;;  %v7693_v62 = vsel %vm2654_vm9, %v2769_v53, %v2773_v17  ;;  %v6859_v53 = vld [vmem:[%s8324_s3 + $0xb0] sm:$0xff]  }
 0x171   : > { %v2821_v43 = vrot.slane %v2819_v27, 1  ;;  %v6877_v27 = vld [vmem:[#allocation2 + $0x2c] ss:$0 sps:$4 sm:$0x11]  }
 0x172   : > { %6458 = vmatpush3.bf16.msra.mxu1 %v6844_v29  ;;  %v2840_v29 = vrot.slane %v2838_v34, 1  ;;  %v4130_v34 = vrot.slane %v6877_v27, 1 }
 0x173   : > { %6506 = vmatpush3.bf16.msra.mxu0 %v6848_v25  ;;  %6539 = vmatprep.subr.bf16.mxu1 %v7683_v32  ;;  %v2843_v25 = vshll.u32 %v6846_v45, 16  ;;  %v6879_v45 = vld [vmem:[#allocation2 + $0x30] sm:$0xfe]  }
 0x174   : > { %6380 = vmatmul.mubr.bf16.gmra.mrb[48].mxu1 %v7501_v38  ;;  %6587 = vmatprep.subr.bf16.mxu0 %v7688_v57  ;;  %v2800_v38 = vshrl.u32 %v6833_v46, 16  ;;  %v2841_v46 = vor.u32 %v2840_v29, %v2836_v47  ;;  %v6881_v29 = vld [vmem:[#allocation2 + $0x3c] sm:$0xfe]   ;;  %v6883_v47 = vld [vmem:[%s8324_s3 + $0x210] sm:$0xff]  }
 0x175   : > { %6383 = vmatprep.mubr.bf16.mxu1 %v7503_v49  ;;  %6428 = vmatmul.mubr.bf16.gmra.mrb[80].mxu0 %v7693_v62  ;;  %v2809_v49 = vrot.slane %v2807_v6, 1  ;;  %v2845_v20 = vrot.slane %v2843_v25, 1  ;;  %v4132_v25 = vrot.slane %v6879_v45, 1  ;;  %v1462_v45 = vld [vmem:[#allocation4 + $0x28] sm:$0xff] }
 0x176   : > { %6431 = vmatprep.mubr.bf16.mxu0 %v7699_v44  ;;  %v2805_v9 = vor.u32 %v2804_v2, %v2800_v38  ;;  %v2860_v2 = vshrl.u32 %v6865_v23, 16 }
 0x178   : > { %v7709_v12 = vsel %vm2654_vm9, %v2805_v9, %v2809_v49  ;;  %v2865_v9 = vor.u32 %v2864_v3, %v2860_v2  ;;  %v4123_v49 = vrot.slane %v6868_v54, 1  ;;  %v6889_v3 = vld [vmem:[#allocation2 + $0x60] sm:$0xfe]   ;;  %v6891_v54 = vld [vmem:[#allocation2 + $0x6c] sm:$0xfe]  }
 0x17a   : > { %v2870_v18 = vsel %vm2654_vm9, %v2865_v9, %v2869_v13 }
 0x17c   : > { %6384 = vmatmul.mubr.bf16.gmra.mrb[52].mxu1 %v7517_v30  ;;  %v2829_v30 = vor.u32 %v2828_v22, %v2824_v35  ;;  %v4125_v22 = vsel %vm4119_vm11, %v4123_v49, %v4124_v16 }
 0x17d   : > { %6387 = vmatprep.mubr.bf16.mxu1 %v7523_v50  ;;  %6432 = vmatmul.mubr.bf16.gmra.mrb[84].mxu0 %v7704_v21  ;;  %v7714_v50 = vsel %vm2654_vm9, %v2817_v40, %v2821_v43  ;;  %v4129_v40 = vrot.slane %v6876_v26, 1  ;;  %v6903_v26 = vld [vmem:[%s8324_s3 + $0x230] sm:$0xff]  }
 0x17e   : > { %6435 = vmatprep.mubr.bf16.mxu0 %v7709_v12  ;;  %v7719_v4 = vsel %vm2654_vm9, %v2829_v30, %v2833_v41  ;;  %v6878_v30 = vld [vmem:[%s8324_s3 + $0x208] sm:$0xff]   ;;  %v6880_v41 = vld [vmem:[#allocation2 + $0x38] ss:$0 sps:$4 sm:$0x11]  }
 0x184   : > { %6388 = vmatmul.mubr.bf16.gmra.mrb[56].mxu1 %v7533_v61  ;;  %v7723_v61 = vsel %vm2654_vm9, %v2841_v46, %v2845_v20  ;;  %v1459_v46 = vld [vmem:[#allocation4 + $0x10] sm:$0xff]  ;;  %v4135_v20 = vrot.slane %v6881_v29, 1 }
 0x185   : > { %6391 = vmatprep.mubr.bf16.mxu1 %v7535_v63  ;;  %6436 = vmatmul.mubr.bf16.gmra.mrb[88].mxu0 %v7714_v50  ;;  %v6850_v63 = vld [vmem:[%s8324_s3 + $0x88] sm:$0xff]  }
 0x186   : > { %6439 = vmatprep.mubr.bf16.mxu0 %v7719_v4 }
 0x18c   : > { %6392 = vmatmul.mubr.bf16.gmra.mrb[60].mxu1 %v6843_v1  ;;  %v4133_v1 = vrot.slane %v6880_v41, 1  ;;  %v4147_v41 = vrot.slane %v6891_v54, 1 }
 0x18d   : > { %6440 = vmatmul.mubr.bf16.gmra.mrb[92].mxu0 %v7723_v61  ;;  %6459 = vmatprep.mubr.bf16.mxu1 %v7547_v28  ;;  %v6851_v28 = vld [vmem:[%s8324_s3 + $0x90] sm:$0xff]  }
 0x18e   : > { %6507 = vmatprep.mubr.bf16.mxu0 %v7555_v33 }
 0x194   : > { %6460 = vmatmul.mubr.bf16.vlgmr.msra.gmra.mrb[64].mxu1 %v7555_v33  ;;  %v6857_v33 = vld [vmem:[%s8324_s3 + $0x150] sm:$0xff]  }
 0x195   : > { %6463 = vmatprep.mubr.bf16.mxu1 %v7571_v39  ;;  %6508 = vmatmul.mubr.bf16.vlgmr.msra.gmra.mrb[96].mxu0 %v7571_v39  ;;  %v6852_v39 = vld [vmem:[%s8324_s3 + $0x98] sm:$0xff]  }
 0x196   : > { %6540 = vmatpush3.bf16.msra.mxu1 %v7683_v32  ;;  %6511 = vmatprep.mubr.bf16.mxu0 %v7579_v56  ;;  %v6863_v32 = vld [vmem:[%s8324_s3 + $0x168] sm:$0xff]  }
 0x197   : > { %6541 = vmatprep.subr.bf16.mxu1 %v6850_v63  ;;  %6588 = vmatpush3.bf16.msra.mxu0 %v7688_v57  ;;  %v7791_v57 = vld [vmem:[%s8324_s3 + $0x200] sm:$0xff]  }
 0x198   : > { %6589 = vmatprep.subr.bf16.mxu0 %v6855_v37 }
 0x19a   : > { %6542 = vmatpush3.bf16.msra.mxu1 %v6850_v63  ;;  %v1457_v63 = vld [vmem:[#allocation4] sm:$0xff] }
 0x19b   : > { %6543 = vmatprep.subr.bf16.mxu1 %v6851_v28  ;;  %6590 = vmatpush3.bf16.msra.mxu0 %v6855_v37  ;;  %v6885_v37 = vld [vmem:[#allocation2 + $0x50] ss:$0 sps:$4 sm:$0x11]  }
 0x19c   : > { %6464 = vmatmul.mubr.bf16.gmra.mrb[68].mxu1 %v7579_v56  ;;  %6591 = vmatprep.subr.bf16.mxu0 %v6857_v33  ;;  %v6860_v56 = vld [vmem:[%s8324_s3 + $0x160] sm:$0xff]  }
 0x19d   : > { %6467 = vmatprep.mubr.bf16.mxu1 %v7602_v7  ;;  %6512 = vmatmul.mubr.bf16.gmra.mrb[100].mxu0 %v7602_v7  ;;  %v6856_v7 = vld [vmem:[%s8324_s3 + $0xa8] sm:$0xff]  }
 0x19e   : > { %6515 = vmatprep.mubr.bf16.mxu0 %v7612_v14  ;;  %6544 = vmatpush3.bf16.msra.mxu1 %v6851_v28 }
 0x19f   : > { %6545 = vmatprep.subr.bf16.mxu1 %v6852_v39  ;;  %6592 = vmatpush3.bf16.msra.mxu0 %v6857_v33  ;;  %v1460_v33 = vld [vmem:[#allocation4 + $0x18] sm:$0xff] }
 0x1a0   : > { %6593 = vmatprep.subr.bf16.mxu0 %v6858_v51 }
 0x1a2   : > { %6546 = vmatpush3.bf16.msra.mxu1 %v6852_v39 }
 0x1a3   : > { %6547 = vmatprep.subr.bf16.mxu1 %v6853_v52  ;;  %6594 = vmatpush3.bf16.msra.mxu0 %v6858_v51 }
 0x1a4   : > { %6468 = vmatmul.mubr.bf16.gmra.mrb[72].mxu1 %v7612_v14  ;;  %6595 = vmatprep.subr.bf16.mxu0 %v6860_v56  ;;  %v6867_v14 = vld [vmem:[%s8324_s3 + $0x170] sm:$0xff]  }
 0x1a5   : > { %6471 = vmatprep.mubr.bf16.mxu1 %v7667_v24  ;;  %6516 = vmatmul.mubr.bf16.gmra.mrb[104].mxu0 %v7667_v24  ;;  %v6864_v24 = vld [vmem:[%s8324_s3 + $0xb8] sm:$0xff]  }
 0x1a6   : > { %6519 = vmatprep.mubr.bf16.mxu0 %v7675_v48  ;;  %6548 = vmatpush3.bf16.msra.mxu1 %v6853_v52 }
 0x1a7   : > { %6549 = vmatprep.subr.bf16.mxu1 %v6856_v7  ;;  %6596 = vmatpush3.bf16.msra.mxu0 %v6860_v56  ;;  %v1458_v56 = vld [vmem:[#allocation4 + $0x8] sm:$0xff] }
 0x1a8   : > { %6597 = vmatprep.subr.bf16.mxu0 %v6863_v32 }
 0x1aa   : > { %6550 = vmatpush3.bf16.msra.mxu1 %v6856_v7  ;;  %v6888_v7 = vld [vmem:[%s8324_s3 + $0x218] sm:$0xff]  }
 0x1ab   : > { %6551 = vmatprep.subr.bf16.mxu1 %v6859_v53  ;;  %6598 = vmatpush3.bf16.msra.mxu0 %v6863_v32  ;;  %v7830_v32 = vsel %vm4119_vm11, %v4132_v25, %v4133_v1 }
 0x1ac   : > { %6472 = vmatmul.mubr.bf16.gmra.mrb[76].mxu1 %v7675_v48  ;;  %6599 = vmatprep.subr.bf16.mxu0 %v6867_v14  ;;  %v6861_v48 = vld [vmem:[#allocation2 + $0xc0] sm:$0xff]  }
 0x1ad   : > { %6475 = vmatprep.mubr.bf16.mxu1 %v7693_v62  ;;  %6520 = vmatmul.mubr.bf16.gmra.mrb[108].mxu0 %v7693_v62  ;;  %v2850_v11 = vshll.u32 %v6861_v48, 16  ;;  %v2848_v60 = vshrl.u32 %v6861_v48, 16  ;;  %v2855_v62 = vshll.u32 %v6862_v58, 16 }
 0x1ae   : > { %6523 = vmatprep.mubr.bf16.mxu0 %v7699_v44  ;;  %6552 = vmatpush3.bf16.msra.mxu1 %v6859_v53  ;;  %v6884_v53 = vld [vmem:[#allocation2 + $0x48] sm:$0xfe]  }
 0x1af   : > { %6553 = vmatprep.subr.bf16.mxu1 %v6864_v24  ;;  %6600 = vmatpush3.bf16.msra.mxu0 %v6867_v14  ;;  %v2852_v17 = vrot.slane %v2850_v11, 1  ;;  %v2857_v38 = vrot.slane %v2855_v62, 1  ;;  %v6886_v14 = vld [vmem:[#allocation2 + $0x54] sm:$0xfe]   ;;  %v4138_v62 = vrot.slane %v6884_v53, 1 }
 0x1b0   : > { %6601 = vmatprep.subr.bf16.mxu0 %v6870_v55  ;;  %v6887_v11 = vld [vmem:[#allocation2 + $0x5c] ss:$0 sps:$4 sm:$0x11]  }
 0x1b1   : > { %v2853_v0 = vor.u32 %v2852_v17, %v2848_v60  ;;  %v6893_v60 = vld [vmem:[%s8324_s3 + $0x220] sm:$0xff]   ;;  %v4142_v2 = vrot.slane %v6887_v11, 1  ;;  %v1465_v53 = vld [vmem:[#allocation4 + $0x40] sm:$0xff] }
 0x1b2   : > { %6554 = vmatpush3.bf16.msra.mxu1 %v6864_v24 }
 0x1b3   : > { %6602 = vmatpush3.bf16.msra.mxu0 %v6870_v55  ;;  %6635 = vmatprep.subr.bf16.mxu1 %v7791_v57  ;;  %v2858_v6 = vsel %vm2654_vm9, %v2853_v0, %v2857_v38  ;;  %v4139_v0 = vrot.slane %v6885_v37, 1  ;;  %v6908_v37 = vld [vmem:[%s8324_s3 + $0x238] sm:$0xff]  }
 0x1b4   : > { %6476 = vmatmul.mubr.bf16.gmra.mrb[80].mxu1 %v7699_v44  ;;  %v6871_v44 = vld [vmem:[#allocation2] sm:$0xfe]  }
 0x1b5   : > { %6479 = vmatprep.mubr.bf16.mxu1 %v7704_v21  ;;  %6524 = vmatmul.mubr.bf16.gmra.mrb[112].mxu0 %v7704_v21  ;;  %v4120_v15 = vrot.slane %v6871_v44, 1  ;;  %v6874_v21 = vld [vmem:[#allocation2 + $0x18] sm:$0xfe]   ;;  %v4141_v44 = vrot.slane %v6886_v14, 1  ;;  %v7850_v36 = vsel %vm4119_vm11, %v4138_v62, %v4139_v0 }
 0x1b6   : > { %6527 = vmatprep.mubr.bf16.mxu0 %v7709_v12  ;;  %v4126_v35 = vrot.slane %v6874_v21, 1 }
 0x1b7   : > { %v4122_v19 = vsel %vm4119_vm11, %v4120_v15, %v4121_v10  ;;  %v7855_v8 = vsel %vm4119_vm11, %v4141_v44, %v4142_v2  ;;  %v6892_v15 = vld [vmem:[#allocation2 + $0x74] ss:$0 sps:$4 sm:$0x11]   ;;  %v1463_v10 = vld [vmem:[#allocation4 + $0x30] sm:$0xff] }
 0x1b8   : > { %v4148_v29 = vrot.slane %v6892_v15, 1 }
 0x1bc   : > { %6480 = vmatmul.mubr.bf16.gmra.mrb[84].mxu1 %v7709_v12  ;;  %v6875_v12 = vld [vmem:[#allocation2 + $0x20] ss:$0 sps:$4 sm:$0x11]  }
 0x1bd   : > { %6483 = vmatprep.mubr.bf16.mxu1 %v7714_v50  ;;  %6528 = vmatmul.mubr.bf16.gmra.mrb[116].mxu0 %v7714_v50  ;;  %v4127_v42 = vrot.slane %v6875_v12, 1  ;;  %v7818_v50 = vsel %vm4119_vm11, %v4129_v40, %v4130_v34 }
 0x1be   : > { %6531 = vmatprep.mubr.bf16.mxu0 %v7719_v4 }
 0x1bf   : > { %v7813_v43 = vsel %vm4119_vm11, %v4126_v35, %v4127_v42  ;;  %v4144_v35 = vrot.slane %v6889_v3, 1 }
 0x1c4   : > { %6484 = vmatmul.mubr.bf16.gmra.mrb[88].mxu1 %v7719_v4  ;;  %v6882_v4 = vld [vmem:[#allocation2 + $0x44] ss:$0 sps:$4 sm:$0x11]  }
 0x1c5   : > { %6487 = vmatprep.mubr.bf16.mxu1 %v7723_v61  ;;  %6532 = vmatmul.mubr.bf16.gmra.mrb[120].mxu0 %v7723_v61  ;;  %v4136_v61 = vrot.slane %v6882_v4, 1 }
 0x1c6   : > { %6535 = vmatprep.mubr.bf16.mxu0 %v2858_v6 }
 0x1c7   : > { %v7835_v48 = vsel %vm4119_vm11, %v4135_v20, %v4136_v61 }
 0x1cc   : > { %6488 = vmatmul.mubr.bf16.gmra.mrb[92].mxu1 %v2858_v6  ;;  %v6890_v6 = vld [vmem:[#allocation2 + $0x68] ss:$0 sps:$4 sm:$0x11]  }
 0x1cd   : > { %6536 = vmatmul.mubr.bf16.gmra.mrb[124].mxu0 %v2870_v18  ;;  %6555 = vmatprep.mubr.bf16.mxu1 %v4122_v19  ;;  %v1461_v18 = vld [vmem:[#allocation4 + $0x20] sm:$0xff]  ;;  %v4145_v42 = vrot.slane %v6890_v6, 1 }
 0x1ce   : > { %6603 = vmatprep.mubr.bf16.mxu0 %v4125_v22 }
 0x1d4   : > { %6556 = vmatmul.mubr.bf16.vlgmr.msra.gmra.mrb[96].mxu1 %v4125_v22  ;;  %v1464_v22 = vld [vmem:[#allocation4 + $0x38] sm:$0xff] }
 0x1d5   : > { %6559 = vmatprep.mubr.bf16.mxu1 %v7813_v43  ;;  %6604 = vmatmul.mubr.bf16.vlgmr.msra.gmra.mrb[128].mxu0 %v7813_v43 }
 0x1d6   : > { %6636 = vmatpush3.bf16.msra.mxu1 %v7791_v57  ;;  %6607 = vmatprep.mubr.bf16.mxu0 %v7818_v50 }
 0x1d7   : > { %6637 = vmatprep.subr.bf16.mxu1 %v6878_v30 }
 0x1da   : > { %6638 = vmatpush3.bf16.msra.mxu1 %v6878_v30  ;;  %v6269_v28 = vpop.f32.mrb[0].mxu1 }
 0x1db   : > { %6639 = vmatprep.subr.bf16.mxu1 %v6883_v47  ;;  %v1716_v39 = vadd.f32 %v6269_v28, %v1459_v46  ;;  %v1587_v51 = vpop.f32.mrb[1].mxu1  ;;  %v6317_v52 = vpop.f32.mrb[32].mxu0  ;;  %v7872_v28 = vsel %vm4119_vm11, %v4144_v35, %v4145_v42  ;;  %v1469_v35 = vld [vmem:[#allocation4 + $0x60] sm:$0xff] }
 0x1dc   : > { %6560 = vmatmul.mubr.bf16.gmra.mrb[100].mxu1 %v7818_v50  ;;  %v1714_v24 = vadd.f32 %v1587_v51, %v1457_v63  ;;  %v6270_v55 = vpop.f32.mrb[2].mxu1  ;;  %v1926_v57 = vpop.f32.mrb[33].mxu0  ;;  %v7878_v51 = vsel %vm4119_vm11, %v4147_v41, %v4148_v29 }
 0x1dd   : > { %6563 = vmatprep.mubr.bf16.mxu1 %v7830_v32  ;;  %6608 = vmatmul.mubr.bf16.gmra.mrb[132].mxu0 %v7830_v32  ;;  %1748 = vst.msk [vmem:[#allocation4 + $0x10] sm:$0xff] %vm1246_vm10, %v1716_v39  ;;  %v1717_v23 = vadd.f32 %v6270_v55, %v1460_v33  ;;  %v1590_v58 = vpop.f32.mrb[3].mxu1  ;;  %v6318_v17 = vpop.f32.mrb[34].mxu0  ;;  %v6894_v33 = vld [vmem:[#allocation2 + $0x78] sm:$0xfe]  }
 0x1de   : > { %6611 = vmatprep.mubr.bf16.mxu0 %v7835_v48  ;;  %6640 = vmatpush3.bf16.msra.mxu1 %v6883_v47  ;;  %1746 = vst.msk [vmem:[#allocation4] sm:$0xff] %vm1246_vm10, %v1714_v24  ;;  %v1715_v59 = vadd.f32 %v1590_v58, %v1458_v56  ;;  %v1929_v31 = vpop.f32.mrb[35].mxu0  ;;  %v6895_v39 = vld [vmem:[#allocation2 + $0x80] ss:$0 sps:$4 sm:$0x11]   ;;  %v4150_v14 = vrot.slane %v6894_v33, 1 }
 0x1df   : > { %1749 = vst.msk [vmem:[#allocation4 + $0x18] sm:$0xff] %vm1246_vm10, %v1717_v23  ;;  %6641 = vmatprep.subr.bf16.mxu1 %v6888_v7  ;;  %v6897_v56 = vld [vmem:[#allocation2 + $0x8c] ss:$0 sps:$4 sm:$0x11]   ;;  %v4151_v24 = vrot.slane %v6895_v39, 1 }
 0x1e0   : > { %1747 = vst.msk [vmem:[#allocation4 + $0x8] sm:$0xff] %vm1246_vm10, %v1715_v59  ;;  %v4154_v58 = vrot.slane %v6897_v56, 1  ;;  %v6904_v56 = vld [vmem:[#allocation2 + $0xa8] sm:$0xfe]  }
 0x1e2   : > { %6642 = vmatpush3.bf16.msra.mxu1 %v6888_v7  ;;  %v1467_v7 = vld [vmem:[#allocation4 + $0x50] sm:$0xff] }
 0x1e3   : > { %6643 = vmatprep.subr.bf16.mxu1 %v6893_v60 }
 0x1e4   : > { %6564 = vmatmul.mubr.bf16.gmra.mrb[104].mxu1 %v7835_v48  ;;  %v1797_v38 = vld [vmem:[#allocation4 + $0x10] sm:$0xff] }
 0x1e5   : > { %6567 = vmatprep.mubr.bf16.mxu1 %v7850_v36  ;;  %6612 = vmatmul.mubr.bf16.gmra.mrb[136].mxu0 %v7850_v36  ;;  %v2055_v9 = vadd.f32 %v6317_v52, %v1797_v38  ;;  %v1795_v13 = vld [vmem:[#allocation4] sm:$0xff]  ;;  %v6896_v52 = vld [vmem:[#allocation2 + $0x84] sm:$0xfe]  }
 0x1e6   : > { %6615 = vmatprep.mubr.bf16.mxu0 %v7855_v8  ;;  %v2053_v49 = vadd.f32 %v1926_v57, %v1795_v13  ;;  %v1798_v16 = vld [vmem:[#allocation4 + $0x18] sm:$0xff]  ;;  %6644 = vmatpush3.bf16.msra.mxu1 %v6893_v60  ;;  %v4153_v23 = vrot.slane %v6896_v52, 1  ;;  %v1466_v60 = vld [vmem:[#allocation4 + $0x48] sm:$0xff] }
 0x1e7   : > { %2087 = vst.msk [vmem:[#allocation4 + $0x10] sm:$0xff] %vm1246_vm10, %v2055_v9  ;;  %v2056_v19 = vadd.f32 %v6318_v17, %v1798_v16  ;;  %v1796_v21 = vld [vmem:[#allocation4 + $0x8] sm:$0xff]  ;;  %v6273_v12 = vpop.f32.mrb[4].mxu1  ;;  %6645 = vmatprep.subr.bf16.mxu1 %v6898_v5  ;;  %v1468_v57 = vld [vmem:[#allocation4 + $0x58] sm:$0xff] }
 0x1e8   : > { %2085 = vst.msk [vmem:[#allocation4] sm:$0xff] %vm1246_vm10, %v2053_v49  ;;  %v2054_v27 = vadd.f32 %v1929_v31, %v1796_v21  ;;  %v1720_v40 = vadd.f32 %v6273_v12, %v1463_v10  ;;  %v1603_v34 = vpop.f32.mrb[5].mxu1  ;;  %v6899_v13 = vld [vmem:[#allocation2 + $0x90] sm:$0xfe]   ;;  %v7886_v49 = vsel %vm4119_vm11, %v4150_v14, %v4151_v24  ;;  %v7893_v12 = vsel %vm4119_vm11, %v4153_v23, %v4154_v58 }
 0x1e9   : > { %2088 = vst.msk [vmem:[#allocation4 + $0x18] sm:$0xff] %vm1246_vm10, %v2056_v19  ;;  %v1718_v4 = vadd.f32 %v1603_v34, %v1461_v18  ;;  %v6274_v47 = vpop.f32.mrb[6].mxu1  ;;  %v6900_v19 = vld [vmem:[#allocation2 + $0x98] ss:$0 sps:$4 sm:$0x11]   ;;  %v4156_v42 = vrot.slane %v6899_v13, 1 }
 0x1ea   : > { %v6321_v30 = vpop.f32.mrb[36].mxu0  ;;  %2086 = vst.msk [vmem:[#allocation4 + $0x8] sm:$0xff] %vm1246_vm10, %v2054_v27  ;;  %1752 = vst.msk [vmem:[#allocation4 + $0x30] sm:$0xff] %vm1246_vm10, %v1720_v40  ;;  %v1721_v1 = vadd.f32 %v6274_v47, %v1464_v22  ;;  %v1606_v46 = vpop.f32.mrb[7].mxu1  ;;  %6646 = vmatpush3.bf16.msra.mxu1 %v6898_v5  ;;  %v6901_v22 = vld [vmem:[#allocation2 + $0x9c] sm:$0xfe]  }
 0x1eb   : > { %v1942_v25 = vpop.f32.mrb[37].mxu0  ;;  %1750 = vst.msk [vmem:[#allocation4 + $0x20] sm:$0xff] %vm1246_vm10, %v1718_v4  ;;  %v1719_v61 = vadd.f32 %v1606_v46, %v1462_v45  ;;  %6647 = vmatprep.subr.bf16.mxu1 %v6903_v26  ;;  %v1471_v27 = vld [vmem:[#allocation4 + $0x70] sm:$0xff]  ;;  %v4157_v40 = vrot.slane %v6900_v19, 1  ;;  %v4159_v45 = vrot.slane %v6901_v22, 1 }
 0x1ec   : > { %v6322_v20 = vpop.f32.mrb[38].mxu0  ;;  %6568 = vmatmul.mubr.bf16.gmra.mrb[108].mxu1 %v7855_v8  ;;  %1753 = vst.msk [vmem:[#allocation4 + $0x38] sm:$0xff] %vm1246_vm10, %v1721_v1 }
 0x1ed   : > { %v1945_v63 = vpop.f32.mrb[39].mxu0  ;;  %6571 = vmatprep.mubr.bf16.mxu1 %v7872_v28  ;;  %6616 = vmatmul.mubr.bf16.gmra.mrb[140].mxu0 %v7872_v28  ;;  %1751 = vst.msk [vmem:[#allocation4 + $0x28] sm:$0xff] %vm1246_vm10, %v1719_v61  ;;  %v7903_v14 = vsel %vm4119_vm11, %v4156_v42, %v4157_v40  ;;  %v1474_v42 = vld [vmem:[#allocation4 + $0x88] sm:$0xff] }
 0x1ee   : > { %6619 = vmatprep.mubr.bf16.mxu0 %v7878_v51  ;;  %6648 = vmatpush3.bf16.msra.mxu1 %v6903_v26  ;;  %v6902_v26 = vld [vmem:[#allocation2 + $0xa4] ss:$0 sps:$4 sm:$0x11]  }
 0x1ef   : > { %6649 = vmatprep.subr.bf16.mxu1 %v6908_v37  ;;  %v4160_v41 = vrot.slane %v6902_v26, 1 }
 0x1f1   : > { %v6277_v55 = vpop.f32.mrb[8].mxu1  ;;  %v1801_v11 = vld [vmem:[#allocation4 + $0x30] sm:$0xff]  ;;  %v7910_v58 = vsel %vm4119_vm11, %v4159_v45, %v4160_v41 }
 0x1f2   : > { %v1724_v17 = vadd.f32 %v6277_v55, %v1467_v7  ;;  %v1619_v59 = vpop.f32.mrb[9].mxu1  ;;  %v2059_v62 = vadd.f32 %v6321_v30, %v1801_v11  ;;  %v1799_v0 = vld [vmem:[#allocation4 + $0x20] sm:$0xff]  ;;  %6650 = vmatpush3.bf16.msra.mxu1 %v6908_v37  ;;  %v1472_v30 = vld [vmem:[#allocation4 + $0x78] sm:$0xff] }
 0x1f3   : > { %v6325_v31 = vpop.f32.mrb[40].mxu0  ;;  %v1722_v44 = vadd.f32 %v1619_v59, %v1465_v53  ;;  %v6278_v2 = vpop.f32.mrb[10].mxu1  ;;  %v2057_v5 = vadd.f32 %v1942_v25, %v1799_v0  ;;  %v1802_v38 = vld [vmem:[#allocation4 + $0x38] sm:$0xff]  ;;  %v1470_v25 = vld [vmem:[#allocation4 + $0x68] sm:$0xff] }
 0x1f4   : > { %v1958_v3 = vpop.f32.mrb[41].mxu0  ;;  %1756 = vst.msk [vmem:[#allocation4 + $0x50] sm:$0xff] %vm1246_vm10, %v1724_v17  ;;  %v1725_v6 = vadd.f32 %v6278_v2, %v1468_v57  ;;  %v1622_v54 = vpop.f32.mrb[11].mxu1  ;;  %2091 = vst.msk [vmem:[#allocation4 + $0x30] sm:$0xff] %vm1246_vm10, %v2059_v62  ;;  %v2060_v15 = vadd.f32 %v6322_v20, %v1802_v38  ;;  %v1800_v10 = vld [vmem:[#allocation4 + $0x28] sm:$0xff]  ;;  %6572 = vmatmul.mubr.bf16.gmra.mrb[112].mxu1 %v7878_v51 }
 0x1f5   : > { %v6326_v9 = vpop.f32.mrb[42].mxu0  ;;  %1754 = vst.msk [vmem:[#allocation4 + $0x40] sm:$0xff] %vm1246_vm10, %v1722_v44  ;;  %v1723_v16 = vadd.f32 %v1622_v54, %v1466_v60  ;;  %2089 = vst.msk [vmem:[#allocation4 + $0x20] sm:$0xff] %vm1246_vm10, %v2057_v5  ;;  %v2058_v21 = vadd.f32 %v1945_v63, %v1800_v10  ;;  %6575 = vmatprep.mubr.bf16.mxu1 %v7886_v49  ;;  %6620 = vmatmul.mubr.bf16.gmra.mrb[144].mxu0 %v7886_v49  ;;  %v6905_v57 = vld [vmem:[#allocation2 + $0xb0] ss:$0 sps:$4 sm:$0x11]  }
 0x1f6   : > { %v1961_v18 = vpop.f32.mrb[43].mxu0  ;;  %1757 = vst.msk [vmem:[#allocation4 + $0x58] sm:$0xff] %vm1246_vm10, %v1725_v6  ;;  %2092 = vst.msk [vmem:[#allocation4 + $0x38] sm:$0xff] %vm1246_vm10, %v2060_v15  ;;  %6623 = vmatprep.mubr.bf16.mxu0 %v7893_v12  ;;  %v6906_v17 = vld [vmem:[#allocation2 + $0xb4] sm:$0xfe]   ;;  %v4162_v60 = vrot.slane %v6904_v56, 1 }
 0x1f7   : > { %1755 = vst.msk [vmem:[#allocation4 + $0x48] sm:$0xff] %vm1246_vm10, %v1723_v16  ;;  %2090 = vst.msk [vmem:[#allocation4 + $0x28] sm:$0xff] %vm1246_vm10, %v2058_v21  ;;  %v6907_v59 = vld [vmem:[#allocation2 + $0xbc] ss:$0 sps:$4 sm:$0x11]   ;;  %v4163_v62 = vrot.slane %v6905_v57, 1 }
 0x1f8   : > { %v4165_v0 = vrot.slane %v6906_v17, 1  ;;  %v4166_v44 = vrot.slane %v6907_v59, 1  ;;  %v1473_v6 = vld [vmem:[#allocation4 + $0x80] sm:$0xff]  ;;  %v6909_v54 = vld [vmem:[#allocation2 + $0xc0] sm:$0xfe]   ;;  %v1476_v16 = vld [vmem:[#allocation4 + $0x98] sm:$0xff] }
 0x1f9   : > { %v7920_v15 = vsel %vm4119_vm11, %v4162_v60, %v4163_v62 }
 0x1fa   : > { %v6281_v34 = vpop.f32.mrb[12].mxu1  ;;  %v7926_v22 = vsel %vm4119_vm11, %v4165_v0, %v4166_v44 }
 0x1fb   : > { %v1728_v29 = vadd.f32 %v6281_v34, %v1471_v27  ;;  %v1635_v4 = vpop.f32.mrb[13].mxu1  ;;  %v6329_v47 = vpop.f32.mrb[44].mxu0  ;;  %v1805_v1 = vld [vmem:[#allocation4 + $0x50] sm:$0xff] }
 0x1fc   : > { %v1726_v46 = vadd.f32 %v1635_v4, %v1469_v35  ;;  %v6282_v20 = vpop.f32.mrb[14].mxu1  ;;  %v1974_v61 = vpop.f32.mrb[45].mxu0  ;;  %v2063_v63 = vadd.f32 %v6325_v31, %v1805_v1  ;;  %v1803_v37 = vld [vmem:[#allocation4 + $0x40] sm:$0xff]  ;;  %6576 = vmatmul.mubr.bf16.gmra.mrb[116].mxu1 %v7893_v12  ;;  %v4168_v1 = vrot.slane %v6909_v54, 1  ;;  %v1484_v54 = vld [vmem:[#allocation4 + $0xd8] sm:$0xff] }
 0x1fd   : > { %1760 = vst.msk [vmem:[#allocation4 + $0x70] sm:$0xff] %vm1246_vm10, %v1728_v29  ;;  %v1729_v33 = vadd.f32 %v6282_v20, %v1472_v30  ;;  %v1638_v39 = vpop.f32.mrb[15].mxu1  ;;  %v6330_v52 = vpop.f32.mrb[46].mxu0  ;;  %v2061_v7 = vadd.f32 %v1958_v3, %v1803_v37  ;;  %v1806_v53 = vld [vmem:[#allocation4 + $0x58] sm:$0xff]  ;;  %6579 = vmatprep.mubr.bf16.mxu1 %v7903_v14  ;;  %6624 = vmatmul.mubr.bf16.gmra.mrb[148].mxu0 %v7903_v14  ;;  %v1475_v3 = vld [vmem:[#allocation4 + $0x90] sm:$0xff] }
 0x1fe   : > { %1758 = vst.msk [vmem:[#allocation4 + $0x60] sm:$0xff] %vm1246_vm10, %v1726_v46  ;;  %v1727_v24 = vadd.f32 %v1638_v39, %v1470_v25  ;;  %v1977_v55 = vpop.f32.mrb[47].mxu0  ;;  %2095 = vst.msk [vmem:[#allocation4 + $0x50] sm:$0xff] %vm1246_vm10, %v2063_v63  ;;  %v2064_v11 = vadd.f32 %v6326_v9, %v1806_v53  ;;  %v1804_v23 = vld [vmem:[#allocation4 + $0x48] sm:$0xff]  ;;  %6627 = vmatprep.mubr.bf16.mxu0 %v7910_v58  ;;  %v1479_v20 = vld [vmem:[#allocation4 + $0xb0] sm:$0xff] }
 0x1ff   : > { %1761 = vst.msk [vmem:[#allocation4 + $0x78] sm:$0xff] %vm1246_vm10, %v1729_v33  ;;  %2093 = vst.msk [vmem:[#allocation4 + $0x40] sm:$0xff] %vm1246_vm10, %v2061_v7  ;;  %v2062_v31 = vadd.f32 %v1961_v18, %v1804_v23  ;;  %v6910_v18 = vld [vmem:[#allocation2 + $0xc8] ss:$0 sps:$4 sm:$0x11]   ;;  %v1480_v33 = vld [vmem:[#allocation4 + $0xb8] sm:$0xff] }
 0x200   : > { %1759 = vst.msk [vmem:[#allocation4 + $0x68] sm:$0xff] %vm1246_vm10, %v1727_v24  ;;  %2096 = vst.msk [vmem:[#allocation4 + $0x58] sm:$0xff] %vm1246_vm10, %v2064_v11  ;;  %v4169_v46 = vrot.slane %v6910_v18, 1  ;;  %v1478_v7 = vld [vmem:[#allocation4 + $0xa8] sm:$0xff] }
 0x201   : > { %2094 = vst.msk [vmem:[#allocation4 + $0x48] sm:$0xff] %vm1246_vm10, %v2062_v31  ;;  %v1482_v18 = vld [vmem:[#allocation4 + $0xc8] sm:$0xff] }
 0x202   : > { %v7938_v63 = vsel %vm4119_vm11, %v4168_v1, %v4169_v46 }
 0x204   : > { %v1809_v2 = vld [vmem:[#allocation4 + $0x70] sm:$0xff]  ;;  %6580 = vmatmul.mubr.bf16.gmra.mrb[120].mxu1 %v7910_v58 }
 0x205   : > { %v2067_v5 = vadd.f32 %v6329_v47, %v1809_v2  ;;  %v1807_v38 = vld [vmem:[#allocation4 + $0x60] sm:$0xff]  ;;  %6583 = vmatprep.mubr.bf16.mxu1 %v7920_v15  ;;  %6628 = vmatmul.mubr.bf16.gmra.mrb[152].mxu0 %v7920_v15 }
 0x206   : > { %v2065_v9 = vadd.f32 %v1974_v61, %v1807_v38  ;;  %v1810_v13 = vld [vmem:[#allocation4 + $0x78] sm:$0xff]  ;;  %v6285_v10 = vpop.f32.mrb[16].mxu1  ;;  %6631 = vmatprep.mubr.bf16.mxu0 %v7926_v22  ;;  %v1477_v61 = vld [vmem:[#allocation4 + $0xa0] sm:$0xff] }
 0x207   : > { %2099 = vst.msk [vmem:[#allocation4 + $0x70] sm:$0xff] %vm1246_vm10, %v2067_v5  ;;  %v2068_v19 = vadd.f32 %v6330_v52, %v1810_v13  ;;  %v1808_v21 = vld [vmem:[#allocation4 + $0x68] sm:$0xff]  ;;  %v1732_v26 = vadd.f32 %v6285_v10, %v1475_v3  ;;  %v1651_v27 = vpop.f32.mrb[17].mxu1  ;;  %v6333_v35 = vpop.f32.mrb[48].mxu0  ;;  %v1483_v5 = vld [vmem:[#allocation4 + $0xd0] sm:$0xff]  ;;  %v1481_v38 = vld [vmem:[#allocation4 + $0xc0] sm:$0xff] }
 0x208   : > { %2097 = vst.msk [vmem:[#allocation4 + $0x60] sm:$0xff] %vm1246_vm10, %v2065_v9  ;;  %v2066_v40 = vadd.f32 %v1977_v55, %v1808_v21  ;;  %v1730_v34 = vadd.f32 %v1651_v27, %v1473_v6  ;;  %v6286_v30 = vpop.f32.mrb[18].mxu1  ;;  %v1990_v45 = vpop.f32.mrb[49].mxu0 }
 0x209   : > { %2100 = vst.msk [vmem:[#allocation4 + $0x78] sm:$0xff] %vm1246_vm10, %v2068_v19  ;;  %1764 = vst.msk [vmem:[#allocation4 + $0x90] sm:$0xff] %vm1246_vm10, %v1732_v26  ;;  %v1733_v41 = vadd.f32 %v6286_v30, %v1476_v16  ;;  %v1654_v29 = vpop.f32.mrb[19].mxu1  ;;  %v6334_v4 = vpop.f32.mrb[50].mxu0 }
 0x20a   : > { %2098 = vst.msk [vmem:[#allocation4 + $0x68] sm:$0xff] %vm1246_vm10, %v2066_v40  ;;  %1762 = vst.msk [vmem:[#allocation4 + $0x80] sm:$0xff] %vm1246_vm10, %v1730_v34  ;;  %v1731_v47 = vadd.f32 %v1654_v29, %v1474_v42  ;;  %v1993_v25 = vpop.f32.mrb[51].mxu0 }
 0x20b   : > { %1765 = vst.msk [vmem:[#allocation4 + $0x98] sm:$0xff] %vm1246_vm10, %v1733_v41 }
 0x20c   : > { %1763 = vst.msk [vmem:[#allocation4 + $0x88] sm:$0xff] %vm1246_vm10, %v1731_v47  ;;  %6584 = vmatmul.mubr.bf16.gmra.mrb[124].mxu1 %v7926_v22  ;;  %v1487_v47 = vld [vmem:[#allocation4 + $0xf0] sm:$0xff] }
 0x20d   : > { %6632 = vmatmul.mubr.bf16.gmra.mrb[156].mxu0 %v7938_v63  ;;  %6651 = vmatprep.mubr.bf16.mxu1 %v7813_v43 }
 0x20e   : > { %v6289_v37 = vpop.f32.mrb[20].mxu1 }
 0x20f   : > { %v1736_v39 = vadd.f32 %v6289_v37, %v1479_v20  ;;  %v1667_v52 = vpop.f32.mrb[21].mxu1  ;;  %v6337_v56 = vpop.f32.mrb[52].mxu0  ;;  %v1488_v20 = vld [vmem:[#allocation4 + $0xf8] sm:$0xff] }
 0x210   : > { %v1813_v53 = vld [vmem:[#allocation4 + $0x90] sm:$0xff]  ;;  %v1734_v24 = vadd.f32 %v1667_v52, %v1477_v61  ;;  %v6290_v55 = vpop.f32.mrb[22].mxu1  ;;  %v2006_v57 = vpop.f32.mrb[53].mxu0 }
 0x211   : > { %v2071_v11 = vadd.f32 %v6333_v35, %v1813_v53  ;;  %v1811_v23 = vld [vmem:[#allocation4 + $0x80] sm:$0xff]  ;;  %1768 = vst.msk [vmem:[#allocation4 + $0xb0] sm:$0xff] %vm1246_vm10, %v1736_v39  ;;  %v1737_v17 = vadd.f32 %v6290_v55, %v1480_v33  ;;  %v1670_v59 = vpop.f32.mrb[23].mxu1  ;;  %v6338_v31 = vpop.f32.mrb[54].mxu0 }
 0x212   : > { %v2069_v60 = vadd.f32 %v1990_v45, %v1811_v23  ;;  %v1814_v62 = vld [vmem:[#allocation4 + $0x98] sm:$0xff]  ;;  %1766 = vst.msk [vmem:[#allocation4 + $0xa0] sm:$0xff] %vm1246_vm10, %v1734_v24  ;;  %v1735_v43 = vadd.f32 %v1670_v59, %v1478_v7  ;;  %v2009_v0 = vpop.f32.mrb[55].mxu0 }
 0x213   : > { %2103 = vst.msk [vmem:[#allocation4 + $0x90] sm:$0xff] %vm1246_vm10, %v2071_v11  ;;  %v2072_v44 = vadd.f32 %v6334_v4, %v1814_v62  ;;  %v1812_v2 = vld [vmem:[#allocation4 + $0x88] sm:$0xff]  ;;  %1769 = vst.msk [vmem:[#allocation4 + $0xb8] sm:$0xff] %vm1246_vm10, %v1737_v17  ;;  %v2136_v62 = vld [vmem:[#allocation4 + $0x10] sm:$0xff] }
 0x214   : > { %2101 = vst.msk [vmem:[#allocation4 + $0x80] sm:$0xff] %vm1246_vm10, %v2069_v60  ;;  %v2070_v3 = vadd.f32 %v1993_v25, %v1812_v2  ;;  %1767 = vst.msk [vmem:[#allocation4 + $0xa8] sm:$0xff] %vm1246_vm10, %v1735_v43  ;;  %6652 = vmatmul.mubr.bf16.vlgmr.msra.gmra.mrb[128].mxu1 %v7818_v50  ;;  %v1485_v25 = vld [vmem:[#allocation4 + $0xe0] sm:$0xff] }
 0x215   : > { %2104 = vst.msk [vmem:[#allocation4 + $0x98] sm:$0xff] %vm1246_vm10, %v2072_v44  ;;  %6655 = vmatprep.mubr.bf16.mxu1 %v7830_v32  ;;  %v2134_v44 = vld [vmem:[#allocation4] sm:$0xff] }
 0x216   : > { %2102 = vst.msk [vmem:[#allocation4 + $0x88] sm:$0xff] %vm1246_vm10, %v2070_v3  ;;  %v6293_v6 = vpop.f32.mrb[24].mxu1 }
 0x217   : > { %v1740_v13 = vadd.f32 %v6293_v6, %v1483_v5  ;;  %v1683_v10 = vpop.f32.mrb[25].mxu1  ;;  %v6341_v16 = vpop.f32.mrb[56].mxu0  ;;  %v2137_v6 = vld [vmem:[#allocation4 + $0x18] sm:$0xff] }
 0x218   : > { %v1817_v9 = vld [vmem:[#allocation4 + $0xb0] sm:$0xff]  ;;  %v1738_v26 = vadd.f32 %v1683_v10, %v1481_v38  ;;  %v6294_v27 = vpop.f32.mrb[26].mxu1  ;;  %v2022_v35 = vpop.f32.mrb[57].mxu0 }
 0x219   : > { %v2075_v19 = vadd.f32 %v6337_v56, %v1817_v9  ;;  %v1815_v21 = vld [vmem:[#allocation4 + $0xa0] sm:$0xff]  ;;  %1772 = vst.msk [vmem:[#allocation4 + $0xd0] sm:$0xff] %vm1246_vm10, %v1740_v13  ;;  %v1741_v50 = vadd.f32 %v6294_v27, %v1484_v54  ;;  %v1686_v34 = vpop.f32.mrb[27].mxu1  ;;  %v6342_v30 = vpop.f32.mrb[58].mxu0  ;;  %v1486_v56 = vld [vmem:[#allocation4 + $0xe8] sm:$0xff] }
 0x21a   : > { %v2073_v42 = vadd.f32 %v2006_v57, %v1815_v21  ;;  %v1818_v40 = vld [vmem:[#allocation4 + $0xb8] sm:$0xff]  ;;  %1770 = vst.msk [vmem:[#allocation4 + $0xc0] sm:$0xff] %vm1246_vm10, %v1738_v26  ;;  %v1739_v41 = vadd.f32 %v1686_v34, %v1482_v18  ;;  %v2025_v29 = vpop.f32.mrb[59].mxu0 }
 0x21b   : > { %2107 = vst.msk [vmem:[#allocation4 + $0xb0] sm:$0xff] %vm1246_vm10, %v2075_v19  ;;  %v2076_v32 = vadd.f32 %v6338_v31, %v1818_v40  ;;  %v1816_v45 = vld [vmem:[#allocation4 + $0xa8] sm:$0xff]  ;;  %1773 = vst.msk [vmem:[#allocation4 + $0xd8] sm:$0xff] %vm1246_vm10, %v1741_v50  ;;  %v2140_v50 = vld [vmem:[#allocation4 + $0x30] sm:$0xff] }
 0x21c   : > { %2105 = vst.msk [vmem:[#allocation4 + $0xa0] sm:$0xff] %vm1246_vm10, %v2073_v42  ;;  %v2074_v4 = vadd.f32 %v2009_v0, %v1816_v45  ;;  %1771 = vst.msk [vmem:[#allocation4 + $0xc8] sm:$0xff] %vm1246_vm10, %v1739_v41  ;;  %6656 = vmatmul.mubr.bf16.gmra.mrb[132].mxu1 %v7835_v48 }
 0x21d   : > { %2108 = vst.msk [vmem:[#allocation4 + $0xb8] sm:$0xff] %vm1246_vm10, %v2076_v32  ;;  %6659 = vmatprep.mubr.bf16.mxu1 %v7850_v36  ;;  %v2138_v32 = vld [vmem:[#allocation4 + $0x20] sm:$0xff] }
 0x21e   : > { %2106 = vst.msk [vmem:[#allocation4 + $0xa8] sm:$0xff] %vm1246_vm10, %v2074_v4 }
 0x21f   : > { %v6297_v46 = vpop.f32.mrb[28].mxu1 }
 0x220   : > { %v1821_v1 = vld [vmem:[#allocation4 + $0xd0] sm:$0xff]  ;;  %v1744_v33 = vadd.f32 %v6297_v46, %v1487_v47  ;;  %v1699_v39 = vpop.f32.mrb[29].mxu1  ;;  %v6345_v52 = vpop.f32.mrb[60].mxu0 }
 0x221   : > { %v2079_v61 = vadd.f32 %v6341_v16, %v1821_v1  ;;  %v1819_v37 = vld [vmem:[#allocation4 + $0xc0] sm:$0xff]  ;;  %v1742_v24 = vadd.f32 %v1699_v39, %v1485_v25  ;;  %v6298_v55 = vpop.f32.mrb[30].mxu1  ;;  %v2038_v57 = vpop.f32.mrb[61].mxu0  ;;  %v2135_v16 = vld [vmem:[#allocation4 + $0x8] sm:$0xff] }
 0x222   : > { %v2077_v7 = vadd.f32 %v2022_v35, %v1819_v37  ;;  %v1822_v53 = vld [vmem:[#allocation4 + $0xd8] sm:$0xff]  ;;  %1776 = vst.msk [vmem:[#allocation4 + $0xf0] sm:$0xff] %vm1246_vm10, %v1744_v33  ;;  %v1745_v11 = vadd.f32 %v6298_v55, %v1488_v20  ;;  %v1702_v23 = vpop.f32.mrb[31].mxu1  ;;  %v6346_v17 = vpop.f32.mrb[62].mxu0  ;;  %v2139_v20 = vld [vmem:[#allocation4 + $0x28] sm:$0xff]  ;;  %v2144_v55 = vld [vmem:[#allocation4 + $0x50] sm:$0xff] }
 0x223   : > { %2111 = vst.msk [vmem:[#allocation4 + $0xd0] sm:$0xff] %vm1246_vm10, %v2079_v61  ;;  %v2080_v48 = vadd.f32 %v6342_v30, %v1822_v53  ;;  %v1820_v36 = vld [vmem:[#allocation4 + $0xc8] sm:$0xff]  ;;  %1774 = vst.msk [vmem:[#allocation4 + $0xe0] sm:$0xff] %vm1246_vm10, %v1742_v24  ;;  %v1743_v31 = vadd.f32 %v1702_v23, %v1486_v56  ;;  %v2041_v60 = vpop.f32.mrb[63].mxu0 }
 0x224   : > { %2109 = vst.msk [vmem:[#allocation4 + $0xc0] sm:$0xff] %vm1246_vm10, %v2077_v7  ;;  %v2078_v59 = vadd.f32 %v2025_v29, %v1820_v36  ;;  %1777 = vst.msk [vmem:[#allocation4 + $0xf8] sm:$0xff] %vm1246_vm10, %v1745_v11  ;;  %6660 = vmatmul.mubr.bf16.gmra.mrb[136].mxu1 %v7855_v8  ;;  %v2142_v36 = vld [vmem:[#allocation4 + $0x40] sm:$0xff] }
 0x225   : > { %2112 = vst.msk [vmem:[#allocation4 + $0xd8] sm:$0xff] %vm1246_vm10, %v2080_v48  ;;  %1775 = vst.msk [vmem:[#allocation4 + $0xe8] sm:$0xff] %vm1246_vm10, %v1743_v31  ;;  %6663 = vmatprep.mubr.bf16.mxu1 %v7872_v28 }
 0x226   : > { %2110 = vst.msk [vmem:[#allocation4 + $0xc8] sm:$0xff] %vm1246_vm10, %v2078_v59 }
 0x227   : > { %v6365_v43 = vpop.f32.mrb[32].mxu1 }
 0x228   : > { %v2394_v0 = vadd.f32 %v6365_v43, %v2136_v62  ;;  %v2265_v2 = vpop.f32.mrb[33].mxu1  ;;  %v6413_v3 = vpop.f32.mrb[64].mxu0 }
 0x229   : > { %v1825_v5 = vld [vmem:[#allocation4 + $0xf0] sm:$0xff]  ;;  %v2392_v38 = vadd.f32 %v2265_v2, %v2134_v44  ;;  %v6366_v54 = vpop.f32.mrb[34].mxu1  ;;  %v3054_v9 = vpop.f32.mrb[65].mxu0 }
 0x22a   : > { %v2083_v13 = vadd.f32 %v6345_v52, %v1825_v5  ;;  %v1823_v10 = vld [vmem:[#allocation4 + $0xe0] sm:$0xff]  ;;  %2426 = vst.msk [vmem:[#allocation4 + $0x10] sm:$0xff] %vm1246_vm10, %v2394_v0  ;;  %v2395_v8 = vadd.f32 %v6366_v54, %v2137_v6  ;;  %v2268_v18 = vpop.f32.mrb[35].mxu1  ;;  %v6414_v19 = vpop.f32.mrb[66].mxu0  ;;  %v2143_v0 = vld [vmem:[#allocation4 + $0x48] sm:$0xff] }
 0x22b   : > { %v2081_v28 = vadd.f32 %v2038_v57, %v1823_v10  ;;  %v1826_v21 = vld [vmem:[#allocation4 + $0xf8] sm:$0xff]  ;;  %2424 = vst.msk [vmem:[#allocation4] sm:$0xff] %vm1246_vm10, %v2392_v38  ;;  %v2393_v26 = vadd.f32 %v2268_v18, %v2135_v16  ;;  %v3057_v27 = vpop.f32.mrb[67].mxu0  ;;  %v2148_v10 = vld [vmem:[#allocation4 + $0x70] sm:$0xff]  ;;  %v2146_v18 = vld [vmem:[#allocation4 + $0x60] sm:$0xff] }
 0x22c   : > { %2115 = vst.msk [vmem:[#allocation4 + $0xf0] sm:$0xff] %vm1246_vm10, %v2083_v13  ;;  %v2084_v35 = vadd.f32 %v6346_v17, %v1826_v21  ;;  %v1824_v42 = vld [vmem:[#allocation4 + $0xe8] sm:$0xff]  ;;  %2427 = vst.msk [vmem:[#allocation4 + $0x18] sm:$0xff] %vm1246_vm10, %v2395_v8  ;;  %6664 = vmatmul.mubr.bf16.gmra.mrb[140].mxu1 %v7878_v51  ;;  %v2141_v51 = vld [vmem:[#allocation4 + $0x38] sm:$0xff] }
 0x22d   : > { %2113 = vst.msk [vmem:[#allocation4 + $0xe0] sm:$0xff] %vm1246_vm10, %v2081_v28  ;;  %v2082_v40 = vadd.f32 %v2041_v60, %v1824_v42  ;;  %2425 = vst.msk [vmem:[#allocation4 + $0x8] sm:$0xff] %vm1246_vm10, %v2393_v26  ;;  %6667 = vmatprep.mubr.bf16.mxu1 %v7886_v49  ;;  %v6912_v21 = vld [vmem:[#allocation2 + $0xd4] ss:$0 sps:$4 sm:$0x11]  }
 0x22e   : > { %2116 = vst.msk [vmem:[#allocation4 + $0xf8] sm:$0xff] %vm1246_vm10, %v2084_v35 }
 0x22f   : > { %2114 = vst.msk [vmem:[#allocation4 + $0xe8] sm:$0xff] %vm1246_vm10, %v2082_v40  ;;  %v6369_v34 = vpop.f32.mrb[36].mxu1  ;;  %v6911_v40 = vld [vmem:[#allocation2 + $0xcc] sm:$0xfe]  }
 0x230   : > { %v2398_v30 = vadd.f32 %v6369_v34, %v2140_v50  ;;  %v2281_v45 = vpop.f32.mrb[37].mxu1  ;;  %v6417_v41 = vpop.f32.mrb[68].mxu0 }
 0x231   : > { %v2925_v29 = vld [vmem:[#allocation4 + $0x10] sm:$0xff]  ;;  %v2396_v4 = vadd.f32 %v2281_v45, %v2138_v32  ;;  %v6370_v47 = vpop.f32.mrb[38].mxu1  ;;  %v3070_v25 = vpop.f32.mrb[69].mxu0 }
 0x232   : > { %v3183_v1 = vadd.f32 %v6413_v3, %v2925_v29  ;;  %v2923_v46 = vld [vmem:[#allocation4] sm:$0xff]  ;;  %2430 = vst.msk [vmem:[#allocation4 + $0x30] sm:$0xff] %vm1246_vm10, %v2398_v30  ;;  %v2399_v49 = vadd.f32 %v6370_v47, %v2141_v51  ;;  %v2284_v61 = vpop.f32.mrb[39].mxu1  ;;  %v6418_v37 = vpop.f32.mrb[70].mxu0  ;;  %v2147_v30 = vld [vmem:[#allocation4 + $0x68] sm:$0xff] }
 0x233   : > { %v3181_v33 = vadd.f32 %v3054_v9, %v2923_v46  ;;  %v2926_v39 = vld [vmem:[#allocation4 + $0x18] sm:$0xff]  ;;  %2428 = vst.msk [vmem:[#allocation4 + $0x20] sm:$0xff] %vm1246_vm10, %v2396_v4  ;;  %v2397_v52 = vadd.f32 %v2284_v61, %v2139_v20  ;;  %v3073_v56 = vpop.f32.mrb[71].mxu0  ;;  %v4171_v46 = vrot.slane %v6911_v40, 1  ;;  %v2152_v20 = vld [vmem:[#allocation4 + $0x90] sm:$0xff] }
 0x234   : > { %3215 = vst.msk [vmem:[#allocation4 + $0x10] sm:$0xff] %vm1246_vm10, %v3183_v1  ;;  %v3184_v7 = vadd.f32 %v6414_v19, %v2926_v39  ;;  %v2924_v53 = vld [vmem:[#allocation4 + $0x8] sm:$0xff]  ;;  %2431 = vst.msk [vmem:[#allocation4 + $0x38] sm:$0xff] %vm1246_vm10, %v2399_v49  ;;  %6668 = vmatmul.mubr.bf16.gmra.mrb[144].mxu1 %v7893_v12  ;;  %v2145_v12 = vld [vmem:[#allocation4 + $0x58] sm:$0xff]  ;;  %v4172_v49 = vrot.slane %v6912_v21, 1 }
 0x235   : > { %3213 = vst.msk [vmem:[#allocation4] sm:$0xff] %vm1246_vm10, %v3181_v33  ;;  %v3182_v24 = vadd.f32 %v3057_v27, %v2924_v53  ;;  %2429 = vst.msk [vmem:[#allocation4 + $0x28] sm:$0xff] %vm1246_vm10, %v2397_v52  ;;  %6671 = vmatprep.mubr.bf16.mxu1 %v7903_v14  ;;  %v2149_v27 = vld [vmem:[#allocation4 + $0x78] sm:$0xff]  ;;  %v2150_v33 = vld [vmem:[#allocation4 + $0x80] sm:$0xff] }
 0x236   : > { %3216 = vst.msk [vmem:[#allocation4 + $0x18] sm:$0xff] %vm1246_vm10, %v3184_v7  ;;  %v2153_v7 = vld [vmem:[#allocation4 + $0x98] sm:$0xff] }
 0x237   : > { %3214 = vst.msk [vmem:[#allocation4 + $0x8] sm:$0xff] %vm1246_vm10, %v3182_v24  ;;  %v6373_v57 = vpop.f32.mrb[40].mxu1 }
 0x238   : > { %v2402_v48 = vadd.f32 %v6373_v57, %v2144_v55  ;;  %v2297_v11 = vpop.f32.mrb[41].mxu1  ;;  %v6421_v23 = vpop.f32.mrb[72].mxu0  ;;  %v4173_v55 = vsel %vm4119_vm11, %v4171_v46, %v4172_v49  ;;  %v2159_v49 = vld [vmem:[#allocation4 + $0xc8] sm:$0xff] }
 0x239   : > { %v2929_v17 = vld [vmem:[#allocation4 + $0x30] sm:$0xff]  ;;  %v2400_v59 = vadd.f32 %v2297_v11, %v2142_v36  ;;  %v6374_v31 = vpop.f32.mrb[42].mxu1  ;;  %v3086_v60 = vpop.f32.mrb[73].mxu0  ;;  %v2151_v36 = vld [vmem:[#allocation4 + $0x88] sm:$0xff] }
 0x23a   : > { %v3187_v62 = vadd.f32 %v6417_v41, %v2929_v17  ;;  %v2927_v43 = vld [vmem:[#allocation4 + $0x20] sm:$0xff]  ;;  %2434 = vst.msk [vmem:[#allocation4 + $0x50] sm:$0xff] %vm1246_vm10, %v2402_v48  ;;  %v2403_v14 = vadd.f32 %v6374_v31, %v2145_v12  ;;  %v2300_v44 = vpop.f32.mrb[43].mxu1  ;;  %v6422_v2 = vpop.f32.mrb[74].mxu0 }
 0x23b   : > { %v3185_v3 = vadd.f32 %v3070_v25, %v2927_v43  ;;  %v2930_v5 = vld [vmem:[#allocation4 + $0x38] sm:$0xff]  ;;  %2432 = vst.msk [vmem:[#allocation4 + $0x40] sm:$0xff] %vm1246_vm10, %v2400_v59  ;;  %v2401_v38 = vadd.f32 %v2300_v44, %v2143_v0  ;;  %v3089_v6 = vpop.f32.mrb[75].mxu0 }
 0x23c   : > { %3219 = vst.msk [vmem:[#allocation4 + $0x30] sm:$0xff] %vm1246_vm10, %v3187_v62  ;;  %v3188_v54 = vadd.f32 %v6418_v37, %v2930_v5  ;;  %v2928_v9 = vld [vmem:[#allocation4 + $0x28] sm:$0xff]  ;;  %2435 = vst.msk [vmem:[#allocation4 + $0x58] sm:$0xff] %vm1246_vm10, %v2403_v14  ;;  %6672 = vmatmul.mubr.bf16.gmra.mrb[148].mxu1 %v7910_v58  ;;  %v2156_v14 = vld [vmem:[#allocation4 + $0xb0] sm:$0xff] }
 0x23d   : > { %3217 = vst.msk [vmem:[#allocation4 + $0x20] sm:$0xff] %vm1246_vm10, %v3185_v3  ;;  %v3186_v13 = vadd.f32 %v3073_v56, %v2928_v9  ;;  %2433 = vst.msk [vmem:[#allocation4 + $0x48] sm:$0xff] %vm1246_vm10, %v2401_v38  ;;  %6675 = vmatprep.mubr.bf16.mxu1 %v7920_v15 }
 0x23e   : > { %3220 = vst.msk [vmem:[#allocation4 + $0x38] sm:$0xff] %vm1246_vm10, %v3188_v54  ;;  %v2157_v54 = vld [vmem:[#allocation4 + $0xb8] sm:$0xff] }
 0x23f   : > { %3218 = vst.msk [vmem:[#allocation4 + $0x28] sm:$0xff] %vm1246_vm10, %v3186_v13  ;;  %v6377_v8 = vpop.f32.mrb[44].mxu1 }
 0x240   : > { %v2406_v16 = vadd.f32 %v6377_v8, %v2148_v10  ;;  %v2313_v19 = vpop.f32.mrb[45].mxu1  ;;  %v6425_v28 = vpop.f32.mrb[76].mxu0 }
 0x241   : > { %v2933_v26 = vld [vmem:[#allocation4 + $0x50] sm:$0xff]  ;;  %v2404_v58 = vadd.f32 %v2313_v19, %v2146_v18  ;;  %v6378_v35 = vpop.f32.mrb[46].mxu1  ;;  %v3102_v42 = vpop.f32.mrb[77].mxu0  ;;  %v2155_v18 = vld [vmem:[#allocation4 + $0xa8] sm:$0xff] }
 0x242   : > { %v3191_v50 = vadd.f32 %v6421_v23, %v2933_v26  ;;  %v2931_v34 = vld [vmem:[#allocation4 + $0x40] sm:$0xff]  ;;  %2438 = vst.msk [vmem:[#allocation4 + $0x70] sm:$0xff] %vm1246_vm10, %v2406_v16  ;;  %v2407_v15 = vadd.f32 %v6378_v35, %v2149_v27  ;;  %v2316_v32 = vpop.f32.mrb[47].mxu1  ;;  %v6426_v45 = vpop.f32.mrb[78].mxu0 }
 0x243   : > { %v3189_v41 = vadd.f32 %v3086_v60, %v2931_v34  ;;  %v2934_v29 = vld [vmem:[#allocation4 + $0x58] sm:$0xff]  ;;  %2436 = vst.msk [vmem:[#allocation4 + $0x60] sm:$0xff] %vm1246_vm10, %v2404_v58  ;;  %v2405_v4 = vadd.f32 %v2316_v32, %v2147_v30  ;;  %v3105_v51 = vpop.f32.mrb[79].mxu0  ;;  %v2158_v30 = vld [vmem:[#allocation4 + $0xc0] sm:$0xff] }
 0x244   : > { %3223 = vst.msk [vmem:[#allocation4 + $0x50] sm:$0xff] %vm1246_vm10, %v3191_v50  ;;  %v3192_v47 = vadd.f32 %v6422_v2, %v2934_v29  ;;  %v2932_v25 = vld [vmem:[#allocation4 + $0x48] sm:$0xff]  ;;  %2439 = vst.msk [vmem:[#allocation4 + $0x78] sm:$0xff] %vm1246_vm10, %v2407_v15  ;;  %6676 = vmatmul.mubr.bf16.gmra.mrb[152].mxu1 %v7926_v22  ;;  %v2154_v2 = vld [vmem:[#allocation4 + $0xa0] sm:$0xff] }
 0x245   : > { %3221 = vst.msk [vmem:[#allocation4 + $0x40] sm:$0xff] %vm1246_vm10, %v3189_v41  ;;  %v3190_v1 = vadd.f32 %v3089_v6, %v2932_v25  ;;  %2437 = vst.msk [vmem:[#allocation4 + $0x68] sm:$0xff] %vm1246_vm10, %v2405_v4  ;;  %6679 = vmatprep.mubr.bf16.mxu1 %v7938_v63  ;;  %v2160_v50 = vld [vmem:[#allocation4 + $0xd0] sm:$0xff]  ;;  %v2161_v4 = vld [vmem:[#allocation4 + $0xd8] sm:$0xff] }
 0x246   : > { %3224 = vst.msk [vmem:[#allocation4 + $0x58] sm:$0xff] %vm1246_vm10, %v3192_v47 }
 0x247   : > { %3222 = vst.msk [vmem:[#allocation4 + $0x48] sm:$0xff] %vm1246_vm10, %v3190_v1  ;;  %v6381_v61 = vpop.f32.mrb[48].mxu1 }
 0x248   : > { %v2410_v37 = vadd.f32 %v6381_v61, %v2152_v20  ;;  %v2329_v39 = vpop.f32.mrb[49].mxu1  ;;  %v6429_v52 = vpop.f32.mrb[80].mxu0 }
 0x249   : > { %v2937_v22 = vld [vmem:[#allocation4 + $0x70] sm:$0xff]  ;;  %v2408_v56 = vadd.f32 %v2329_v39, %v2150_v33  ;;  %v6382_v53 = vpop.f32.mrb[50].mxu1  ;;  %v3118_v24 = vpop.f32.mrb[81].mxu0 }
 0x24a   : > { %v3195_v63 = vadd.f32 %v6425_v28, %v2937_v22  ;;  %v2935_v57 = vld [vmem:[#allocation4 + $0x60] sm:$0xff]  ;;  %2442 = vst.msk [vmem:[#allocation4 + $0x90] sm:$0xff] %vm1246_vm10, %v2410_v37  ;;  %v2411_v48 = vadd.f32 %v6382_v53, %v2153_v7  ;;  %v2332_v11 = vpop.f32.mrb[51].mxu1  ;;  %v6430_v23 = vpop.f32.mrb[82].mxu0  ;;  %v2164_v53 = vld [vmem:[#allocation4 + $0xf0] sm:$0xff] }
 0x24b   : > { %v3193_v17 = vadd.f32 %v3102_v42, %v2935_v57  ;;  %v2938_v59 = vld [vmem:[#allocation4 + $0x78] sm:$0xff]  ;;  %2440 = vst.msk [vmem:[#allocation4 + $0x80] sm:$0xff] %vm1246_vm10, %v2408_v56  ;;  %v2409_v12 = vadd.f32 %v2332_v11, %v2151_v36  ;;  %v3121_v31 = vpop.f32.mrb[83].mxu0 }
 0x24c   : > { %3227 = vst.msk [vmem:[#allocation4 + $0x70] sm:$0xff] %vm1246_vm10, %v3195_v63  ;;  %v3196_v60 = vadd.f32 %v6426_v45, %v2938_v59  ;;  %v2936_v62 = vld [vmem:[#allocation4 + $0x68] sm:$0xff]  ;;  %2443 = vst.msk [vmem:[#allocation4 + $0x98] sm:$0xff] %vm1246_vm10, %v2411_v48  ;;  %6680 = vmatmul.mubr.bf16.gmra.mrb[156].mxu1 %v4173_v55  ;;  %v2162_v63 = vld [vmem:[#allocation4 + $0xe0] sm:$0xff] }
 0x24d   : > { %3225 = vst.msk [vmem:[#allocation4 + $0x60] sm:$0xff] %vm1246_vm10, %v3193_v17  ;;  %v3194_v43 = vadd.f32 %v3105_v51, %v2936_v62  ;;  %2441 = vst.msk [vmem:[#allocation4 + $0x88] sm:$0xff] %vm1246_vm10, %v2409_v12  ;;  %v2163_v62 = vld [vmem:[#allocation4 + $0xe8] sm:$0xff] }
 0x24e   : > { %3228 = vst.msk [vmem:[#allocation4 + $0x78] sm:$0xff] %vm1246_vm10, %v3196_v60 }
 0x24f   : > { %3226 = vst.msk [vmem:[#allocation4 + $0x68] sm:$0xff] %vm1246_vm10, %v3194_v43  ;;  %v6385_v0 = vpop.f32.mrb[52].mxu1 }
 0x250   : > { %v2414_v44 = vadd.f32 %v6385_v0, %v2156_v14  ;;  %v2345_v3 = vpop.f32.mrb[53].mxu1  ;;  %v6433_v5 = vpop.f32.mrb[84].mxu0 }
 0x251   : > { %v2941_v38 = vld [vmem:[#allocation4 + $0x90] sm:$0xff]  ;;  %v2412_v6 = vadd.f32 %v2345_v3, %v2154_v2  ;;  %v6386_v9 = vpop.f32.mrb[54].mxu1  ;;  %v3134_v13 = vpop.f32.mrb[85].mxu0 }
 0x252   : > { %v3199_v10 = vadd.f32 %v6429_v52, %v2941_v38  ;;  %v2939_v8 = vld [vmem:[#allocation4 + $0x80] sm:$0xff]  ;;  %2446 = vst.msk [vmem:[#allocation4 + $0xb0] sm:$0xff] %vm1246_vm10, %v2414_v44  ;;  %v2415_v16 = vadd.f32 %v6386_v9, %v2157_v54  ;;  %v2348_v19 = vpop.f32.mrb[55].mxu1  ;;  %v6434_v28 = vpop.f32.mrb[86].mxu0  ;;  %v3263_v54 = vld [vmem:[#allocation4 + $0x10] sm:$0xff] }
 0x253   : > { %v3197_v21 = vadd.f32 %v3118_v24, %v2939_v8  ;;  %v2942_v26 = vld [vmem:[#allocation4 + $0x98] sm:$0xff]  ;;  %2444 = vst.msk [vmem:[#allocation4 + $0xa0] sm:$0xff] %vm1246_vm10, %v2412_v6  ;;  %v2413_v58 = vadd.f32 %v2348_v19, %v2155_v18  ;;  %v3137_v27 = vpop.f32.mrb[87].mxu0 }
 0x254   : > { %3231 = vst.msk [vmem:[#allocation4 + $0x90] sm:$0xff] %vm1246_vm10, %v3199_v10  ;;  %v3200_v35 = vadd.f32 %v6430_v23, %v2942_v26  ;;  %v2940_v42 = vld [vmem:[#allocation4 + $0x88] sm:$0xff]  ;;  %2447 = vst.msk [vmem:[#allocation4 + $0xb8] sm:$0xff] %vm1246_vm10, %v2415_v16  ;;  %v2165_v23 = vld [vmem:[#allocation4 + $0xf8] sm:$0xff] }
 0x255   : > { %3229 = vst.msk [vmem:[#allocation4 + $0x80] sm:$0xff] %vm1246_vm10, %v3197_v21  ;;  %v3198_v40 = vadd.f32 %v3121_v31, %v2940_v42  ;;  %2445 = vst.msk [vmem:[#allocation4 + $0xa8] sm:$0xff] %vm1246_vm10, %v2413_v58  ;;  %v3261_v10 = vld [vmem:[#allocation4] sm:$0xff]  ;;  %v3262_v42 = vld [vmem:[#allocation4 + $0x8] sm:$0xff] }
 0x256   : > { %3232 = vst.msk [vmem:[#allocation4 + $0x98] sm:$0xff] %vm1246_vm10, %v3200_v35 }
 0x257   : > { %3230 = vst.msk [vmem:[#allocation4 + $0x88] sm:$0xff] %vm1246_vm10, %v3198_v40  ;;  %v6389_v34 = vpop.f32.mrb[56].mxu1 }
 0x258   : > { %v2418_v15 = vadd.f32 %v6389_v34, %v2160_v50  ;;  %v2361_v32 = vpop.f32.mrb[57].mxu1  ;;  %v6437_v45 = vpop.f32.mrb[88].mxu0 }
 0x259   : > { %v2945_v41 = vld [vmem:[#allocation4 + $0xb0] sm:$0xff]  ;;  %v2416_v29 = vadd.f32 %v2361_v32, %v2158_v30  ;;  %v6390_v51 = vpop.f32.mrb[58].mxu1  ;;  %v3150_v47 = vpop.f32.mrb[89].mxu0 }
 0x25a   : > { %v3203_v25 = vadd.f32 %v6433_v5, %v2945_v41  ;;  %v2943_v1 = vld [vmem:[#allocation4 + $0xa0] sm:$0xff]  ;;  %2450 = vst.msk [vmem:[#allocation4 + $0xd0] sm:$0xff] %vm1246_vm10, %v2418_v15  ;;  %v2419_v46 = vadd.f32 %v6390_v51, %v2161_v4  ;;  %v2364_v20 = vpop.f32.mrb[59].mxu1  ;;  %v6438_v61 = vpop.f32.mrb[90].mxu0  ;;  %v3267_v4 = vld [vmem:[#allocation4 + $0x30] sm:$0xff] }
 0x25b   : > { %v3201_v37 = vadd.f32 %v3134_v13, %v2943_v1  ;;  %v2946_v33 = vld [vmem:[#allocation4 + $0xb8] sm:$0xff]  ;;  %2448 = vst.msk [vmem:[#allocation4 + $0xc0] sm:$0xff] %vm1246_vm10, %v2416_v29  ;;  %v2417_v39 = vadd.f32 %v2364_v20, %v2159_v49  ;;  %v3153_v52 = vpop.f32.mrb[91].mxu0 }
 0x25c   : > { %3235 = vst.msk [vmem:[#allocation4 + $0xb0] sm:$0xff] %vm1246_vm10, %v3203_v25  ;;  %v3204_v22 = vadd.f32 %v6434_v28, %v2946_v33  ;;  %v2944_v56 = vld [vmem:[#allocation4 + $0xa8] sm:$0xff]  ;;  %2451 = vst.msk [vmem:[#allocation4 + $0xd8] sm:$0xff] %vm1246_vm10, %v2419_v46  ;;  %v3264_v28 = vld [vmem:[#allocation4 + $0x18] sm:$0xff] }
 0x25d   : > { %3233 = vst.msk [vmem:[#allocation4 + $0xa0] sm:$0xff] %vm1246_vm10, %v3201_v37  ;;  %v3202_v7 = vadd.f32 %v3137_v27, %v2944_v56  ;;  %2449 = vst.msk [vmem:[#allocation4 + $0xc8] sm:$0xff] %vm1246_vm10, %v2417_v39  ;;  %v3265_v25 = vld [vmem:[#allocation4 + $0x20] sm:$0xff]  ;;  %v3266_v56 = vld [vmem:[#allocation4 + $0x28] sm:$0xff] }
 0x25e   : > { %3236 = vst.msk [vmem:[#allocation4 + $0xb8] sm:$0xff] %vm1246_vm10, %v3204_v22 }
 0x25f   : > { %3234 = vst.msk [vmem:[#allocation4 + $0xa8] sm:$0xff] %vm1246_vm10, %v3202_v7  ;;  %v6393_v24 = vpop.f32.mrb[60].mxu1 }
 0x260   : > { %v2422_v55 = vadd.f32 %v6393_v24, %v2164_v53  ;;  %v2377_v57 = vpop.f32.mrb[61].mxu1  ;;  %v6441_v48 = vpop.f32.mrb[92].mxu0 }
 0x261   : > { %v2949_v36 = vld [vmem:[#allocation4 + $0xd0] sm:$0xff]  ;;  %v2420_v11 = vadd.f32 %v2377_v57, %v2162_v63  ;;  %v6394_v17 = vpop.f32.mrb[62].mxu1  ;;  %v3166_v59 = vpop.f32.mrb[93].mxu0 }
 0x262   : > { %v3207_v12 = vadd.f32 %v6437_v45, %v2949_v36  ;;  %v2947_v31 = vld [vmem:[#allocation4 + $0xc0] sm:$0xff]  ;;  %2454 = vst.msk [vmem:[#allocation4 + $0xf0] sm:$0xff] %vm1246_vm10, %v2422_v55  ;;  %v2423_v60 = vadd.f32 %v6394_v17, %v2165_v23  ;;  %v2380_v43 = vpop.f32.mrb[63].mxu1  ;;  %v6442_v14 = vpop.f32.mrb[94].mxu0  ;;  %v3271_v23 = vld [vmem:[#allocation4 + $0x50] sm:$0xff] }
 0x263   : > { %v3205_v0 = vadd.f32 %v3150_v47, %v2947_v31  ;;  %v2950_v44 = vld [vmem:[#allocation4 + $0xd8] sm:$0xff]  ;;  %2452 = vst.msk [vmem:[#allocation4 + $0xe0] sm:$0xff] %vm1246_vm10, %v2420_v11  ;;  %v2421_v2 = vadd.f32 %v2380_v43, %v2163_v62  ;;  %v3169_v3 = vpop.f32.mrb[95].mxu0 }
 0x264   : > { %3239 = vst.msk [vmem:[#allocation4 + $0xd0] sm:$0xff] %vm1246_vm10, %v3207_v12  ;;  %v3208_v5 = vadd.f32 %v6438_v61, %v2950_v44  ;;  %v2948_v38 = vld [vmem:[#allocation4 + $0xc8] sm:$0xff]  ;;  %2455 = vst.msk [vmem:[#allocation4 + $0xf8] sm:$0xff] %vm1246_vm10, %v2423_v60  ;;  %v3268_v61 = vld [vmem:[#allocation4 + $0x38] sm:$0xff] }
 0x265   : > { %3237 = vst.msk [vmem:[#allocation4 + $0xc0] sm:$0xff] %vm1246_vm10, %v3205_v0  ;;  %v3206_v6 = vadd.f32 %v3153_v52, %v2948_v38  ;;  %2453 = vst.msk [vmem:[#allocation4 + $0xe8] sm:$0xff] %vm1246_vm10, %v2421_v2  ;;  %v3269_v12 = vld [vmem:[#allocation4 + $0x40] sm:$0xff]  ;;  %v3270_v38 = vld [vmem:[#allocation4 + $0x48] sm:$0xff] }
 0x266   : > { %3240 = vst.msk [vmem:[#allocation4 + $0xd8] sm:$0xff] %vm1246_vm10, %v3208_v5 }
 0x267   : > { %3238 = vst.msk [vmem:[#allocation4 + $0xc8] sm:$0xff] %vm1246_vm10, %v3206_v6  ;;  %v6461_v9 = vpop.f32.mrb[64].mxu1 }
 0x268   : > { %v3521_v13 = vadd.f32 %v6461_v9, %v3263_v54  ;;  %v3392_v8 = vpop.f32.mrb[65].mxu1  ;;  %v6509_v16 = vpop.f32.mrb[96].mxu0 }
 0x269   : > { %v2953_v18 = vld [vmem:[#allocation4 + $0xf0] sm:$0xff]  ;;  %v3519_v19 = vadd.f32 %v3392_v8, %v3261_v10  ;;  %v6462_v21 = vpop.f32.mrb[66].mxu1  ;;  %v3730_v26 = vpop.f32.mrb[97].mxu0 }
 0x26a   : > { %v3211_v58 = vadd.f32 %v6441_v48, %v2953_v18  ;;  %v2951_v27 = vld [vmem:[#allocation4 + $0xe0] sm:$0xff]  ;;  %3553 = vst.msk [vmem:[#allocation4 + $0x10] sm:$0xff] %vm1246_vm10, %v3521_v13  ;;  %v3522_v35 = vadd.f32 %v6462_v21, %v3264_v28  ;;  %v3395_v40 = vpop.f32.mrb[67].mxu1  ;;  %v6510_v50 = vpop.f32.mrb[98].mxu0  ;;  %v3275_v28 = vld [vmem:[#allocation4 + $0x70] sm:$0xff] }
 0x26b   : > { %v3209_v34 = vadd.f32 %v3166_v59, %v2951_v27  ;;  %v2954_v15 = vld [vmem:[#allocation4 + $0xf8] sm:$0xff]  ;;  %3551 = vst.msk [vmem:[#allocation4] sm:$0xff] %vm1246_vm10, %v3519_v19  ;;  %v3520_v30 = vadd.f32 %v3395_v40, %v3262_v42  ;;  %v3733_v32 = vpop.f32.mrb[99].mxu0 }
 0x26c   : > { %3243 = vst.msk [vmem:[#allocation4 + $0xf0] sm:$0xff] %vm1246_vm10, %v3211_v58  ;;  %v3212_v45 = vadd.f32 %v6442_v14, %v2954_v15  ;;  %v2952_v41 = vld [vmem:[#allocation4 + $0xe8] sm:$0xff]  ;;  %3554 = vst.msk [vmem:[#allocation4 + $0x18] sm:$0xff] %vm1246_vm10, %v3522_v35  ;;  %v3272_v14 = vld [vmem:[#allocation4 + $0x58] sm:$0xff] }
 0x26d   : > { %3241 = vst.msk [vmem:[#allocation4 + $0xe0] sm:$0xff] %vm1246_vm10, %v3209_v34  ;;  %v3210_v29 = vadd.f32 %v3169_v3, %v2952_v41  ;;  %3552 = vst.msk [vmem:[#allocation4 + $0x8] sm:$0xff] %vm1246_vm10, %v3520_v30  ;;  %v3273_v58 = vld [vmem:[#allocation4 + $0x60] sm:$0xff]  ;;  %v3274_v41 = vld [vmem:[#allocation4 + $0x68] sm:$0xff] }
 0x26e   : > { %3244 = vst.msk [vmem:[#allocation4 + $0xf8] sm:$0xff] %vm1246_vm10, %v3212_v45 }
 0x26f   : > { %3242 = vst.msk [vmem:[#allocation4 + $0xe8] sm:$0xff] %vm1246_vm10, %v3210_v29  ;;  %v6465_v51 = vpop.f32.mrb[68].mxu1 }
 0x270   : > { %v3525_v47 = vadd.f32 %v6465_v51, %v3267_v4  ;;  %v3408_v1 = vpop.f32.mrb[69].mxu1  ;;  %v6513_v46 = vpop.f32.mrb[100].mxu0 }
 0x271   : > { %v3601_v49 = vld [vmem:[#allocation4 + $0x10] sm:$0xff]  ;;  %v3523_v20 = vadd.f32 %v3408_v1, %v3265_v25  ;;  %v6466_v37 = vpop.f32.mrb[70].mxu1  ;;  %v3746_v33 = vpop.f32.mrb[101].mxu0 }
 0x272   : > { %v3859_v39 = vadd.f32 %v6509_v16, %v3601_v49  ;;  %v3599_v52 = vld [vmem:[#allocation4] sm:$0xff]  ;;  %3557 = vst.msk [vmem:[#allocation4 + $0x30] sm:$0xff] %vm1246_vm10, %v3525_v47  ;;  %v3526_v22 = vadd.f32 %v6466_v37, %v3268_v61  ;;  %v3411_v7 = vpop.f32.mrb[71].mxu1  ;;  %v6514_v53 = vpop.f32.mrb[102].mxu0  ;;  %v3279_v61 = vld [vmem:[#allocation4 + $0x90] sm:$0xff] }
 0x273   : > { %v3857_v24 = vadd.f32 %v3730_v26, %v3599_v52  ;;  %v3602_v55 = vld [vmem:[#allocation4 + $0x18] sm:$0xff]  ;;  %3555 = vst.msk [vmem:[#allocation4 + $0x20] sm:$0xff] %vm1246_vm10, %v3523_v20  ;;  %v3524_v63 = vadd.f32 %v3411_v7, %v3266_v56  ;;  %v3749_v57 = vpop.f32.mrb[103].mxu0 }
 0x274   : > { %3891 = vst.msk [vmem:[#allocation4 + $0x10] sm:$0xff] %vm1246_vm10, %v3859_v39  ;;  %v3860_v48 = vadd.f32 %v6510_v50, %v3602_v55  ;;  %v3600_v36 = vld [vmem:[#allocation4 + $0x8] sm:$0xff]  ;;  %3558 = vst.msk [vmem:[#allocation4 + $0x38] sm:$0xff] %vm1246_vm10, %v3526_v22  ;;  %v3276_v50 = vld [vmem:[#allocation4 + $0x78] sm:$0xff] }
 0x275   : > { %3889 = vst.msk [vmem:[#allocation4] sm:$0xff] %vm1246_vm10, %v3857_v24  ;;  %v3858_v11 = vadd.f32 %v3733_v32, %v3600_v36  ;;  %3556 = vst.msk [vmem:[#allocation4 + $0x28] sm:$0xff] %vm1246_vm10, %v3524_v63  ;;  %v3277_v39 = vld [vmem:[#allocation4 + $0x80] sm:$0xff]  ;;  %v3278_v36 = vld [vmem:[#allocation4 + $0x88] sm:$0xff] }
 0x276   : > { %3892 = vst.msk [vmem:[#allocation4 + $0x18] sm:$0xff] %vm1246_vm10, %v3860_v48 }
 0x277   : > { %3890 = vst.msk [vmem:[#allocation4 + $0x8] sm:$0xff] %vm1246_vm10, %v3858_v11  ;;  %v6469_v17 = vpop.f32.mrb[72].mxu1 }
 0x278   : > { %v3529_v59 = vadd.f32 %v6469_v17, %v3271_v23  ;;  %v3424_v31 = vpop.f32.mrb[73].mxu1  ;;  %v6517_v60 = vpop.f32.mrb[104].mxu0 }
 0x279   : > { %v3605_v62 = vld [vmem:[#allocation4 + $0x30] sm:$0xff]  ;;  %v3527_v43 = vadd.f32 %v3424_v31, %v3269_v12  ;;  %v6470_v0 = vpop.f32.mrb[74].mxu1  ;;  %v3762_v44 = vpop.f32.mrb[105].mxu0 }
 0x27a   : > { %v3863_v2 = vadd.f32 %v6513_v46, %v3605_v62  ;;  %v3603_v3 = vld [vmem:[#allocation4 + $0x20] sm:$0xff]  ;;  %3561 = vst.msk [vmem:[#allocation4 + $0x50] sm:$0xff] %vm1246_vm10, %v3529_v59  ;;  %v3530_v5 = vadd.f32 %v6470_v0, %v3272_v14  ;;  %v3427_v6 = vpop.f32.mrb[75].mxu1  ;;  %v6518_v54 = vpop.f32.mrb[106].mxu0  ;;  %v3283_v14 = vld [vmem:[#allocation4 + $0xb0] sm:$0xff] }
 0x27b   : > { %v3861_v9 = vadd.f32 %v3746_v33, %v3603_v3  ;;  %v3606_v13 = vld [vmem:[#allocation4 + $0x38] sm:$0xff]  ;;  %3559 = vst.msk [vmem:[#allocation4 + $0x40] sm:$0xff] %vm1246_vm10, %v3527_v43  ;;  %v3528_v10 = vadd.f32 %v3427_v6, %v3270_v38  ;;  %v3765_v8 = vpop.f32.mrb[107].mxu0 }
 0x27c   : > { %3895 = vst.msk [vmem:[#allocation4 + $0x30] sm:$0xff] %vm1246_vm10, %v3863_v2  ;;  %v3864_v16 = vadd.f32 %v6514_v53, %v3606_v13  ;;  %v3604_v18 = vld [vmem:[#allocation4 + $0x28] sm:$0xff]  ;;  %3562 = vst.msk [vmem:[#allocation4 + $0x58] sm:$0xff] %vm1246_vm10, %v3530_v5  ;;  %v3280_v53 = vld [vmem:[#allocation4 + $0x98] sm:$0xff] }
 0x27d   : > { %3893 = vst.msk [vmem:[#allocation4 + $0x20] sm:$0xff] %vm1246_vm10, %v3861_v9  ;;  %v3862_v19 = vadd.f32 %v3749_v57, %v3604_v18  ;;  %3560 = vst.msk [vmem:[#allocation4 + $0x48] sm:$0xff] %vm1246_vm10, %v3528_v10  ;;  %v3281_v2 = vld [vmem:[#allocation4 + $0xa0] sm:$0xff]  ;;  %v3282_v18 = vld [vmem:[#allocation4 + $0xa8] sm:$0xff] }
 0x27e   : > { %3896 = vst.msk [vmem:[#allocation4 + $0x38] sm:$0xff] %vm1246_vm10, %v3864_v16 }
 0x27f   : > { %3894 = vst.msk [vmem:[#allocation4 + $0x28] sm:$0xff] %vm1246_vm10, %v3862_v19  ;;  %v6473_v21 = vpop.f32.mrb[76].mxu1 }
 0x280   : > { %v3533_v26 = vadd.f32 %v6473_v21, %v3275_v28  ;;  %v3440_v27 = vpop.f32.mrb[77].mxu1  ;;  %v6521_v35 = vpop.f32.mrb[108].mxu0 }
 0x281   : > { %v3609_v42 = vld [vmem:[#allocation4 + $0x50] sm:$0xff]  ;;  %v3531_v40 = vadd.f32 %v3440_v27, %v3273_v58  ;;  %v6474_v34 = vpop.f32.mrb[78].mxu1  ;;  %v3778_v15 = vpop.f32.mrb[109].mxu0 }
 0x282   : > { %v3867_v30 = vadd.f32 %v6517_v60, %v3609_v42  ;;  %v3607_v32 = vld [vmem:[#allocation4 + $0x40] sm:$0xff]  ;;  %3565 = vst.msk [vmem:[#allocation4 + $0x70] sm:$0xff] %vm1246_vm10, %v3533_v26  ;;  %v3534_v45 = vadd.f32 %v6474_v34, %v3276_v50  ;;  %v3443_v29 = vpop.f32.mrb[79].mxu1  ;;  %v6522_v4 = vpop.f32.mrb[110].mxu0  ;;  %v3287_v50 = vld [vmem:[#allocation4 + $0xd0] sm:$0xff] }
 0x283   : > { %v3865_v51 = vadd.f32 %v3762_v44, %v3607_v32  ;;  %v3610_v47 = vld [vmem:[#allocation4 + $0x58] sm:$0xff]  ;;  %3563 = vst.msk [vmem:[#allocation4 + $0x60] sm:$0xff] %vm1246_vm10, %v3531_v40  ;;  %v3532_v25 = vadd.f32 %v3443_v29, %v3274_v41  ;;  %v3781_v1 = vpop.f32.mrb[111].mxu0 }
 0x284   : > { %3899 = vst.msk [vmem:[#allocation4 + $0x50] sm:$0xff] %vm1246_vm10, %v3867_v30  ;;  %v3868_v46 = vadd.f32 %v6518_v54, %v3610_v47  ;;  %v3608_v49 = vld [vmem:[#allocation4 + $0x48] sm:$0xff]  ;;  %3566 = vst.msk [vmem:[#allocation4 + $0x78] sm:$0xff] %vm1246_vm10, %v3534_v45  ;;  %v3284_v54 = vld [vmem:[#allocation4 + $0xb8] sm:$0xff] }
 0x285   : > { %3897 = vst.msk [vmem:[#allocation4 + $0x40] sm:$0xff] %vm1246_vm10, %v3865_v51  ;;  %v3866_v20 = vadd.f32 %v3765_v8, %v3608_v49  ;;  %3564 = vst.msk [vmem:[#allocation4 + $0x68] sm:$0xff] %vm1246_vm10, %v3532_v25  ;;  %v3285_v30 = vld [vmem:[#allocation4 + $0xc0] sm:$0xff]  ;;  %v3286_v49 = vld [vmem:[#allocation4 + $0xc8] sm:$0xff] }
 0x286   : > { %3900 = vst.msk [vmem:[#allocation4 + $0x58] sm:$0xff] %vm1246_vm10, %v3868_v46 }
 0x287   : > { %3898 = vst.msk [vmem:[#allocation4 + $0x48] sm:$0xff] %vm1246_vm10, %v3866_v20  ;;  %v6477_v37 = vpop.f32.mrb[80].mxu1 }
 0x288   : > { %v3537_v33 = vadd.f32 %v6477_v37, %v3279_v61  ;;  %v3456_v52 = vpop.f32.mrb[81].mxu1  ;;  %v6525_v22 = vpop.f32.mrb[112].mxu0 }
 0x289   : > { %v3613_v56 = vld [vmem:[#allocation4 + $0x70] sm:$0xff]  ;;  %v3535_v7 = vadd.f32 %v3456_v52, %v3277_v39  ;;  %v6478_v24 = vpop.f32.mrb[82].mxu1  ;;  %v3794_v55 = vpop.f32.mrb[113].mxu0 }
 0x28a   : > { %v3871_v63 = vadd.f32 %v6521_v35, %v3613_v56  ;;  %v3611_v57 = vld [vmem:[#allocation4 + $0x60] sm:$0xff]  ;;  %3569 = vst.msk [vmem:[#allocation4 + $0x90] sm:$0xff] %vm1246_vm10, %v3537_v33  ;;  %v3538_v48 = vadd.f32 %v6478_v24, %v3280_v53  ;;  %v3459_v11 = vpop.f32.mrb[83].mxu1  ;;  %v6526_v23 = vpop.f32.mrb[114].mxu0  ;;  %v3291_v53 = vld [vmem:[#allocation4 + $0xf0] sm:$0xff] }
 0x28b   : > { %v3869_v17 = vadd.f32 %v3778_v15, %v3611_v57  ;;  %v3614_v59 = vld [vmem:[#allocation4 + $0x78] sm:$0xff]  ;;  %3567 = vst.msk [vmem:[#allocation4 + $0x80] sm:$0xff] %vm1246_vm10, %v3535_v7  ;;  %v3536_v12 = vadd.f32 %v3459_v11, %v3278_v36  ;;  %v3797_v31 = vpop.f32.mrb[115].mxu0 }
 0x28c   : > { %3903 = vst.msk [vmem:[#allocation4 + $0x70] sm:$0xff] %vm1246_vm10, %v3871_v63  ;;  %v3872_v60 = vadd.f32 %v6522_v4, %v3614_v59  ;;  %v3612_v62 = vld [vmem:[#allocation4 + $0x68] sm:$0xff]  ;;  %3570 = vst.msk [vmem:[#allocation4 + $0x98] sm:$0xff] %vm1246_vm10, %v3538_v48  ;;  %v3288_v4 = vld [vmem:[#allocation4 + $0xd8] sm:$0xff] }
 0x28d   : > { %3901 = vst.msk [vmem:[#allocation4 + $0x60] sm:$0xff] %vm1246_vm10, %v3869_v17  ;;  %v3870_v43 = vadd.f32 %v3781_v1, %v3612_v62  ;;  %3568 = vst.msk [vmem:[#allocation4 + $0x88] sm:$0xff] %vm1246_vm10, %v3536_v12  ;;  %v3289_v63 = vld [vmem:[#allocation4 + $0xe0] sm:$0xff]  ;;  %v3290_v62 = vld [vmem:[#allocation4 + $0xe8] sm:$0xff] }
 0x28e   : > { %3904 = vst.msk [vmem:[#allocation4 + $0x78] sm:$0xff] %vm1246_vm10, %v3872_v60 }
 0x28f   : > { %3902 = vst.msk [vmem:[#allocation4 + $0x68] sm:$0xff] %vm1246_vm10, %v3870_v43  ;;  %v6481_v0 = vpop.f32.mrb[84].mxu1 }
 0x290   : > { %v3541_v44 = vadd.f32 %v6481_v0, %v3283_v14  ;;  %v3472_v3 = vpop.f32.mrb[85].mxu1  ;;  %v6529_v5 = vpop.f32.mrb[116].mxu0 }
 0x291   : > { %v3617_v38 = vld [vmem:[#allocation4 + $0x90] sm:$0xff]  ;;  %v3539_v6 = vadd.f32 %v3472_v3, %v3281_v2  ;;  %v6482_v9 = vpop.f32.mrb[86].mxu1  ;;  %v3810_v13 = vpop.f32.mrb[117].mxu0 }
 0x292   : > { %v3875_v10 = vadd.f32 %v6525_v22, %v3617_v38  ;;  %v3615_v8 = vld [vmem:[#allocation4 + $0x80] sm:$0xff]  ;;  %3573 = vst.msk [vmem:[#allocation4 + $0xb0] sm:$0xff] %vm1246_vm10, %v3541_v44  ;;  %v3542_v16 = vadd.f32 %v6482_v9, %v3284_v54  ;;  %v3475_v19 = vpop.f32.mrb[87].mxu1  ;;  %v6530_v28 = vpop.f32.mrb[118].mxu0  ;;  %v4228_v54 = vld [vmem:[#allocation4 + $0x10] sm:$0xff] }
 0x293   : > { %v3873_v21 = vadd.f32 %v3794_v55, %v3615_v8  ;;  %v3618_v26 = vld [vmem:[#allocation4 + $0x98] sm:$0xff]  ;;  %3571 = vst.msk [vmem:[#allocation4 + $0xa0] sm:$0xff] %vm1246_vm10, %v3539_v6  ;;  %v3540_v58 = vadd.f32 %v3475_v19, %v3282_v18  ;;  %v3813_v27 = vpop.f32.mrb[119].mxu0 }
 0x294   : > { %3907 = vst.msk [vmem:[#allocation4 + $0x90] sm:$0xff] %vm1246_vm10, %v3875_v10  ;;  %v3876_v35 = vadd.f32 %v6526_v23, %v3618_v26  ;;  %v3616_v42 = vld [vmem:[#allocation4 + $0x88] sm:$0xff]  ;;  %3574 = vst.msk [vmem:[#allocation4 + $0xb8] sm:$0xff] %vm1246_vm10, %v3542_v16  ;;  %v3292_v23 = vld [vmem:[#allocation4 + $0xf8] sm:$0xff] }
 0x295   : > { %3905 = vst.msk [vmem:[#allocation4 + $0x80] sm:$0xff] %vm1246_vm10, %v3873_v21  ;;  %v3874_v40 = vadd.f32 %v3797_v31, %v3616_v42  ;;  %3572 = vst.msk [vmem:[#allocation4 + $0xa8] sm:$0xff] %vm1246_vm10, %v3540_v58  ;;  %v4226_v10 = vld [vmem:[#allocation4] sm:$0xff]  ;;  %v4227_v42 = vld [vmem:[#allocation4 + $0x8] sm:$0xff] }
 0x296   : > { %3908 = vst.msk [vmem:[#allocation4 + $0x98] sm:$0xff] %vm1246_vm10, %v3876_v35 }
 0x297   : > { %3906 = vst.msk [vmem:[#allocation4 + $0x88] sm:$0xff] %vm1246_vm10, %v3874_v40  ;;  %v6485_v34 = vpop.f32.mrb[88].mxu1 }
 0x298   : > { %v3545_v15 = vadd.f32 %v6485_v34, %v3287_v50  ;;  %v3488_v32 = vpop.f32.mrb[89].mxu1  ;;  %v6533_v45 = vpop.f32.mrb[120].mxu0 }
 0x299   : > { %v3621_v41 = vld [vmem:[#allocation4 + $0xb0] sm:$0xff]  ;;  %v3543_v29 = vadd.f32 %v3488_v32, %v3285_v30  ;;  %v6486_v51 = vpop.f32.mrb[90].mxu1  ;;  %v3826_v47 = vpop.f32.mrb[121].mxu0 }
 0x29a   : > { %v3879_v25 = vadd.f32 %v6529_v5, %v3621_v41  ;;  %v3619_v1 = vld [vmem:[#allocation4 + $0xa0] sm:$0xff]  ;;  %3577 = vst.msk [vmem:[#allocation4 + $0xd0] sm:$0xff] %vm1246_vm10, %v3545_v15  ;;  %v3546_v46 = vadd.f32 %v6486_v51, %v3288_v4  ;;  %v3491_v20 = vpop.f32.mrb[91].mxu1  ;;  %v6534_v61 = vpop.f32.mrb[122].mxu0  ;;  %v4232_v4 = vld [vmem:[#allocation4 + $0x30] sm:$0xff] }
 0x29b   : > { %v3877_v37 = vadd.f32 %v3810_v13, %v3619_v1  ;;  %v3622_v33 = vld [vmem:[#allocation4 + $0xb8] sm:$0xff]  ;;  %3575 = vst.msk [vmem:[#allocation4 + $0xc0] sm:$0xff] %vm1246_vm10, %v3543_v29  ;;  %v3544_v39 = vadd.f32 %v3491_v20, %v3286_v49  ;;  %v3829_v52 = vpop.f32.mrb[123].mxu0 }
 0x29c   : > { %3911 = vst.msk [vmem:[#allocation4 + $0xb0] sm:$0xff] %vm1246_vm10, %v3879_v25  ;;  %v3880_v22 = vadd.f32 %v6530_v28, %v3622_v33  ;;  %v3620_v56 = vld [vmem:[#allocation4 + $0xa8] sm:$0xff]  ;;  %3578 = vst.msk [vmem:[#allocation4 + $0xd8] sm:$0xff] %vm1246_vm10, %v3546_v46  ;;  %v4229_v28 = vld [vmem:[#allocation4 + $0x18] sm:$0xff] }
 0x29d   : > { %3909 = vst.msk [vmem:[#allocation4 + $0xa0] sm:$0xff] %vm1246_vm10, %v3877_v37  ;;  %v3878_v7 = vadd.f32 %v3813_v27, %v3620_v56  ;;  %3576 = vst.msk [vmem:[#allocation4 + $0xc8] sm:$0xff] %vm1246_vm10, %v3544_v39  ;;  %v4230_v25 = vld [vmem:[#allocation4 + $0x20] sm:$0xff]  ;;  %v4231_v56 = vld [vmem:[#allocation4 + $0x28] sm:$0xff] }
 0x29e   : > { %3912 = vst.msk [vmem:[#allocation4 + $0xb8] sm:$0xff] %vm1246_vm10, %v3880_v22 }
 0x29f   : > { %3910 = vst.msk [vmem:[#allocation4 + $0xa8] sm:$0xff] %vm1246_vm10, %v3878_v7  ;;  %v6489_v24 = vpop.f32.mrb[92].mxu1 }
 0x2a0   : > { %v3549_v55 = vadd.f32 %v6489_v24, %v3291_v53  ;;  %v3504_v57 = vpop.f32.mrb[93].mxu1  ;;  %v6537_v48 = vpop.f32.mrb[124].mxu0 }
 0x2a1   : > { %v3625_v36 = vld [vmem:[#allocation4 + $0xd0] sm:$0xff]  ;;  %v3547_v11 = vadd.f32 %v3504_v57, %v3289_v63  ;;  %v6490_v17 = vpop.f32.mrb[94].mxu1  ;;  %v3842_v59 = vpop.f32.mrb[125].mxu0 }
 0x2a2   : > { %v3883_v12 = vadd.f32 %v6533_v45, %v3625_v36  ;;  %v3623_v31 = vld [vmem:[#allocation4 + $0xc0] sm:$0xff]  ;;  %3581 = vst.msk [vmem:[#allocation4 + $0xf0] sm:$0xff] %vm1246_vm10, %v3549_v55  ;;  %v3550_v60 = vadd.f32 %v6490_v17, %v3292_v23  ;;  %v3507_v43 = vpop.f32.mrb[95].mxu1  ;;  %v6538_v14 = vpop.f32.mrb[126].mxu0  ;;  %v4236_v23 = vld [vmem:[#allocation4 + $0x50] sm:$0xff] }
 0x2a3   : > { %v3881_v0 = vadd.f32 %v3826_v47, %v3623_v31  ;;  %v3626_v44 = vld [vmem:[#allocation4 + $0xd8] sm:$0xff]  ;;  %3579 = vst.msk [vmem:[#allocation4 + $0xe0] sm:$0xff] %vm1246_vm10, %v3547_v11  ;;  %v3548_v2 = vadd.f32 %v3507_v43, %v3290_v62  ;;  %v3845_v3 = vpop.f32.mrb[127].mxu0 }
 0x2a4   : > { %3915 = vst.msk [vmem:[#allocation4 + $0xd0] sm:$0xff] %vm1246_vm10, %v3883_v12  ;;  %v3884_v5 = vadd.f32 %v6534_v61, %v3626_v44  ;;  %v3624_v38 = vld [vmem:[#allocation4 + $0xc8] sm:$0xff]  ;;  %3582 = vst.msk [vmem:[#allocation4 + $0xf8] sm:$0xff] %vm1246_vm10, %v3550_v60  ;;  %v4233_v61 = vld [vmem:[#allocation4 + $0x38] sm:$0xff] }
 0x2a5   : > { %3913 = vst.msk [vmem:[#allocation4 + $0xc0] sm:$0xff] %vm1246_vm10, %v3881_v0  ;;  %v3882_v6 = vadd.f32 %v3829_v52, %v3624_v38  ;;  %3580 = vst.msk [vmem:[#allocation4 + $0xe8] sm:$0xff] %vm1246_vm10, %v3548_v2  ;;  %v4234_v12 = vld [vmem:[#allocation4 + $0x40] sm:$0xff]  ;;  %v4235_v38 = vld [vmem:[#allocation4 + $0x48] sm:$0xff] }
 0x2a6   : > { %3916 = vst.msk [vmem:[#allocation4 + $0xd8] sm:$0xff] %vm1246_vm10, %v3884_v5 }
 0x2a7   : > { %3914 = vst.msk [vmem:[#allocation4 + $0xc8] sm:$0xff] %vm1246_vm10, %v3882_v6  ;;  %v6557_v9 = vpop.f32.mrb[96].mxu1 }
 0x2a8   : > { %v4486_v13 = vadd.f32 %v6557_v9, %v4228_v54  ;;  %v4357_v8 = vpop.f32.mrb[97].mxu1  ;;  %v6605_v16 = vpop.f32.mrb[128].mxu0 }
 0x2a9   : > { %v3629_v18 = vld [vmem:[#allocation4 + $0xf0] sm:$0xff]  ;;  %v4484_v19 = vadd.f32 %v4357_v8, %v4226_v10  ;;  %v6558_v21 = vpop.f32.mrb[98].mxu1  ;;  %v4695_v26 = vpop.f32.mrb[129].mxu0 }
 0x2aa   : > { %v3887_v58 = vadd.f32 %v6537_v48, %v3629_v18  ;;  %v3627_v27 = vld [vmem:[#allocation4 + $0xe0] sm:$0xff]  ;;  %4518 = vst.msk [vmem:[#allocation4 + $0x10] sm:$0xff] %vm1246_vm10, %v4486_v13  ;;  %v4487_v35 = vadd.f32 %v6558_v21, %v4229_v28  ;;  %v4360_v40 = vpop.f32.mrb[99].mxu1  ;;  %v6606_v50 = vpop.f32.mrb[130].mxu0  ;;  %v4240_v28 = vld [vmem:[#allocation4 + $0x70] sm:$0xff] }
 0x2ab   : > { %v3885_v34 = vadd.f32 %v3842_v59, %v3627_v27  ;;  %v3630_v15 = vld [vmem:[#allocation4 + $0xf8] sm:$0xff]  ;;  %4516 = vst.msk [vmem:[#allocation4] sm:$0xff] %vm1246_vm10, %v4484_v19  ;;  %v4485_v30 = vadd.f32 %v4360_v40, %v4227_v42  ;;  %v4698_v32 = vpop.f32.mrb[131].mxu0 }
 0x2ac   : > { %3919 = vst.msk [vmem:[#allocation4 + $0xf0] sm:$0xff] %vm1246_vm10, %v3887_v58  ;;  %v3888_v45 = vadd.f32 %v6538_v14, %v3630_v15  ;;  %v3628_v41 = vld [vmem:[#allocation4 + $0xe8] sm:$0xff]  ;;  %4519 = vst.msk [vmem:[#allocation4 + $0x18] sm:$0xff] %vm1246_vm10, %v4487_v35  ;;  %v4237_v14 = vld [vmem:[#allocation4 + $0x58] sm:$0xff] }
 0x2ad   : > { %3917 = vst.msk [vmem:[#allocation4 + $0xe0] sm:$0xff] %vm1246_vm10, %v3885_v34  ;;  %v3886_v29 = vadd.f32 %v3845_v3, %v3628_v41  ;;  %4517 = vst.msk [vmem:[#allocation4 + $0x8] sm:$0xff] %vm1246_vm10, %v4485_v30  ;;  %v4238_v58 = vld [vmem:[#allocation4 + $0x60] sm:$0xff]  ;;  %v4239_v41 = vld [vmem:[#allocation4 + $0x68] sm:$0xff] }
 0x2ae   : > { %3920 = vst.msk [vmem:[#allocation4 + $0xf8] sm:$0xff] %vm1246_vm10, %v3888_v45 }
 0x2af   : > { %3918 = vst.msk [vmem:[#allocation4 + $0xe8] sm:$0xff] %vm1246_vm10, %v3886_v29  ;;  %v6561_v51 = vpop.f32.mrb[100].mxu1 }
 0x2b0   : > { %v4490_v47 = vadd.f32 %v6561_v51, %v4232_v4  ;;  %v4373_v1 = vpop.f32.mrb[101].mxu1  ;;  %v6609_v46 = vpop.f32.mrb[132].mxu0 }
 0x2b1   : > { %v4566_v49 = vld [vmem:[#allocation4 + $0x10] sm:$0xff]  ;;  %v4488_v20 = vadd.f32 %v4373_v1, %v4230_v25  ;;  %v6562_v37 = vpop.f32.mrb[102].mxu1  ;;  %v4711_v33 = vpop.f32.mrb[133].mxu0 }
 0x2b2   : > { %v4824_v39 = vadd.f32 %v6605_v16, %v4566_v49  ;;  %v4564_v52 = vld [vmem:[#allocation4] sm:$0xff]  ;;  %4522 = vst.msk [vmem:[#allocation4 + $0x30] sm:$0xff] %vm1246_vm10, %v4490_v47  ;;  %v4491_v22 = vadd.f32 %v6562_v37, %v4233_v61  ;;  %v4376_v7 = vpop.f32.mrb[103].mxu1  ;;  %v6610_v53 = vpop.f32.mrb[134].mxu0  ;;  %v4244_v61 = vld [vmem:[#allocation4 + $0x90] sm:$0xff] }
 0x2b3   : > { %v4822_v24 = vadd.f32 %v4695_v26, %v4564_v52  ;;  %v4567_v55 = vld [vmem:[#allocation4 + $0x18] sm:$0xff]  ;;  %4520 = vst.msk [vmem:[#allocation4 + $0x20] sm:$0xff] %vm1246_vm10, %v4488_v20  ;;  %v4489_v63 = vadd.f32 %v4376_v7, %v4231_v56  ;;  %v4714_v57 = vpop.f32.mrb[135].mxu0 }
 0x2b4   : > { %4856 = vst.msk [vmem:[#allocation4 + $0x10] sm:$0xff] %vm1246_vm10, %v4824_v39  ;;  %v4825_v48 = vadd.f32 %v6606_v50, %v4567_v55  ;;  %v4565_v36 = vld [vmem:[#allocation4 + $0x8] sm:$0xff]  ;;  %4523 = vst.msk [vmem:[#allocation4 + $0x38] sm:$0xff] %vm1246_vm10, %v4491_v22  ;;  %v4241_v50 = vld [vmem:[#allocation4 + $0x78] sm:$0xff] }
 0x2b5   : > { %4854 = vst.msk [vmem:[#allocation4] sm:$0xff] %vm1246_vm10, %v4822_v24  ;;  %v4823_v11 = vadd.f32 %v4698_v32, %v4565_v36  ;;  %4521 = vst.msk [vmem:[#allocation4 + $0x28] sm:$0xff] %vm1246_vm10, %v4489_v63  ;;  %v4242_v39 = vld [vmem:[#allocation4 + $0x80] sm:$0xff]  ;;  %v4243_v36 = vld [vmem:[#allocation4 + $0x88] sm:$0xff] }
 0x2b6   : > { %4857 = vst.msk [vmem:[#allocation4 + $0x18] sm:$0xff] %vm1246_vm10, %v4825_v48 }
 0x2b7   : > { %4855 = vst.msk [vmem:[#allocation4 + $0x8] sm:$0xff] %vm1246_vm10, %v4823_v11  ;;  %v6565_v17 = vpop.f32.mrb[104].mxu1 }
 0x2b8   : > { %v4494_v59 = vadd.f32 %v6565_v17, %v4236_v23  ;;  %v4389_v31 = vpop.f32.mrb[105].mxu1  ;;  %v6613_v60 = vpop.f32.mrb[136].mxu0 }
 0x2b9   : > { %v4570_v62 = vld [vmem:[#allocation4 + $0x30] sm:$0xff]  ;;  %v4492_v43 = vadd.f32 %v4389_v31, %v4234_v12  ;;  %v6566_v0 = vpop.f32.mrb[106].mxu1  ;;  %v4727_v44 = vpop.f32.mrb[137].mxu0 }
 0x2ba   : > { %v4828_v2 = vadd.f32 %v6609_v46, %v4570_v62  ;;  %v4568_v3 = vld [vmem:[#allocation4 + $0x20] sm:$0xff]  ;;  %4526 = vst.msk [vmem:[#allocation4 + $0x50] sm:$0xff] %vm1246_vm10, %v4494_v59  ;;  %v4495_v5 = vadd.f32 %v6566_v0, %v4237_v14  ;;  %v4392_v6 = vpop.f32.mrb[107].mxu1  ;;  %v6614_v54 = vpop.f32.mrb[138].mxu0  ;;  %v4248_v14 = vld [vmem:[#allocation4 + $0xb0] sm:$0xff] }
 0x2bb   : > { %v4826_v9 = vadd.f32 %v4711_v33, %v4568_v3  ;;  %v4571_v13 = vld [vmem:[#allocation4 + $0x38] sm:$0xff]  ;;  %4524 = vst.msk [vmem:[#allocation4 + $0x40] sm:$0xff] %vm1246_vm10, %v4492_v43  ;;  %v4493_v10 = vadd.f32 %v4392_v6, %v4235_v38  ;;  %v4730_v8 = vpop.f32.mrb[139].mxu0 }
 0x2bc   : > { %4860 = vst.msk [vmem:[#allocation4 + $0x30] sm:$0xff] %vm1246_vm10, %v4828_v2  ;;  %v4829_v16 = vadd.f32 %v6610_v53, %v4571_v13  ;;  %v4569_v18 = vld [vmem:[#allocation4 + $0x28] sm:$0xff]  ;;  %4527 = vst.msk [vmem:[#allocation4 + $0x58] sm:$0xff] %vm1246_vm10, %v4495_v5  ;;  %v4245_v53 = vld [vmem:[#allocation4 + $0x98] sm:$0xff] }
 0x2bd   : > { %4858 = vst.msk [vmem:[#allocation4 + $0x20] sm:$0xff] %vm1246_vm10, %v4826_v9  ;;  %v4827_v19 = vadd.f32 %v4714_v57, %v4569_v18  ;;  %4525 = vst.msk [vmem:[#allocation4 + $0x48] sm:$0xff] %vm1246_vm10, %v4493_v10  ;;  %v4246_v2 = vld [vmem:[#allocation4 + $0xa0] sm:$0xff]  ;;  %v4247_v18 = vld [vmem:[#allocation4 + $0xa8] sm:$0xff] }
 0x2be   : > { %4861 = vst.msk [vmem:[#allocation4 + $0x38] sm:$0xff] %vm1246_vm10, %v4829_v16 }
 0x2bf   : > { %4859 = vst.msk [vmem:[#allocation4 + $0x28] sm:$0xff] %vm1246_vm10, %v4827_v19  ;;  %v6569_v21 = vpop.f32.mrb[108].mxu1 }
 0x2c0   : > { %v4498_v26 = vadd.f32 %v6569_v21, %v4240_v28  ;;  %v4405_v27 = vpop.f32.mrb[109].mxu1  ;;  %v6617_v35 = vpop.f32.mrb[140].mxu0 }
 0x2c1   : > { %v4574_v42 = vld [vmem:[#allocation4 + $0x50] sm:$0xff]  ;;  %v4496_v40 = vadd.f32 %v4405_v27, %v4238_v58  ;;  %v6570_v34 = vpop.f32.mrb[110].mxu1  ;;  %v4743_v15 = vpop.f32.mrb[141].mxu0 }
 0x2c2   : > { %v4832_v30 = vadd.f32 %v6613_v60, %v4574_v42  ;;  %v4572_v32 = vld [vmem:[#allocation4 + $0x40] sm:$0xff]  ;;  %4530 = vst.msk [vmem:[#allocation4 + $0x70] sm:$0xff] %vm1246_vm10, %v4498_v26  ;;  %v4499_v45 = vadd.f32 %v6570_v34, %v4241_v50  ;;  %v4408_v29 = vpop.f32.mrb[111].mxu1  ;;  %v6618_v4 = vpop.f32.mrb[142].mxu0  ;;  %v4252_v34 = vld [vmem:[#allocation4 + $0xd0] sm:$0xff] }
 0x2c3   : > { %v4830_v51 = vadd.f32 %v4727_v44, %v4572_v32  ;;  %v4575_v47 = vld [vmem:[#allocation4 + $0x58] sm:$0xff]  ;;  %4528 = vst.msk [vmem:[#allocation4 + $0x60] sm:$0xff] %vm1246_vm10, %v4496_v40  ;;  %v4497_v25 = vadd.f32 %v4408_v29, %v4239_v41  ;;  %v4746_v1 = vpop.f32.mrb[143].mxu0  ;;  %v8156_v40 = vld [vmem:[%s8326_s5] sm:$0xf]  ;;  %v4250_v32 = vld [vmem:[#allocation4 + $0xc0] sm:$0xff] }
 0x2c4   : > { %4864 = vst.msk [vmem:[#allocation4 + $0x50] sm:$0xff] %vm1246_vm10, %v4832_v30  ;;  %v4833_v46 = vadd.f32 %v6614_v54, %v4575_v47  ;;  %v4573_v49 = vld [vmem:[#allocation4 + $0x48] sm:$0xff]  ;;  %4531 = vst.msk [vmem:[#allocation4 + $0x78] sm:$0xff] %vm1246_vm10, %v4499_v45  ;;  %v4249_v54 = vld [vmem:[#allocation4 + $0xb8] sm:$0xff]  ;;  %6213 = vmatprep.mubr.msk.bf16.mxu0 %vm1246_vm10, %v8156_v40 }
 0x2c5   : > { %4862 = vst.msk [vmem:[#allocation4 + $0x40] sm:$0xff] %vm1246_vm10, %v4830_v51  ;;  %v4831_v20 = vadd.f32 %v4730_v8, %v4573_v49  ;;  %4529 = vst.msk [vmem:[#allocation4 + $0x68] sm:$0xff] %vm1246_vm10, %v4497_v25  ;;  %v4253_v51 = vld [vmem:[#allocation4 + $0xd8] sm:$0xff] }
 0x2c6   : > { %4865 = vst.msk [vmem:[#allocation4 + $0x58] sm:$0xff] %vm1246_vm10, %v4833_v46 }
 0x2c7   : > { %4863 = vst.msk [vmem:[#allocation4 + $0x48] sm:$0xff] %vm1246_vm10, %v4831_v20  ;;  %v6573_v37 = vpop.f32.mrb[112].mxu1  ;;  %v4251_v20 = vld [vmem:[#allocation4 + $0xc8] sm:$0xff] }
 0x2c8   : > { %v4502_v33 = vadd.f32 %v6573_v37, %v4244_v61  ;;  %v4421_v52 = vpop.f32.mrb[113].mxu1  ;;  %v6621_v22 = vpop.f32.mrb[144].mxu0 }
 0x2c9   : > { %v4578_v56 = vld [vmem:[#allocation4 + $0x70] sm:$0xff]  ;;  %v4500_v7 = vadd.f32 %v4421_v52, %v4242_v39  ;;  %v6574_v24 = vpop.f32.mrb[114].mxu1  ;;  %v4759_v55 = vpop.f32.mrb[145].mxu0 }
 0x2ca   : > { %v4836_v63 = vadd.f32 %v6617_v35, %v4578_v56  ;;  %v4576_v57 = vld [vmem:[#allocation4 + $0x60] sm:$0xff]  ;;  %4534 = vst.msk [vmem:[#allocation4 + $0x90] sm:$0xff] %vm1246_vm10, %v4502_v33  ;;  %v4503_v48 = vadd.f32 %v6574_v24, %v4245_v53  ;;  %v4424_v11 = vpop.f32.mrb[115].mxu1  ;;  %v6622_v23 = vpop.f32.mrb[146].mxu0  ;;  %v5344_v56 = vld [vmem:[%s8327_s6] sm:$0xff] }
 0x2cb   : > { %v4834_v17 = vadd.f32 %v4743_v15, %v4576_v57  ;;  %v4579_v59 = vld [vmem:[#allocation4 + $0x78] sm:$0xff]  ;;  %4532 = vst.msk [vmem:[#allocation4 + $0x80] sm:$0xff] %vm1246_vm10, %v4500_v7  ;;  %v4501_v12 = vadd.f32 %v4424_v11, %v4243_v36  ;;  %v4762_v31 = vpop.f32.mrb[147].mxu0  ;;  %5347 = vperm.xlu0 %6732, %v5344_v56  }
 0x2cc   : > { %4868 = vst.msk [vmem:[#allocation4 + $0x70] sm:$0xff] %vm1246_vm10, %v4836_v63  ;;  %v4837_v60 = vadd.f32 %v6618_v4, %v4579_v59  ;;  %v4577_v62 = vld [vmem:[#allocation4 + $0x68] sm:$0xff]  ;;  %4535 = vst.msk [vmem:[#allocation4 + $0x98] sm:$0xff] %vm1246_vm10, %v4503_v48  ;;  %v4254_v48 = vld [vmem:[#allocation4 + $0xe0] sm:$0xff] }
 0x2cd   : > { %4866 = vst.msk [vmem:[#allocation4 + $0x60] sm:$0xff] %vm1246_vm10, %v4834_v17  ;;  %v4835_v43 = vadd.f32 %v4746_v1, %v4577_v62  ;;  %4533 = vst.msk [vmem:[#allocation4 + $0x88] sm:$0xff] %vm1246_vm10, %v4501_v12  ;;  %v4257_v59 = vld [vmem:[#allocation4 + $0xf8] sm:$0xff]  ;;  %v4910_v56 = vld [vmem:[#allocation4 + $0x40] sm:$0xff] }
 0x2ce   : > { %4869 = vst.msk [vmem:[#allocation4 + $0x78] sm:$0xff] %vm1246_vm10, %v4837_v60 }
 0x2cf   : > { %4867 = vst.msk [vmem:[#allocation4 + $0x68] sm:$0xff] %vm1246_vm10, %v4835_v43  ;;  %v6577_v0 = vpop.f32.mrb[116].mxu1 }
 0x2d0   : > { %v4506_v44 = vadd.f32 %v6577_v0, %v4248_v14  ;;  %v4437_v3 = vpop.f32.mrb[117].mxu1  ;;  %v6625_v5 = vpop.f32.mrb[148].mxu0  ;;  %v4255_v14 = vld [vmem:[#allocation4 + $0xe8] sm:$0xff] }
 0x2d1   : > { %v4582_v38 = vld [vmem:[#allocation4 + $0x90] sm:$0xff]  ;;  %v4504_v6 = vadd.f32 %v4437_v3, %v4246_v2  ;;  %v6578_v9 = vpop.f32.mrb[118].mxu1  ;;  %v4775_v13 = vpop.f32.mrb[149].mxu0 }
 0x2d2   : > { %v4840_v10 = vadd.f32 %v6621_v22, %v4582_v38  ;;  %v4580_v8 = vld [vmem:[#allocation4 + $0x80] sm:$0xff]  ;;  %4538 = vst.msk [vmem:[#allocation4 + $0xb0] sm:$0xff] %vm1246_vm10, %v4506_v44  ;;  %v4507_v16 = vadd.f32 %v6578_v9, %v4249_v54  ;;  %v4440_v19 = vpop.f32.mrb[119].mxu1  ;;  %v6626_v28 = vpop.f32.mrb[150].mxu0 }
 0x2d3   : > { %v4838_v21 = vadd.f32 %v4759_v55, %v4580_v8  ;;  %v4583_v26 = vld [vmem:[#allocation4 + $0x98] sm:$0xff]  ;;  %4536 = vst.msk [vmem:[#allocation4 + $0xa0] sm:$0xff] %vm1246_vm10, %v4504_v6  ;;  %v4505_v58 = vadd.f32 %v4440_v19, %v4247_v18  ;;  %v4778_v27 = vpop.f32.mrb[151].mxu0  ;;  %v4256_v55 = vld [vmem:[#allocation4 + $0xf0] sm:$0xff] }
 0x2d4   : > { %4872 = vst.msk [vmem:[#allocation4 + $0x90] sm:$0xff] %vm1246_vm10, %v4840_v10  ;;  %v4841_v35 = vadd.f32 %v6622_v23, %v4583_v26  ;;  %v4581_v42 = vld [vmem:[#allocation4 + $0x88] sm:$0xff]  ;;  %4539 = vst.msk [vmem:[#allocation4 + $0xb8] sm:$0xff] %vm1246_vm10, %v4507_v16  ;;  %v4902_v16 = vld [vmem:[#allocation4] sm:$0xff] }
 0x2d5   : > { %4870 = vst.msk [vmem:[#allocation4 + $0x80] sm:$0xff] %vm1246_vm10, %v4838_v21  ;;  %v4839_v50 = vadd.f32 %v4762_v31, %v4581_v42  ;;  %4537 = vst.msk [vmem:[#allocation4 + $0xa8] sm:$0xff] %vm1246_vm10, %v4505_v58  ;;  %v4905_v21 = vld [vmem:[#allocation4 + $0x18] sm:$0xff]  ;;  %v4903_v42 = vld [vmem:[#allocation4 + $0x8] sm:$0xff] }
 0x2d6   : > { %4873 = vst.msk [vmem:[#allocation4 + $0x98] sm:$0xff] %vm1246_vm10, %v4841_v35 }
 0x2d7   : > { %4871 = vst.msk [vmem:[#allocation4 + $0x88] sm:$0xff] %vm1246_vm10, %v4839_v50  ;;  %v6581_v15 = vpop.f32.mrb[120].mxu1 }
 0x2d8   : > { %v4510_v30 = vadd.f32 %v6581_v15, %v4252_v34  ;;  %v4453_v45 = vpop.f32.mrb[121].mxu1  ;;  %v6629_v41 = vpop.f32.mrb[152].mxu0 }
 0x2d9   : > { %v4586_v29 = vld [vmem:[#allocation4 + $0xb0] sm:$0xff]  ;;  %v4508_v4 = vadd.f32 %v4453_v45, %v4250_v32  ;;  %v6582_v47 = vpop.f32.mrb[122].mxu1  ;;  %v4791_v25 = vpop.f32.mrb[153].mxu0 }
 0x2da   : > { %v4844_v1 = vadd.f32 %v6625_v5, %v4586_v29  ;;  %v4584_v46 = vld [vmem:[#allocation4 + $0xa0] sm:$0xff]  ;;  %4542 = vst.msk [vmem:[#allocation4 + $0xd0] sm:$0xff] %vm1246_vm10, %v4510_v30  ;;  %v4511_v49 = vadd.f32 %v6582_v47, %v4253_v51  ;;  %v4456_v61 = vpop.f32.mrb[123].mxu1  ;;  %v6630_v37 = vpop.f32.mrb[154].mxu0  ;;  %v4908_v29 = vld [vmem:[#allocation4 + $0x30] sm:$0xff] }
 0x2db   : > { %v4842_v33 = vadd.f32 %v4775_v13, %v4584_v46  ;;  %v4587_v39 = vld [vmem:[#allocation4 + $0xb8] sm:$0xff]  ;;  %4540 = vst.msk [vmem:[#allocation4 + $0xc0] sm:$0xff] %vm1246_vm10, %v4508_v4  ;;  %v4509_v52 = vadd.f32 %v4456_v61, %v4251_v20  ;;  %v4794_v22 = vpop.f32.mrb[155].mxu0  ;;  %v4904_v13 = vld [vmem:[#allocation4 + $0x10] sm:$0xff]  ;;  %v4906_v47 = vld [vmem:[#allocation4 + $0x20] sm:$0xff] }
 0x2dc   : > { %4876 = vst.msk [vmem:[#allocation4 + $0xb0] sm:$0xff] %vm1246_vm10, %v4844_v1  ;;  %v4845_v7 = vadd.f32 %v6626_v28, %v4587_v39  ;;  %v4585_v53 = vld [vmem:[#allocation4 + $0xa8] sm:$0xff]  ;;  %4543 = vst.msk [vmem:[#allocation4 + $0xd8] sm:$0xff] %vm1246_vm10, %v4511_v49  ;;  %v4909_v46 = vld [vmem:[#allocation4 + $0x38] sm:$0xff] }
 0x2dd   : > { %4874 = vst.msk [vmem:[#allocation4 + $0xa0] sm:$0xff] %vm1246_vm10, %v4842_v33  ;;  %v4843_v24 = vadd.f32 %v4778_v27, %v4585_v53  ;;  %4541 = vst.msk [vmem:[#allocation4 + $0xc8] sm:$0xff] %vm1246_vm10, %v4509_v52  ;;  %v4907_v61 = vld [vmem:[#allocation4 + $0x28] sm:$0xff]  ;;  %v4912_v39 = vld [vmem:[#allocation4 + $0x50] sm:$0xff] }
 0x2de   : > { %4877 = vst.msk [vmem:[#allocation4 + $0xb8] sm:$0xff] %vm1246_vm10, %v4845_v7 }
 0x2df   : > { %4875 = vst.msk [vmem:[#allocation4 + $0xa8] sm:$0xff] %vm1246_vm10, %v4843_v24  ;;  %v6585_v63 = vpop.f32.mrb[124].mxu1  ;;  %v4913_v24 = vld [vmem:[#allocation4 + $0x58] sm:$0xff] }
 0x2e0   : > { %v4514_v57 = vadd.f32 %v6585_v63, %v4256_v55  ;;  %v4469_v36 = vpop.f32.mrb[125].mxu1  ;;  %v6633_v11 = vpop.f32.mrb[156].mxu0 }
 0x2e1   : > { %v4590_v23 = vld [vmem:[#allocation4 + $0xd0] sm:$0xff]  ;;  %v4512_v17 = vadd.f32 %v4469_v36, %v4254_v48  ;;  %v6586_v12 = vpop.f32.mrb[126].mxu1  ;;  %v4807_v31 = vpop.f32.mrb[157].mxu0 }
 0x2e2   : > { %v4848_v60 = vadd.f32 %v6629_v41, %v4590_v23  ;;  %v4588_v62 = vld [vmem:[#allocation4 + $0xc0] sm:$0xff]  ;;  %4546 = vst.msk [vmem:[#allocation4 + $0xf0] sm:$0xff] %vm1246_vm10, %v4514_v57  ;;  %v4515_v43 = vadd.f32 %v6586_v12, %v4257_v59  ;;  %v4472_v0 = vpop.f32.mrb[127].mxu1  ;;  %v6634_v44 = vpop.f32.mrb[158].mxu0  ;;  %v4911_v57 = vld [vmem:[#allocation4 + $0x48] sm:$0xff] }
 0x2e3   : > { %v4846_v2 = vadd.f32 %v4791_v25, %v4588_v62  ;;  %v4591_v3 = vld [vmem:[#allocation4 + $0xd8] sm:$0xff]  ;;  %4544 = vst.msk [vmem:[#allocation4 + $0xe0] sm:$0xff] %vm1246_vm10, %v4512_v17  ;;  %v4513_v5 = vadd.f32 %v4472_v0, %v4255_v14  ;;  %v4810_v38 = vpop.f32.mrb[159].mxu0  ;;  %v4914_v59 = vld [vmem:[#allocation4 + $0x60] sm:$0xff]  ;;  %v4915_v14 = vld [vmem:[#allocation4 + $0x68] sm:$0xff] }
 0x2e4   : > { %4880 = vst.msk [vmem:[#allocation4 + $0xd0] sm:$0xff] %vm1246_vm10, %v4848_v60  ;;  %v4849_v6 = vadd.f32 %v6630_v37, %v4591_v3  ;;  %v4589_v54 = vld [vmem:[#allocation4 + $0xc8] sm:$0xff]  ;;  %4547 = vst.msk [vmem:[#allocation4 + $0xf8] sm:$0xff] %vm1246_vm10, %v4515_v43  ;;  %v4917_v60 = vld [vmem:[#allocation4 + $0x78] sm:$0xff] }
 0x2e5   : > { %4878 = vst.msk [vmem:[#allocation4 + $0xc0] sm:$0xff] %vm1246_vm10, %v4846_v2  ;;  %v4847_v9 = vadd.f32 %v4794_v22, %v4589_v54  ;;  %4545 = vst.msk [vmem:[#allocation4 + $0xe8] sm:$0xff] %vm1246_vm10, %v4513_v5  ;;  %v4920_v2 = vld [vmem:[#allocation4 + $0x90] sm:$0xff] }
 0x2e6   : > { %4881 = vst.msk [vmem:[#allocation4 + $0xd8] sm:$0xff] %vm1246_vm10, %v4849_v6 }
 0x2e7   : > { %4879 = vst.msk [vmem:[#allocation4 + $0xc8] sm:$0xff] %vm1246_vm10, %v4847_v9  ;;  %v6653_v10 = vpop.f32.mrb[128].mxu1  ;;  %v4921_v9 = vld [vmem:[#allocation4 + $0x98] sm:$0xff] }
 0x2e8   : > { %v5162_v8 = vadd.f32 %v6653_v10, %v4904_v13  ;;  %v5033_v18 = vpop.f32.mrb[129].mxu1 }
 0x2e9   : > { %v4594_v19 = vld [vmem:[#allocation4 + $0xf0] sm:$0xff]  ;;  %v5160_v28 = vadd.f32 %v5033_v18, %v4902_v16  ;;  %v6654_v26 = vpop.f32.mrb[130].mxu1 }
 0x2ea   : > { %v4852_v58 = vadd.f32 %v6633_v11, %v4594_v19  ;;  %v4592_v27 = vld [vmem:[#allocation4 + $0xe0] sm:$0xff]  ;;  %5194 = vst.msk [vmem:[#allocation4 + $0x10] sm:$0xff] %vm1246_vm10, %v5162_v8  ;;  %v5163_v35 = vadd.f32 %v6654_v26, %v4905_v21  ;;  %v5036_v50 = vpop.f32.mrb[131].mxu1  ;;  %v4916_v11 = vld [vmem:[#allocation4 + $0x70] sm:$0xff]  ;;  %v4919_v8 = vld [vmem:[#allocation4 + $0x88] sm:$0xff] }
 0x2eb   : > { %v4850_v34 = vadd.f32 %v4807_v31, %v4592_v27  ;;  %v4595_v15 = vld [vmem:[#allocation4 + $0xf8] sm:$0xff]  ;;  %5192 = vst.msk [vmem:[#allocation4] sm:$0xff] %vm1246_vm10, %v5160_v28  ;;  %v5161_v30 = vadd.f32 %v5036_v50, %v4903_v42  ;;  %v8210_v28 = vld [vmem:[%s8325_s4] ss:$0 sm:$0xff]  ;;  %v4924_v26 = vld [vmem:[#allocation4 + $0xb0] sm:$0xff] }
 0x2ec   : > { %4884 = vst.msk [vmem:[#allocation4 + $0xf0] sm:$0xff] %vm1246_vm10, %v4852_v58  ;;  %v4853_v32 = vadd.f32 %v6634_v44, %v4595_v15  ;;  %v4593_v45 = vld [vmem:[#allocation4 + $0xe8] sm:$0xff]  ;;  %5195 = vst.msk [vmem:[#allocation4 + $0x18] sm:$0xff] %vm1246_vm10, %v5163_v35  ;;  %v4922_v42 = vld [vmem:[#allocation4 + $0xa0] sm:$0xff] }
 0x2ed   : > { %4882 = vst.msk [vmem:[#allocation4 + $0xe0] sm:$0xff] %vm1246_vm10, %v4850_v34  ;;  %v4851_v41 = vadd.f32 %v4810_v38, %v4593_v45  ;;  %5193 = vst.msk [vmem:[#allocation4 + $0x8] sm:$0xff] %vm1246_vm10, %v5161_v30  ;;  %v4918_v38 = vld [vmem:[#allocation4 + $0x80] sm:$0xff]  ;;  %v4925_v15 = vld [vmem:[#allocation4 + $0xb8] sm:$0xff] }
 0x2ee   : > { %4885 = vst.msk [vmem:[#allocation4 + $0xf8] sm:$0xff] %vm1246_vm10, %v4853_v32 }
 0x2ef   : > { %4883 = vst.msk [vmem:[#allocation4 + $0xe8] sm:$0xff] %vm1246_vm10, %v4851_v41  ;;  %v6657_v4 = vpop.f32.mrb[132].mxu1  ;;  %v4923_v41 = vld [vmem:[#allocation4 + $0xa8] sm:$0xff] }
 0x2f0   : > { %v5166_v51 = vadd.f32 %v6657_v4, %v4908_v29  ;;  %v5049_v25 = vpop.f32.mrb[133].mxu1 }
 0x2f1   : > { %v5164_v1 = vadd.f32 %v5049_v25, %v4906_v47  ;;  %v6658_v49 = vpop.f32.mrb[134].mxu1 }
 0x2f2   : > { %5198 = vst.msk [vmem:[#allocation4 + $0x30] sm:$0xff] %vm1246_vm10, %v5166_v51  ;;  %v5167_v20 = vadd.f32 %v6658_v49, %v4909_v46  ;;  %v5052_v37 = vpop.f32.mrb[135].mxu1  ;;  %v5224_v21 = vld [vmem:[#allocation4] sm:$0xff] }
 0x2f3   : > { %5196 = vst.msk [vmem:[#allocation4 + $0x20] sm:$0xff] %vm1246_vm10, %v5164_v1  ;;  %v5165_v33 = vadd.f32 %v5052_v37, %v4907_v61  ;;  %v5263_v32 = vadd.f32 %v8210_v28, %v5224_v21  ;;  %v5227_v49 = vld [vmem:[#allocation4 + $0x18] sm:$0xff] }
 0x2f4   : > { %5199 = vst.msk [vmem:[#allocation4 + $0x38] sm:$0xff] %vm1246_vm10, %v5167_v20  ;;  %v5225_v19 = vld [vmem:[#allocation4 + $0x8] sm:$0xff] }
 0x2f5   : > { %5197 = vst.msk [vmem:[#allocation4 + $0x28] sm:$0xff] %vm1246_vm10, %v5165_v33  ;;  %v5264_v27 = vadd.f32 %v8210_v28, %v5225_v19  ;;  %v5295_v33 = vmax.f32 %v5263_v32, 0.0 }
 0x2f6   : > { %v4931_v32 = vld [vmem:[#allocation4 + $0xe8] sm:$0xff] }
 0x2f7   : > { %v6661_v52 = vpop.f32.mrb[136].mxu1  ;;  %v5296_v1 = vmax.f32 %v5264_v27, 0.0 }
 0x2f8   : > { %v5170_v22 = vadd.f32 %v6661_v52, %v4912_v39  ;;  %v5065_v7 = vpop.f32.mrb[137].mxu1  ;;  %v5226_v52 = vld [vmem:[#allocation4 + $0x10] sm:$0xff] }
 0x2f9   : > { %v5168_v53 = vadd.f32 %v5065_v7, %v4910_v56  ;;  %v6662_v55 = vpop.f32.mrb[138].mxu1  ;;  %v4928_v56 = vld [vmem:[#allocation4 + $0xd0] sm:$0xff] }
 0x2fa   : > { %5202 = vst.msk [vmem:[#allocation4 + $0x50] sm:$0xff] %vm1246_vm10, %v5170_v22  ;;  %v5171_v63 = vadd.f32 %v6662_v55, %v4913_v24  ;;  %v5068_v48 = vpop.f32.mrb[139].mxu1  ;;  %v5266_v22 = vadd.f32 %v8210_v28, %v5227_v49  ;;  %v5327_v55 = vpack.c.bf16 %v5296_v1, %v5295_v33 }
 0x2fb   : > { %5200 = vst.msk [vmem:[#allocation4 + $0x40] sm:$0xff] %vm1246_vm10, %v5168_v53  ;;  %v5169_v36 = vadd.f32 %v5068_v48, %v4911_v57  ;;  %v4926_v48 = vld [vmem:[#allocation4 + $0xc0] sm:$0xff]  ;;  %v5231_v1 = vld [vmem:[#allocation4 + $0x38] sm:$0xff] }
 0x2fc   : > { %5203 = vst.msk [vmem:[#allocation4 + $0x58] sm:$0xff] %vm1246_vm10, %v5171_v63  ;;  %v5270_v33 = vadd.f32 %v8210_v28, %v5231_v1 }
 0x2fd   : > { %5201 = vst.msk [vmem:[#allocation4 + $0x48] sm:$0xff] %vm1246_vm10, %v5169_v36 }
 0x2ff   : > { %v6665_v23 = vpop.f32.mrb[140].mxu1 }
 0x300   : > { %v5174_v17 = vadd.f32 %v6665_v23, %v4916_v11  ;;  %v5081_v12 = vpop.f32.mrb[141].mxu1  ;;  %v5265_v11 = vadd.f32 %v8210_v28, %v5226_v52 }
 0x301   : > { %v5172_v31 = vadd.f32 %v5081_v12, %v4914_v59  ;;  %v6666_v62 = vpop.f32.mrb[142].mxu1 }
 0x302   : > { %5206 = vst.msk [vmem:[#allocation4 + $0x70] sm:$0xff] %vm1246_vm10, %v5174_v17  ;;  %v5175_v43 = vadd.f32 %v6666_v62, %v4917_v60  ;;  %v5084_v0 = vpop.f32.mrb[143].mxu1  ;;  %v4929_v17 = vld [vmem:[#allocation4 + $0xd8] sm:$0xff]  ;;  %v4927_v62 = vld [vmem:[#allocation4 + $0xc8] sm:$0xff] }
 0x303   : > { %5204 = vst.msk [vmem:[#allocation4 + $0x60] sm:$0xff] %vm1246_vm10, %v5172_v31  ;;  %v5173_v44 = vadd.f32 %v5084_v0, %v4915_v14  ;;  %v5298_v14 = vmax.f32 %v5266_v22, 0.0 }
 0x304   : > { %5207 = vst.msk [vmem:[#allocation4 + $0x78] sm:$0xff] %vm1246_vm10, %v5175_v43 }
 0x305   : > { %5205 = vst.msk [vmem:[#allocation4 + $0x68] sm:$0xff] %vm1246_vm10, %v5173_v44 }
 0x307   : > { %v6669_v3 = vpop.f32.mrb[144].mxu1 }
 0x308   : > { %v5178_v5 = vadd.f32 %v6669_v3, %v4920_v2  ;;  %v5097_v6 = vpop.f32.mrb[145].mxu1  ;;  %v5354_v2 = vsel %vm1246_vm10, %v5327_v55, 0 }
 0x309   : > { %v5176_v54 = vadd.f32 %v5097_v6, %v4918_v38  ;;  %v6670_v13 = vpop.f32.mrb[146].mxu1  ;;  %v5229_v6 = vld [vmem:[#allocation4 + $0x28] sm:$0xff] }
 0x30a   : > { %5210 = vst.msk [vmem:[#allocation4 + $0x90] sm:$0xff] %vm1246_vm10, %v5178_v5  ;;  %v5179_v10 = vadd.f32 %v6670_v13, %v4921_v9  ;;  %v5100_v16 = vpop.f32.mrb[147].mxu1  ;;  %v5297_v5 = vmax.f32 %v5265_v11, 0.0  ;;  %v5268_v19 = vadd.f32 %v8210_v28, %v5229_v6 }
 0x30b   : > { %5208 = vst.msk [vmem:[#allocation4 + $0x80] sm:$0xff] %vm1246_vm10, %v5176_v54  ;;  %v5177_v18 = vadd.f32 %v5100_v16, %v4919_v8  ;;  %v4932_v8 = vld [vmem:[#allocation4 + $0xf0] sm:$0xff] }
 0x30c   : > { %5211 = vst.msk [vmem:[#allocation4 + $0x98] sm:$0xff] %vm1246_vm10, %v5179_v10  ;;  %v5328_v13 = vpack.c.bf16 %v5298_v14, %v5297_v5  ;;  %v5228_v10 = vld [vmem:[#allocation4 + $0x20] sm:$0xff]  ;;  %v5234_v5 = vld [vmem:[#allocation4 + $0x50] sm:$0xff] }
 0x30d   : > { %5209 = vst.msk [vmem:[#allocation4 + $0x88] sm:$0xff] %vm1246_vm10, %v5177_v18 }
 0x30f   : > { %v6673_v58 = vpop.f32.mrb[148].mxu1 }
 0x310   : > { %v5182_v35 = vadd.f32 %v6673_v58, %v4924_v26  ;;  %v5113_v50 = vpop.f32.mrb[149].mxu1  ;;  %v4930_v26 = vld [vmem:[#allocation4 + $0xe0] sm:$0xff] }
 0x311   : > { %v5180_v34 = vadd.f32 %v5113_v50, %v4922_v42  ;;  %v6674_v30 = vpop.f32.mrb[150].mxu1  ;;  %v5242_v51 = vld [vmem:[#allocation4 + $0x90] sm:$0xff]  ;;  %v4933_v42 = vld [vmem:[#allocation4 + $0xf8] sm:$0xff] }
 0x312   : > { %5214 = vst.msk [vmem:[#allocation4 + $0xb0] sm:$0xff] %vm1246_vm10, %v5182_v35  ;;  %v5183_v45 = vadd.f32 %v6674_v30, %v4925_v15  ;;  %v5116_v29 = vpop.f32.mrb[151].mxu1  ;;  %v5240_v4 = vld [vmem:[#allocation4 + $0x80] sm:$0xff]  ;;  %v5281_v39 = vadd.f32 %v8210_v28, %v5242_v51  ;;  %v5267_v15 = vadd.f32 %v8210_v28, %v5228_v10  ;;  %v5273_v10 = vadd.f32 %v8210_v28, %v5234_v5 }
 0x313   : > { %5212 = vst.msk [vmem:[#allocation4 + $0xa0] sm:$0xff] %vm1246_vm10, %v5180_v34  ;;  %v5181_v47 = vadd.f32 %v5116_v29, %v4923_v41  ;;  %v5279_v25 = vadd.f32 %v8210_v28, %v5240_v4  ;;  %v5243_v46 = vld [vmem:[#allocation4 + $0x98] sm:$0xff]  ;;  %v5357_v41 = vsel %vm1246_vm10, %v5328_v13, 0 }
 0x314   : > { %5215 = vst.msk [vmem:[#allocation4 + $0xb8] sm:$0xff] %vm1246_vm10, %v5183_v45  ;;  %v5241_v20 = vld [vmem:[#allocation4 + $0x88] sm:$0xff]  ;;  %v5282_v61 = vadd.f32 %v8210_v28, %v5243_v46  ;;  %v5313_v31 = vmax.f32 %v5281_v39, 0.0  ;;  %v5299_v46 = vmax.f32 %v5267_v15, 0.0 }
 0x315   : > { %5213 = vst.msk [vmem:[#allocation4 + $0xa8] sm:$0xff] %vm1246_vm10, %v5181_v47  ;;  %v5280_v37 = vadd.f32 %v8210_v28, %v5241_v20  ;;  %v5311_v53 = vmax.f32 %v5279_v25, 0.0  ;;  %v5300_v47 = vmax.f32 %v5268_v19, 0.0  ;;  %v5230_v20 = vld [vmem:[#allocation4 + $0x30] sm:$0xff] }
 0x316   : > { %v5314_v63 = vmax.f32 %v5282_v61, 0.0  ;;  %v5269_v22 = vadd.f32 %v8210_v28, %v5230_v20 }
 0x317   : > { %v6677_v7 = vpop.f32.mrb[152].mxu1  ;;  %v5312_v24 = vmax.f32 %v5280_v37, 0.0  ;;  %v5329_v61 = vpack.c.bf16 %v5300_v47, %v5299_v46  ;;  %v5239_v47 = vld [vmem:[#allocation4 + $0x78] sm:$0xff]  ;;  %v5238_v46 = vld [vmem:[#allocation4 + $0x70] sm:$0xff] }
 0x318   : > { %v5186_v57 = vadd.f32 %v6677_v7, %v4928_v56  ;;  %v5129_v36 = vpop.f32.mrb[153].mxu1  ;;  %v5336_v3 = vpack.c.bf16 %v5314_v63, %v5313_v31  ;;  %v5233_v63 = vld [vmem:[#allocation4 + $0x48] sm:$0xff] }
 0x319   : > { %v5184_v23 = vadd.f32 %v5129_v36, %v4926_v48  ;;  %v6678_v59 = vpop.f32.mrb[154].mxu1  ;;  %v5335_v12 = vpack.c.bf16 %v5312_v24, %v5311_v53  ;;  %v5246_v29 = vld [vmem:[#allocation4 + $0xb0] sm:$0xff]  ;;  %v5360_v7 = vsel %vm1246_vm10, %v5329_v61, 0  ;;  %v5302_v24 = vmax.f32 %v5270_v33, 0.0  ;;  %v5232_v36 = vld [vmem:[#allocation4 + $0x40] sm:$0xff] }
 0x31a   : > { %5218 = vst.msk [vmem:[#allocation4 + $0xd0] sm:$0xff] %vm1246_vm10, %v5186_v57  ;;  %v5187_v60 = vadd.f32 %v6678_v59, %v4929_v17  ;;  %v5132_v43 = vpop.f32.mrb[155].mxu1  ;;  %v5244_v0 = vld [vmem:[#allocation4 + $0xa0] sm:$0xff]  ;;  %v5285_v49 = vadd.f32 %v8210_v28, %v5246_v29  ;;  %v5301_v57 = vmax.f32 %v5269_v22, 0.0  ;;  %v5272_v17 = vadd.f32 %v8210_v28, %v5233_v63 }
 0x31b   : > { %5216 = vst.msk [vmem:[#allocation4 + $0xc0] sm:$0xff] %vm1246_vm10, %v5184_v23  ;;  %v5185_v44 = vadd.f32 %v5132_v43, %v4927_v62  ;;  %6683 = vmatprep.subr.msk.bf16.mxu0 %vm1246_vm10, %v5335_v12  ;;  %v5283_v54 = vadd.f32 %v8210_v28, %v5244_v0  ;;  %v5247_v27 = vld [vmem:[#allocation4 + $0xb8] sm:$0xff]  ;;  %v5271_v31 = vadd.f32 %v8210_v28, %v5232_v36 }
 0x31c   : > { %5219 = vst.msk [vmem:[#allocation4 + $0xd8] sm:$0xff] %vm1246_vm10, %v5187_v60  ;;  %6198 = vmatpush3.bf16.xpose.msra.mxu0 %v5354_v2  ;;  %v5245_v38 = vld [vmem:[#allocation4 + $0xa8] sm:$0xff]  ;;  %v5286_v25 = vadd.f32 %v8210_v28, %v5247_v27  ;;  %v5317_v52 = vmax.f32 %v5285_v49, 0.0  ;;  %v5330_v11 = vpack.c.bf16 %v5302_v24, %v5301_v57  ;;  %v5304_v14 = vmax.f32 %v5272_v17, 0.0 }
 0x31d   : > { %5217 = vst.msk [vmem:[#allocation4 + $0xc8] sm:$0xff] %vm1246_vm10, %v5185_v44  ;;  %6684 = vmatprep.subr.msk.bf16.mxu0 %vm1246_vm10, %v5336_v3  ;;  %v5284_v9 = vadd.f32 %v8210_v28, %v5245_v38  ;;  %v5315_v34 = vmax.f32 %v5283_v54, 0.0  ;;  %v5235_v44 = vld [vmem:[#allocation4 + $0x58] sm:$0xff]  ;;  %v5303_v2 = vmax.f32 %v5271_v31, 0.0  ;;  %v5278_v61 = vadd.f32 %v8210_v28, %v5239_v47 }
 0x31e   : > { %v5318_v37 = vmax.f32 %v5286_v25, 0.0  ;;  %v5363_v62 = vsel %vm1246_vm10, %v5330_v11, 0  ;;  %v5274_v54 = vadd.f32 %v8210_v28, %v5235_v44  ;;  %v5277_v33 = vadd.f32 %v8210_v28, %v5238_v46 }
 0x31f   : > { %v6681_v16 = vpop.f32.mrb[156].mxu1  ;;  %v5316_v18 = vmax.f32 %v5284_v9, 0.0  ;;  %v5331_v38 = vpack.c.bf16 %v5304_v14, %v5303_v2  ;;  %v5310_v22 = vmax.f32 %v5278_v61, 0.0 }
 0x320   : > { %v5190_v21 = vadd.f32 %v6681_v16, %v4932_v8  ;;  %v5145_v58 = vpop.f32.mrb[157].mxu1  ;;  %v5338_v53 = vpack.c.bf16 %v5318_v37, %v5317_v52  ;;  %v5306_v19 = vmax.f32 %v5274_v54, 0.0 }
 0x321   : > { %v5188_v35 = vadd.f32 %v5145_v58, %v4930_v26  ;;  %v6682_v50 = vpop.f32.mrb[158].mxu1  ;;  %v5337_v51 = vpack.c.bf16 %v5316_v18, %v5315_v34  ;;  %v5250_v60 = vld [vmem:[#allocation4 + $0xd0] sm:$0xff]  ;;  %v5366_v16 = vsel %vm1246_vm10, %v5331_v38, 0  ;;  %v5237_v26 = vld [vmem:[#allocation4 + $0x68] sm:$0xff]  ;;  %v5305_v58 = vmax.f32 %v5273_v10, 0.0 }
 0x322   : > { %5222 = vst.msk [vmem:[#allocation4 + $0xf0] sm:$0xff] %vm1246_vm10, %v5190_v21  ;;  %v5191_v30 = vadd.f32 %v6682_v50, %v4933_v42  ;;  %v5148_v45 = vpop.f32.mrb[159].mxu1  ;;  %v5248_v56 = vld [vmem:[#allocation4 + $0xc0] sm:$0xff]  ;;  %v5289_v3 = vadd.f32 %v8210_v28, %v5250_v60  ;;  %v5276_v34 = vadd.f32 %v8210_v28, %v5237_v26 }
 0x323   : > { %5220 = vst.msk [vmem:[#allocation4 + $0xe0] sm:$0xff] %vm1246_vm10, %v5188_v35  ;;  %v5189_v4 = vadd.f32 %v5148_v45, %v4931_v32  ;;  %v5287_v48 = vadd.f32 %v8210_v28, %v5248_v56  ;;  %v5251_v59 = vld [vmem:[#allocation4 + $0xd8] sm:$0xff]  ;;  %v5236_v35 = vld [vmem:[#allocation4 + $0x60] sm:$0xff]  ;;  %v5332_v42 = vpack.c.bf16 %v5306_v19, %v5305_v58  ;;  %v5309_v56 = vmax.f32 %v5277_v33, 0.0 }
 0x324   : > { %5223 = vst.msk [vmem:[#allocation4 + $0xf8] sm:$0xff] %vm1246_vm10, %v5191_v30  ;;  %6200 = vmatpush3.bf16.xpose.msra.mxu0 %v5357_v41  ;;  %v5249_v39 = vld [vmem:[#allocation4 + $0xc8] sm:$0xff]  ;;  %v5290_v0 = vadd.f32 %v8210_v28, %v5251_v59  ;;  %v5321_v13 = vmax.f32 %v5289_v3, 0.0  ;;  %v5275_v32 = vadd.f32 %v8210_v28, %v5236_v35 }
 0x325   : > { %5221 = vst.msk [vmem:[#allocation4 + $0xe8] sm:$0xff] %vm1246_vm10, %v5189_v4  ;;  %6685 = vmatprep.subr.msk.bf16.mxu0 %vm1246_vm10, %v5337_v51  ;;  %v5288_v55 = vadd.f32 %v8210_v28, %v5249_v39  ;;  %v5319_v12 = vmax.f32 %v5287_v48, 0.0  ;;  %v5369_v41 = vsel %vm1246_vm10, %v5332_v42, 0  ;;  %v5308_v4 = vmax.f32 %v5276_v34, 0.0 }
 0x326   : > { %v5322_v6 = vmax.f32 %v5290_v0, 0.0  ;;  %v5307_v25 = vmax.f32 %v5275_v32, 0.0 }
 0x327   : > { %v5320_v23 = vmax.f32 %v5288_v55, 0.0 }
 0x328   : > { %v5340_v18 = vpack.c.bf16 %v5322_v6, %v5321_v13  ;;  %v5333_v49 = vpack.c.bf16 %v5308_v4, %v5307_v25 }
 0x329   : > { %v5339_v43 = vpack.c.bf16 %v5320_v23, %v5319_v12  ;;  %v5254_v45 = vld [vmem:[#allocation4 + $0xf0] sm:$0xff] }
 0x32a   : > { %v5252_v8 = vld [vmem:[#allocation4 + $0xe0] sm:$0xff]  ;;  %v5293_v1 = vadd.f32 %v8210_v28, %v5254_v45  ;;  %v5372_v39 = vsel %vm1246_vm10, %v5333_v49, 0 }
 0x32b   : > { %v5291_v27 = vadd.f32 %v8210_v28, %v5252_v8  ;;  %v5255_v15 = vld [vmem:[#allocation4 + $0xf8] sm:$0xff] }
 0x32c   : > { %6202 = vmatpush3.bf16.xpose.msra.mxu0 %v5360_v7  ;;  %v5253_v9 = vld [vmem:[#allocation4 + $0xe8] sm:$0xff]  ;;  %v5294_v51 = vadd.f32 %v8210_v28, %v5255_v15  ;;  %v5325_v37 = vmax.f32 %v5293_v1, 0.0  ;;  %v5334_v7 = vpack.c.bf16 %v5310_v22, %v5309_v56 }
 0x32d   : > { %6686 = vmatprep.subr.msk.bf16.mxu0 %vm1246_vm10, %v5338_v53  ;;  %v5292_v21 = vadd.f32 %v8210_v28, %v5253_v9  ;;  %v5323_v30 = vmax.f32 %v5291_v27, 0.0 }
 0x32e   : > { %v5326_v20 = vmax.f32 %v5294_v51, 0.0  ;;  %v5375_v53 = vsel %vm1246_vm10, %v5334_v7, 0 }
 0x32f   : > { %v5324_v50 = vmax.f32 %v5292_v21, 0.0 }
 0x330   : > { %v5342_v52 = vpack.c.bf16 %v5326_v20, %v5325_v37 }
 0x331   : > { %v5341_v29 = vpack.c.bf16 %v5324_v50, %v5323_v30 }
 0x334   : > { %6204 = vmatpush3.bf16.xpose.msra.mxu0 %v5363_v62 }
 0x335   : > { %6687 = vmatprep.subr.msk.bf16.mxu0 %vm1246_vm10, %v5339_v43 }
 0x33c   : > { %6206 = vmatpush3.bf16.xpose.msra.mxu0 %v5366_v16 }
 0x33d   : > { %6688 = vmatprep.subr.msk.bf16.mxu0 %vm1246_vm10, %v5340_v18 }
 0x344   : > { %6208 = vmatpush3.bf16.xpose.msra.mxu0 %v5369_v41 }
 0x345   : > { %6689 = vmatprep.subr.msk.bf16.mxu0 %vm1246_vm10, %v5341_v29 }
 0x34a   : > { %v5348_v24 = vpop.permute.xlu0 %5347 }
 0x34c   : > { %6210 = vmatpush3.bf16.xpose.msra.mxu0 %v5372_v39 }
 0x34d   : > { %6690 = vmatprep.subr.msk.bf16.mxu0 %vm1246_vm10, %v5342_v52 }
 0x354   : > { %6212 = vmatpush3.bf16.xpose.msra.mxu0 %v5375_v53 }
 0x35b   : > { %6214 = vmatmul.mubr.msk.bf16.vlgmr.msra.gmra.mrb[160].mxu0 %vm1246_vm10, %v8156_v40 }
 0x42e   : > { %v5435_v55 = vpop.f32.mrb[160].mxu0 }
 0x42f   : > { %v5436_v63 = vadd.f32 %v5435_v55, %v5348_v24  ;;  %v5437_v57 = vpop.f32.mrb[161].mxu0 }
 0x430   : > { %v5438_v28 = vadd.f32 %v5437_v57, %v5348_v24  ;;  %v5439_v48 = vpop.f32.mrb[162].mxu0 }
 0x431   : > { %v5442_v36 = vrot.slane %v5436_v63, 4  ;;  %v5440_v11 = vpop.f32.mrb[163].mxu0 }
 0x432   : > { %v5448_v23 = vrot.slane %v5438_v28, 4 }
 0x433   : > { %v5443_v17 = vmax.f32 %v5436_v63, %v5442_v36 }
 0x434   : > { %v5449_v59 = vmax.f32 %v5438_v28, %v5448_v23 }
 0x435   : > { %v5444_v12 = vrot.slane %v5443_v17, 2 }
 0x436   : > { %v5450_v31 = vrot.slane %v5449_v59, 2 }
 0x437   : > { %v5445_v60 = vmax.f32 %v5443_v17, %v5444_v12 }
 0x438   : > { %v5451_v62 = vmax.f32 %v5449_v59, %v5450_v31 }
 0x439   : > { %v5446_v43 = vrot.slane %v5445_v60, 1 }
 0x43a   : > { %v5452_v14 = vrot.slane %v5451_v62, 1 }
 0x43b   : > { %v5447_v0 = vmax.f32 %v5445_v60, %v5446_v43 }
 0x43c   : > { %v5453_v44 = vmax.f32 %v5451_v62, %v5452_v14 }
 0x43d   : > { %v5454_v40 = vsub.f32 %v5436_v63, %v5447_v0 }
 0x43e   : > { %v5455_v2 = vsub.f32 %v5438_v28, %v5453_v44 }
 0x43f   : > { %v5456_v3 = vmul.f32 1.442695, %v5454_v40 }
 0x440   : > { %v5458_v5 = vmul.f32 1.442695, %v5455_v2 }
 0x441   : > { %6913 = vpow2.f32 %v5456_v3 }
 0x442   : > { %6915 = vpow2.f32 %v5458_v5 }
 0x44b   : > { %v6914_v38 = vpop.eup %6913 }
 0x44c   : > { %v6916_v6 = vpop.eup %6915  ;;  %v5460_v54 = vrot.slane %v6914_v38, 4 }
 0x44d   : > { %v5466_v9 = vrot.slane %v6916_v6, 4 }
 0x44e   : > { %v5461_v13 = vadd.f32 %v6914_v38, %v5460_v54 }
 0x44f   : > { %v5467_v10 = vadd.f32 %v6916_v6, %v5466_v9 }
 0x450   : > { %v5462_v8 = vrot.slane %v5461_v13, 2 }
 0x451   : > { %v5468_v16 = vrot.slane %v5467_v10, 2 }
 0x452   : > { %v5463_v18 = vadd.f32 %v5462_v8, %v5461_v13 }
 0x453   : > { %v5469_v19 = vadd.f32 %v5468_v16, %v5467_v10 }
 0x454   : > { %v5464_v21 = vrot.slane %v5463_v18, 1 }
 0x455   : > { %v5470_v26 = vrot.slane %v5469_v19, 1 }
 0x456   : > { %v5465_v58 = vadd.f32 %v5464_v21, %v5463_v18 }
 0x457   : > { %v5471_v27 = vadd.f32 %v5470_v26, %v5469_v19 }
 0x458   : > { %6917 = vrcp.f32 %v5465_v58 }
 0x459   : > { %6919 = vrcp.f32 %v5471_v27 }
 0x462   : > { %v6918_v35 = vpop.eup %6917 }
 0x463   : > { %v6920_v42 = vpop.eup %6919  ;;  %v5474_v50 = vmul.f32 %v6918_v35, %v5465_v58 }
 0x464   : > { %v5475_v34 = vmul.f32 %v6920_v42, %v5471_v27 }
 0x465   : > { %v5476_v15 = vsub.f32 2.0, %v5474_v50 }
 0x466   : > { %v5477_v30 = vsub.f32 2.0, %v5475_v34 }
 0x467   : > { %v5478_v32 = vmul.f32 %v6918_v35, %v5476_v15 }
 0x468   : > { %v5479_v45 = vmul.f32 %v6920_v42, %v5477_v30 }
 0x469   : > { %v5480_v41 = vmul.f32 %v6914_v38, %v5478_v32 }
 0x46a   : > { %v5481_v29 = vmul.f32 %v6916_v6, %v5479_v45 }
 0x46b   : > { %5482 = vst [vmem:[%s271_s23] sm:$0xff] %v5480_v41 }
 0x46c   : > { %5483 = vst [vmem:[%s271_s23 + $0x8] sm:$0xff] %v5481_v29 }
 0x46d   : > { %6934 = shalt.err (!%p6931_p3)
}
 0x46e   : > { %s6935_s18 = scalar_lea.hbm %s8279_s13, 256  ;;  %s6939_s21 = scalar_lea.hbm %s8328_s7, 512 }
 0x46f   : > { %p6936_p4 = scmp.ne.s32.totalorder %s8279_s13, %s6935_s18  ;;  %p6940_p9 = scmp.lt.u32.totalorder %s8279_s13, %s8328_s7 }
 0x470   : > { %p6941_p10 = scmp.lt.u32.totalorder %s6939_s21, %s6935_s18  ;;  %p6943_p12 = scmp.lt.u32.totalorder %s6935_s18, %s8279_s13 }
 0x471   : > { %p6937_p7 = pnand %p6936_p4, %p7066_p5 }
 0x472   : > { %p6942_p11 = por %p6941_p10, %p6940_p9 }
 0x473   : > { %p6938_p8 = pneg %p6937_p7 }
 0x474   : > { %p6944_p13 = por %p6943_p12, %p6942_p11 }
 0x476   : > { %p6945_p0 = pnand %p6944_p13, %p6938_p8 }
 0x478   : > { %6948 = shalt.err (!%p6945_p0)
}
 0x479   : > { %6691 = dma.vmem_to_hbm [thread:$0]  (%p7066_p5), %s8281_s29, 256, %s8279_s13, %s5485_s14  }
 0x47a PF: > { %p6697_p1 = scmp.ge.s32.totalorder %s6983_s27, 2  ;;  %s5511_s8 = sand.u32 1, %s6971_s24  }
 0x47b   : > { %s5512_s9 = scalar_lea.sflag [#allocation6], %s5511_s8 }
 0x47c   : > { %p6694_p2 = pnand %p6697_p1, %p7070_p6 }
 0x47e   : > { %6966 = dma.done.wait (!%p6694_p2), %s5512_s9, 256  }
 0x47f   : > { %6968 = vsyncadd (!%p6694_p2), %s5512_s9, 4294967040  ;;  %p17_p3 = scmp.ge.s32.totalorder %s7053_s30, 4   ;;  %s8337_s24 = smov %s6975_s25 }
 0x480   : > { %s8338_s25 = smov %s6979_s26  ;;  %s8339_s26 = smov %s7064_s10 }
 0x481   : > { %s8340_s27 = smov %s7053_s30  ;;  %19 = sbr.rel (!%p17_p3) target bundleno = 3 (0x3), region = 94 }
 0x488   :  { %5517 = vsyncpa [#allocation6], 1 }
 0x489   :  { %5519 = vsyncpa [#allocation6 + $0x1], 1 }

</bundles_post_ra>
